<compile_context>
chip_gen: v6e
topology: v6e:2x2x1
jax: 0.10.0
libtpu: 0.0.40
codegen_flags: <defaults>
</compile_context>

<pallas_src>
import jax
import jax.numpy as jnp
from jax.experimental import pallas as pl
from jax.experimental.pallas import tpu as pltpu


def _dim_net_kernel(x_ref, w_ref, b_ref, o_ref):
    # Linear: (tb, K) @ (K, N) in f32 on the MXU, + f32 bias row.
    logits = jnp.dot(x_ref[...], w_ref[...], preferred_element_type=jnp.float32)
    logits = logits + b_ref[...]

    # Numerically stable softmax over the feature axis (all f32).
    m = jnp.max(logits, axis=-1, keepdims=True)
    e = jnp.exp(logits - m)
    denom = jnp.sum(e, axis=-1, keepdims=True)
    probs = e * pl.reciprocal(denom, approx=False)

    # o_ref is either (tb, N) (plain layout; reshape is a no-op) or
    # (tb*N//128, 128) (lane-dense; packs 8 consecutive rows into one
    # 128-lane row -> unmasked dense stores and a dense output DMA).
    o_ref[...] = probs.reshape(o_ref.shape).astype(o_ref.dtype)


def _pallas_forward(x, w, b2d, *, tb, lane_dense):
    B, K = x.shape
    N = w.shape[1]
    grid = (pl.cdiv(B, tb),)

    if lane_dense:
        out_rows = (B * N) // 128
        blk_rows = (tb * N) // 128
        out_shape = jax.ShapeDtypeStruct((out_rows, 128), jnp.float32)
        out_spec = pl.BlockSpec((blk_rows, 128), lambda i: (i, 0))
    else:
        out_shape = jax.ShapeDtypeStruct((B, N), jnp.float32)
        out_spec = pl.BlockSpec((tb, N), lambda i: (i, 0))

    out = pl.pallas_call(
        _dim_net_kernel,
        out_shape=out_shape,
        grid_spec=pltpu.PrefetchScalarGridSpec(
            num_scalar_prefetch=0,
            grid=grid,
            in_specs=[
                pl.BlockSpec((tb, K), lambda i: (i, 0)),   # activation tile (native f32)
                pl.BlockSpec((K, N), lambda i: (0, 0)),    # full weight, VMEM-resident
                pl.BlockSpec((1, N), lambda i: (0, 0)),    # bias row
            ],
            out_specs=out_spec,
        ),
        compiler_params=pltpu.CompilerParams(
            dimension_semantics=("parallel",),
        ),
    )(x, w, b2d)

    if lane_dense:
        out = out.reshape(B, N)   # contiguous row-major: pure metadata reshape
    return out


def dimension_network_forward(x, w, b, *, tb=1024, lane_dense=None):
    """Forward pass of dimensionNetwork: softmax(x @ w + b, axis=-1).

    x: (B, original_size) f32;  w: (original_size, new_size) f32 (already
    stored as (in_features, out_features));  b: (new_size,) f32.
    Returns (B, new_size) f32 probabilities.
    """
    B, K = x.shape
    Kw, N = w.shape
    assert K == Kw, "weight must be stored as (original_size, new_size)"

    # Batch tile: as large as requested but never larger than the batch; when
    # it actually tiles the batch it must respect the (8, 128) sublane rule.
    tb = min(tb, B)
    if tb < B:
        tb = max(8, (tb // 8) * 8)

    b2d = b.astype(jnp.float32).reshape(1, N)

    # Lane-dense output layout is only expressible when every block (and the
    # full array) repacks into whole, 8-sublane-aligned 128-lane rows.
    blk_rows = (tb * N) // 128
    lane_dense_ok = (
        (B * N) % 128 == 0
        and (tb * N) % 128 == 0
        and (blk_rows % 8 == 0 or tb == B)
    )
    if lane_dense is None:
        lane_dense = lane_dense_ok
    elif lane_dense and not lane_dense_ok:
        lane_dense = False

    if lane_dense:
        # Feature-detect: some Mosaic builds cannot lower the in-kernel
        # (tb, N) -> (tb*N/128, 128) shape cast; fall back to the plain layout.
        # TODO(synk): this eager probe is bypassed if callers jit this wrapper;
        # in that case pass lane_dense=False explicitly if lowering fails.
        try:
            return _pallas_forward(x, w, b2d, tb=tb, lane_dense=True)
        except Exception:
            pass
    return _pallas_forward(x, w, b2d, tb=tb, lane_dense=False)


def init_params(key, original_size, new_size):
    """Deterministic init mimicking PyTorch nn.Linear defaults (+-1/sqrt(fan_in))."""
    kw, kb = jax.random.split(key)
    bound = 1.0 / (original_size ** 0.5)
    # Stored already transposed: (in_features, out_features).
    w = jax.random.uniform(
        kw, (original_size, new_size), jnp.float32, minval=-bound, maxval=bound
    )
    b = jax.random.uniform(
        kb, (new_size,), jnp.float32, minval=-bound, maxval=bound
    )
    return w, b


def _reference(x, w, b):
    logits = jnp.dot(
        x, w, preferred_element_type=jnp.float32,
        precision=jax.lax.Precision.HIGHEST,
    ) + b.astype(jnp.float32)
    return jax.nn.softmax(logits, axis=-1)


if __name__ == "__main__":
    original_size = 768
    new_size = 16
    batch = 512

    key = jax.random.PRNGKey(0)
    kx, kp = jax.random.split(key)
    x = jax.random.normal(kx, (batch, original_size), jnp.float32)
    w, b = init_params(kp, original_size, new_size)

    out = jax.block_until_ready(dimension_network_forward(x, w, b))
    ref = _reference(x, w, b)
    assert out.shape == (batch, new_size)
    assert jnp.allclose(out, ref, atol=5e-3, rtol=0.0)
    assert jnp.allclose(jnp.sum(out, axis=-1), jnp.ones((batch,)), atol=1e-3)

    # Non-divisible batch exercises the cdiv / partial-final-block path and the
    # plain-layout fallback (100*16 is not a multiple of 128 lanes).
    x_small = x[:100]
    out_small = jax.block_until_ready(
        dimension_network_forward(x_small, w, b, tb=64)
    )
    assert out_small.shape == (100, new_size)
    assert jnp.allclose(out_small, ref[:100], atol=5e-3, rtol=0.0)

    print("KERNEL_OK")
</pallas_src>

<mosaic_0001>
module attributes {stable_mosaic.version = 11 : i64} {
  func.func @_dim_net_kernel(%arg0: i32, %arg1: memref<512x768xf32, #tpu.memory_space<vmem>>, %arg2: memref<768x16xf32, #tpu.memory_space<vmem>>, %arg3: memref<1x16xf32, #tpu.memory_space<vmem>>, %arg4: memref<64x128xf32, #tpu.memory_space<vmem>>) attributes {dimension_semantics = [#tpu.dimension_semantics<parallel>], iteration_bounds = array<i64: 1>, scalar_prefetch = 0 : i64, scratch_operands = 0 : i64, tpu.core_type = #tpu.core_type<tc>, window_params = [{transform_indices = @transform_0, window_bounds = array<i64: 512, 768>}, {pipeline_mode = #tpu.pipeline_mode<synchronous>, transform_indices = @transform_1, window_bounds = array<i64: 768, 16>}, {pipeline_mode = #tpu.pipeline_mode<synchronous>, transform_indices = @transform_2, window_bounds = array<i64: 1, 16>}, {transform_indices = @transform_3, window_bounds = array<i64: 64, 128>}]} {
    %c0 = arith.constant 0 : index
    %c0_0 = arith.constant 0 : index
    %0 = vector.load %arg1[%c0, %c0_0] : memref<512x768xf32, #tpu.memory_space<vmem>>, vector<512x768xf32>
    %c0_1 = arith.constant 0 : index
    %c0_2 = arith.constant 0 : index
    %1 = vector.load %arg2[%c0_1, %c0_2] : memref<768x16xf32, #tpu.memory_space<vmem>>, vector<768x16xf32>
    %cst = arith.constant dense<0.000000e+00> : vector<512x16xf32>
    %2 = tpu.matmul %0, %1, %cst {dimension_numbers = #tpu.dot_dimension_numbers<[1], [0], [0], [1], [0, 0, 1, 1], [], []>} : vector<512x768xf32>, vector<768x16xf32>, vector<512x16xf32> -> vector<512x16xf32>
    %c0_3 = arith.constant 0 : index
    %c0_4 = arith.constant 0 : index
    %3 = vector.load %arg3[%c0_3, %c0_4] : memref<1x16xf32, #tpu.memory_space<vmem>>, vector<1x16xf32>
    %4 = vector.broadcast %3 : vector<1x16xf32> to vector<512x16xf32>
    %5 = arith.addf %2, %4 : vector<512x16xf32>
    %cst_5 = arith.constant dense<0xFF800000> : vector<512xf32>
    %6 = vector.multi_reduction <maximumf>, %5, %cst_5 [1] : vector<512x16xf32> to vector<512xf32>
    %7 = vector.shape_cast %6 : vector<512xf32> to vector<512x1xf32>
    %8 = vector.broadcast %7 : vector<512x1xf32> to vector<512x16xf32>
    %9 = arith.subf %5, %8 : vector<512x16xf32>
    %10 = math.exp %9 : vector<512x16xf32>
    %cst_6 = arith.constant dense<0.000000e+00> : vector<512xf32>
    %11 = vector.multi_reduction <add>, %10, %cst_6 [1] : vector<512x16xf32> to vector<512xf32>
    %12 = vector.shape_cast %11 : vector<512xf32> to vector<512x1xf32>
    %13 = tpu.reciprocal %12 : vector<512x1xf32> -> vector<512x1xf32>
    %14 = vector.broadcast %13 : vector<512x1xf32> to vector<512x16xf32>
    %15 = arith.mulf %10, %14 : vector<512x16xf32>
    %16 = vector.shape_cast %15 : vector<512x16xf32> to vector<64x128xf32>
    %c0_7 = arith.constant 0 : index
    %c0_8 = arith.constant 0 : index
    %17 = vector.load %arg4[%c0_7, %c0_8] : memref<64x128xf32, #tpu.memory_space<vmem>>, vector<64x128xf32>
    tpu.vector_store %arg4[%c0_7, %c0_8], %16 {strides = array<i32>} : memref<64x128xf32, #tpu.memory_space<vmem>>, vector<64x128xf32>,
    return
  }
  func.func @transform_0(%arg0: i32) -> (i32, i32) {
    %c0_i32 = arith.constant 0 : i32
    %c0_i32_0 = arith.constant 0 : i32
    return %arg0, %c0_i32 : i32, i32
  }
  func.func @transform_1(%arg0: i32) -> (i32, i32) {
    %c0_i32 = arith.constant 0 : i32
    %c0_i32_0 = arith.constant 0 : i32
    %c0_i32_1 = arith.constant 0 : i32
    return %c0_i32, %c0_i32_0 : i32, i32
  }
  func.func @transform_2(%arg0: i32) -> (i32, i32) {
    %c0_i32 = arith.constant 0 : i32
    %c0_i32_0 = arith.constant 0 : i32
    %c0_i32_1 = arith.constant 0 : i32
    return %c0_i32, %c0_i32_0 : i32, i32
  }
  func.func @transform_3(%arg0: i32) -> (i32, i32) {
    %c0_i32 = arith.constant 0 : i32
    %c0_i32_0 = arith.constant 0 : i32
    return %arg0, %c0_i32 : i32, i32
  }
}

module attributes {stable_mosaic.version = 11 : i64} {
  func.func @_dim_net_kernel(%arg0: i32, %arg1: memref<512x768xf32, #tpu.memory_space<vmem>>, %arg2: memref<768x16xf32, #tpu.memory_space<vmem>>, %arg3: memref<1x16xf32, #tpu.memory_space<vmem>>, %arg4: memref<512x16xf32, #tpu.memory_space<vmem>>) attributes {dimension_semantics = [#tpu.dimension_semantics<parallel>], iteration_bounds = array<i64: 1>, scalar_prefetch = 0 : i64, scratch_operands = 0 : i64, tpu.core_type = #tpu.core_type<tc>, window_params = [{transform_indices = @transform_0, window_bounds = array<i64: 512, 768>}, {pipeline_mode = #tpu.pipeline_mode<synchronous>, transform_indices = @transform_1, window_bounds = array<i64: 768, 16>}, {pipeline_mode = #tpu.pipeline_mode<synchronous>, transform_indices = @transform_2, window_bounds = array<i64: 1, 16>}, {transform_indices = @transform_3, window_bounds = array<i64: 512, 16>}]} {
    %c0 = arith.constant 0 : index
    %c0_0 = arith.constant 0 : index
    %0 = vector.load %arg1[%c0, %c0_0] : memref<512x768xf32, #tpu.memory_space<vmem>>, vector<512x768xf32>
    %c0_1 = arith.constant 0 : index
    %c0_2 = arith.constant 0 : index
    %1 = vector.load %arg2[%c0_1, %c0_2] : memref<768x16xf32, #tpu.memory_space<vmem>>, vector<768x16xf32>
    %cst = arith.constant dense<0.000000e+00> : vector<512x16xf32>
    %2 = tpu.matmul %0, %1, %cst {dimension_numbers = #tpu.dot_dimension_numbers<[1], [0], [0], [1], [0, 0, 1, 1], [], []>} : vector<512x768xf32>, vector<768x16xf32>, vector<512x16xf32> -> vector<512x16xf32>
    %c0_3 = arith.constant 0 : index
    %c0_4 = arith.constant 0 : index
    %3 = vector.load %arg3[%c0_3, %c0_4] : memref<1x16xf32, #tpu.memory_space<vmem>>, vector<1x16xf32>
    %4 = vector.broadcast %3 : vector<1x16xf32> to vector<512x16xf32>
    %5 = arith.addf %2, %4 : vector<512x16xf32>
    %cst_5 = arith.constant dense<0xFF800000> : vector<512xf32>
    %6 = vector.multi_reduction <maximumf>, %5, %cst_5 [1] : vector<512x16xf32> to vector<512xf32>
    %7 = vector.shape_cast %6 : vector<512xf32> to vector<512x1xf32>
    %8 = vector.broadcast %7 : vector<512x1xf32> to vector<512x16xf32>
    %9 = arith.subf %5, %8 : vector<512x16xf32>
    %10 = math.exp %9 : vector<512x16xf32>
    %cst_6 = arith.constant dense<0.000000e+00> : vector<512xf32>
    %11 = vector.multi_reduction <add>, %10, %cst_6 [1] : vector<512x16xf32> to vector<512xf32>
    %12 = vector.shape_cast %11 : vector<512xf32> to vector<512x1xf32>
    %13 = tpu.reciprocal %12 : vector<512x1xf32> -> vector<512x1xf32>
    %14 = vector.broadcast %13 : vector<512x1xf32> to vector<512x16xf32>
    %15 = arith.mulf %10, %14 : vector<512x16xf32>
    %c0_7 = arith.constant 0 : index
    %c0_8 = arith.constant 0 : index
    %16 = vector.load %arg4[%c0_7, %c0_8] : memref<512x16xf32, #tpu.memory_space<vmem>>, vector<512x16xf32>
    tpu.vector_store %arg4[%c0_7, %c0_8], %15 {strides = array<i32>} : memref<512x16xf32, #tpu.memory_space<vmem>>, vector<512x16xf32>,
    return
  }
  func.func @transform_0(%arg0: i32) -> (i32, i32) {
    %c0_i32 = arith.constant 0 : i32
    %c0_i32_0 = arith.constant 0 : i32
    return %arg0, %c0_i32 : i32, i32
  }
  func.func @transform_1(%arg0: i32) -> (i32, i32) {
    %c0_i32 = arith.constant 0 : i32
    %c0_i32_0 = arith.constant 0 : i32
    %c0_i32_1 = arith.constant 0 : i32
    return %c0_i32, %c0_i32_0 : i32, i32
  }
  func.func @transform_2(%arg0: i32) -> (i32, i32) {
    %c0_i32 = arith.constant 0 : i32
    %c0_i32_0 = arith.constant 0 : i32
    %c0_i32_1 = arith.constant 0 : i32
    return %c0_i32, %c0_i32_0 : i32, i32
  }
  func.func @transform_3(%arg0: i32) -> (i32, i32) {
    %c0_i32 = arith.constant 0 : i32
    %c0_i32_0 = arith.constant 0 : i32
    return %arg0, %c0_i32 : i32, i32
  }
}

</mosaic_0001>

<bundles_post_ra>
// kernel: tpu_custom_call.1
= control target key start
LH: loop header
LB: loop body
LE: loop exit
PB: predicated region body
PF: predicated region fallthrough
CT: control target
= control target key end

     0   :  { %8 = vsyncpa [#allocation3], 0  ;;  %s4431_s0 = inlined_call_operand.hbm [shape: f32[512,768], index: 0, kind: input, shape index: {}]   ;;  %s4432_s1 = inlined_call_operand.vmem [shape: f32[768,16], index: 1, kind: input, shape index: {}]   ;;  %s4433_s2 = inlined_call_operand.hbm [shape: f32[1,16], index: 2, kind: input, shape index: {}]   ;;  %s4434_s3 = inlined_call_operand.vmem [shape: f32[512,16], index: 3, kind: output, shape index: {}]  }
   0x1   :  { %9 = vsyncpa [#allocation5], 0  ;;  %s2828_s12 = smov [#allocation2]  }
   0x2   :  { %s15_s13 = sshll.u32 %s2828_s12, 4  ;;  %s16_s13 = int_to_ptr.vmem [resolvable:$true] %s15_s13 }
   0x3   :  { %s2792_s14 = scalar_lea.vmem %s16_s13, 49152  ;;  %p2797_p1 = scmp.lt.s32.totalorder %s16_s13, %s16_s13 }
   0x4   :  { %p2793_p0 = scmp.ne.s32.totalorder %s16_s13, %s2792_s14  ;;  %p2798_p2 = scmp.lt.s32.totalorder %s2792_s14, %s2792_s14 }
   0x6   :  { %p2799_p3 = por %p2798_p2, %p2797_p1 }
   0x8   :  { %p2800_p4 = pnand %p2799_p3, %p2793_p0 }
   0xa   :  { %2803 = shalt.err (!%p2800_p4)
}
   0xb   :  { %s2829_s15 = smov 768   ;;  %s2830_s16 = smov 48  }
   0xc   :  { %21 = dma.hbm_to_vmem [thread:$0]  %s4431_s0, 49152, %s16_s13, [#allocation3], %s2829_s15, %s2829_s15, %s2830_s16  }
   0xd   :  { %s2831_s19 = smov [#allocation4]  }
   0xe   :  { %s30_s20 = sshll.u32 %s2831_s19, 4  ;;  %s31_s20 = int_to_ptr.vmem [resolvable:$true] %s30_s20 }
   0xf   :  { %s2812_s21 = scalar_lea.vmem %s31_s20, 16  ;;  %s2816_s22 = scalar_lea.vmem %s31_s20, 32 }
  0x10   :  { %p2813_p5 = scmp.ne.s32.totalorder %s31_s20, %s2812_s21  ;;  %p2817_p6 = scmp.lt.s32.totalorder %s31_s20, %s31_s20 }
  0x11   :  { %p2818_p7 = scmp.lt.s32.totalorder %s2816_s22, %s2812_s21 }
  0x13   :  { %p2819_p8 = por %p2818_p7, %p2817_p6 }
  0x15   :  { %p2820_p9 = pnand %p2819_p8, %p2813_p5 }
  0x17   :  { %2823 = shalt.err (!%p2820_p9)
}
  0x18   :  { %33 = dma.hbm_to_vmem [thread:$0]  %s4433_s2, 16, %s31_s20, [#allocation5]  }
  0x19   :  { %2824 = dma.done.wait [#allocation3], 49152  }
  0x1a   :  { %2825 = vsyncadd [#allocation3], 4294918144 }
  0x1b   :  { %2826 = dma.done.wait [#allocation5], 16  }
  0x1c   :  { %2827 = vsyncadd [#allocation5], 4294967280  ;;  %v2832_v0 = vmov 0.0   ;;  %v439_v1 = vld [vmem:[%s4432_s1 + $0x78] sm:$0xff]  ;;  %v438_v2 = vld [vmem:[%s4432_s1 + $0x70] sm:$0xff]  ;;  %vm1682_vm0 = vcmask 130048  }
  0x1d   :  { %2458 = vmatprep.subr.mxu1 %v2832_v0  ;;  %527 = vmatprep.subr.mxu0 %v2832_v0  ;;  %v437_v3 = vld [vmem:[%s4432_s1 + $0x68] sm:$0xff]  ;;  %v436_v4 = vld [vmem:[%s4432_s1 + $0x60] sm:$0xff]  ;;  %v435_v5 = vld [vmem:[%s4432_s1 + $0x58] sm:$0xff] }
  0x1e   :  { %2490 = vmatpush1.msra.mxu1 %v439_v1  ;;  %528 = vmatpush1.msra.mxu0 %v439_v1  ;;  %v434_v6 = vld [vmem:[%s4432_s1 + $0x50] sm:$0xff]  ;;  %v433_v7 = vld [vmem:[%s4432_s1 + $0x48] sm:$0xff]  ;;  %v432_v8 = vld [vmem:[%s4432_s1 + $0x40] sm:$0xff] }
  0x1f   :  { %2459 = vmatprep.subr.mxu1 %v2832_v0  ;;  %529 = vmatprep.subr.mxu0 %v2832_v0  ;;  %v431_v9 = vld [vmem:[%s4432_s1 + $0x38] sm:$0xff]  ;;  %v430_v10 = vld [vmem:[%s4432_s1 + $0x30] sm:$0xff]  ;;  %v429_v11 = vld [vmem:[%s4432_s1 + $0x28] sm:$0xff] }
  0x20   :  { %2491 = vmatpush1.msra.mxu1 %v438_v2  ;;  %530 = vmatpush1.msra.mxu0 %v438_v2  ;;  %v428_v12 = vld [vmem:[%s4432_s1 + $0x20] sm:$0xff]  ;;  %v427_v13 = vld [vmem:[%s4432_s1 + $0x18] sm:$0xff]  ;;  %v426_v14 = vld [vmem:[%s4432_s1 + $0x10] sm:$0xff] }
  0x21   :  { %2460 = vmatprep.subr.mxu1 %v2832_v0  ;;  %531 = vmatprep.subr.mxu0 %v2832_v0  ;;  %v425_v15 = vld [vmem:[%s4432_s1 + $0x8] sm:$0xff]  ;;  %v424_v16 = vld [vmem:[%s4432_s1] sm:$0xff]  ;;  %v455_v17 = vld [vmem:[%s4432_s1 + $0xf8] sm:$0xff] }
  0x22   :  { %2492 = vmatpush1.msra.mxu1 %v437_v3  ;;  %532 = vmatpush1.msra.mxu0 %v437_v3  ;;  %v454_v18 = vld [vmem:[%s4432_s1 + $0xf0] sm:$0xff]  ;;  %v453_v19 = vld [vmem:[%s4432_s1 + $0xe8] sm:$0xff]  ;;  %v452_v20 = vld [vmem:[%s4432_s1 + $0xe0] sm:$0xff] }
  0x23   :  { %2461 = vmatprep.subr.mxu1 %v2832_v0  ;;  %533 = vmatprep.subr.mxu0 %v2832_v0  ;;  %v451_v21 = vld [vmem:[%s4432_s1 + $0xd8] sm:$0xff]  ;;  %v450_v22 = vld [vmem:[%s4432_s1 + $0xd0] sm:$0xff]  ;;  %v449_v23 = vld [vmem:[%s4432_s1 + $0xc8] sm:$0xff] }
  0x24   :  { %2493 = vmatpush1.msra.mxu1 %v436_v4  ;;  %534 = vmatpush1.msra.mxu0 %v436_v4  ;;  %v448_v24 = vld [vmem:[%s4432_s1 + $0xc0] sm:$0xff]  ;;  %v447_v25 = vld [vmem:[%s4432_s1 + $0xb8] sm:$0xff]  ;;  %v446_v26 = vld [vmem:[%s4432_s1 + $0xb0] sm:$0xff] }
  0x25   :  { %2462 = vmatprep.subr.mxu1 %v2832_v0  ;;  %535 = vmatprep.subr.mxu0 %v2832_v0  ;;  %v445_v27 = vld [vmem:[%s4432_s1 + $0xa8] sm:$0xff]  ;;  %v444_v28 = vld [vmem:[%s4432_s1 + $0xa0] sm:$0xff]  ;;  %v443_v29 = vld [vmem:[%s4432_s1 + $0x98] sm:$0xff] }
  0x26   :  { %2494 = vmatpush1.msra.mxu1 %v435_v5  ;;  %536 = vmatpush1.msra.mxu0 %v435_v5  ;;  %v442_v30 = vld [vmem:[%s4432_s1 + $0x90] sm:$0xff]  ;;  %v441_v31 = vld [vmem:[%s4432_s1 + $0x88] sm:$0xff]  ;;  %v440_v32 = vld [vmem:[%s4432_s1 + $0x80] sm:$0xff] }
  0x27   :  { %2463 = vmatprep.subr.mxu1 %v2832_v0  ;;  %537 = vmatprep.subr.mxu0 %v2832_v0  ;;  %v233_v33 = vld [vmem:[#allocation2 + $0x608] sm:$0xff]  ;;  %v232_v35 = vld [vmem:[#allocation2 + $0x600] sm:$0xff]  ;;  %v471_v37 = vld [vmem:[%s4432_s1 + $0x178] sm:$0xff] }
  0x28   :  { %2495 = vmatpush1.msra.mxu1 %v434_v6  ;;  %538 = vmatpush1.msra.mxu0 %v434_v6  ;;  %v41_v34 = vld [vmem:[#allocation2 + $0x8] sm:$0xff]  ;;  %v40_v36 = vld [vmem:[#allocation2] sm:$0xff]  ;;  %v239_v38 = vld [vmem:[#allocation2 + $0x638] sm:$0xff] }
  0x29   :  { %2464 = vmatprep.subr.mxu1 %v2832_v0  ;;  %539 = vmatprep.subr.mxu0 %v2832_v0  ;;  %v503_v39 = vld [vmem:[%s4432_s1 + $0x278] sm:$0xff]  ;;  %v238_v41 = vld [vmem:[#allocation2 + $0x630] sm:$0xff]  ;;  %v245_v44 = vld [vmem:[#allocation2 + $0x668] sm:$0xff] }
  0x2a   :  { %2496 = vmatpush1.msra.mxu1 %v433_v7  ;;  %540 = vmatpush1.msra.mxu0 %v433_v7  ;;  %v47_v40 = vld [vmem:[#allocation2 + $0x38] sm:$0xff]  ;;  %v46_v42 = vld [vmem:[#allocation2 + $0x30] sm:$0xff]  ;;  %v53_v46 = vld [vmem:[#allocation2 + $0x68] sm:$0xff] }
  0x2b   :  { %2465 = vmatprep.subr.mxu1 %v2832_v0  ;;  %541 = vmatprep.subr.mxu0 %v2832_v0  ;;  %v470_v43 = vld [vmem:[%s4432_s1 + $0x170] sm:$0xff]  ;;  %v244_v47 = vld [vmem:[#allocation2 + $0x660] sm:$0xff]  ;;  %v469_v49 = vld [vmem:[%s4432_s1 + $0x168] sm:$0xff] }
  0x2c   :  { %2497 = vmatpush1.msra.mxu1 %v432_v8  ;;  %542 = vmatpush1.msra.mxu0 %v432_v8  ;;  %v502_v45 = vld [vmem:[%s4432_s1 + $0x270] sm:$0xff]  ;;  %v52_v48 = vld [vmem:[#allocation2 + $0x60] sm:$0xff]  ;;  %v251_v50 = vld [vmem:[#allocation2 + $0x698] sm:$0xff] }
  0x2d   :  { %2466 = vmatprep.subr.mxu1 %v2832_v0  ;;  %543 = vmatprep.subr.mxu0 %v2832_v0  ;;  %v501_v51 = vld [vmem:[%s4432_s1 + $0x268] sm:$0xff]  ;;  %v59_v52 = vld [vmem:[#allocation2 + $0x98] sm:$0xff]  ;;  %v250_v53 = vld [vmem:[#allocation2 + $0x690] sm:$0xff] }
  0x2e   :  { %2498 = vmatpush1.msra.mxu1 %v431_v9  ;;  %544 = vmatpush1.msra.mxu0 %v431_v9  ;;  %v58_v54 = vld [vmem:[#allocation2 + $0x90] sm:$0xff]  ;;  %v468_v55 = vld [vmem:[%s4432_s1 + $0x160] sm:$0xff]  ;;  %v257_v56 = vld [vmem:[#allocation2 + $0x6c8] sm:$0xff] }
  0x2f   :  { %2467 = vmatprep.subr.mxu1 %v2832_v0  ;;  %545 = vmatprep.subr.mxu0 %v2832_v0  ;;  %v500_v57 = vld [vmem:[%s4432_s1 + $0x260] sm:$0xff]  ;;  %v65_v58 = vld [vmem:[#allocation2 + $0xc8] sm:$0xff]  ;;  %v467_v61 = vld [vmem:[%s4432_s1 + $0x158] sm:$0xff] }
  0x30   :  { %2499 = vmatpush1.msra.mxu1 %v430_v10  ;;  %546 = vmatpush1.msra.mxu0 %v430_v10  ;;  %v256_v59 = vld [vmem:[#allocation2 + $0x6c0] sm:$0xff]  ;;  %v263_v62 = vld [vmem:[#allocation2 + $0x6f8] sm:$0xff]  ;;  %v262_v2 = vld [vmem:[#allocation2 + $0x6f0] sm:$0xff] }
  0x31   :  { %2468 = vmatprep.subr.mxu1 %v2832_v0  ;;  %547 = vmatprep.subr.mxu0 %v2832_v0  ;;  %v64_v60 = vld [vmem:[#allocation2 + $0xc0] sm:$0xff]  ;;  %v499_v63 = vld [vmem:[%s4432_s1 + $0x258] sm:$0xff]  ;;  %v70_v3 = vld [vmem:[#allocation2 + $0xf0] sm:$0xff] }
  0x32   :  { %2500 = vmatpush1.msra.mxu1 %v429_v11  ;;  %548 = vmatpush1.msra.mxu0 %v429_v11  ;;  %v71_v1 = vld [vmem:[#allocation2 + $0xf8] sm:$0xff]  ;;  %v466_v4 = vld [vmem:[%s4432_s1 + $0x150] sm:$0xff]  ;;  %v269_v5 = vld [vmem:[#allocation2 + $0x728] sm:$0xff] }
  0x33   :  { %2469 = vmatprep.subr.mxu1 %v2832_v0  ;;  %549 = vmatprep.subr.mxu0 %v2832_v0  ;;  %v498_v6 = vld [vmem:[%s4432_s1 + $0x250] sm:$0xff]  ;;  %v77_v7 = vld [vmem:[#allocation2 + $0x128] sm:$0xff]  ;;  %v268_v8 = vld [vmem:[#allocation2 + $0x720] sm:$0xff] }
  0x34   :  { %2501 = vmatpush1.msra.mxu1 %v428_v12  ;;  %550 = vmatpush1.msra.mxu0 %v428_v12  ;;  %v76_v9 = vld [vmem:[#allocation2 + $0x120] sm:$0xff]  ;;  %v465_v10 = vld [vmem:[%s4432_s1 + $0x148] sm:$0xff]  ;;  %v275_v11 = vld [vmem:[#allocation2 + $0x758] sm:$0xff] }
  0x35   :  { %2470 = vmatprep.subr.mxu1 %v2832_v0  ;;  %551 = vmatprep.subr.mxu0 %v2832_v0  ;;  %v497_v12 = vld [vmem:[%s4432_s1 + $0x248] sm:$0xff] }
  0x36   :  { %2502 = vmatpush1.msra.mxu1 %v427_v13  ;;  %552 = vmatpush1.msra.mxu0 %v427_v13  ;;  %v83_v13 = vld [vmem:[#allocation2 + $0x158] sm:$0xff] }
  0x37   :  { %2471 = vmatprep.subr.mxu1 %v2832_v0  ;;  %553 = vmatprep.subr.mxu0 %v2832_v0 }
  0x38   :  { %2503 = vmatpush1.msra.mxu1 %v426_v14  ;;  %554 = vmatpush1.msra.mxu0 %v426_v14  ;;  %v274_v14 = vld [vmem:[#allocation2 + $0x750] sm:$0xff] }
  0x39   :  { %2472 = vmatprep.subr.mxu1 %v2832_v0  ;;  %555 = vmatprep.subr.mxu0 %v2832_v0 }
  0x3a   :  { %2504 = vmatpush1.msra.mxu1 %v425_v15  ;;  %556 = vmatpush1.msra.mxu0 %v425_v15  ;;  %v82_v15 = vld [vmem:[#allocation2 + $0x150] sm:$0xff] }
  0x3b   :  { %2473 = vmatprep.subr.mxu1 %v2832_v0  ;;  %557 = vmatprep.subr.mxu0 %v2832_v0 }
  0x3c   :  { %2505 = vmatpush1.msra.mxu1 %v424_v16  ;;  %558 = vmatpush1.msra.mxu0 %v424_v16  ;;  %v464_v16 = vld [vmem:[%s4432_s1 + $0x140] sm:$0xff] }
  0x3d   :  { %2474 = vmatprep.subr.mxu1 %v2832_v0  ;;  %559 = vmatprep.subr.mxu0 %v2832_v0 }
  0x3e   :  { %2506 = vmatpush2.msra.mxu1 %v455_v17  ;;  %560 = vmatpush2.msra.mxu0 %v455_v17  ;;  %v281_v17 = vld [vmem:[#allocation2 + $0x788] sm:$0xff] }
  0x3f   :  { %2475 = vmatprep.subr.mxu1 %v2832_v0  ;;  %561 = vmatprep.subr.mxu0 %v2832_v0 }
  0x40   :  { %2507 = vmatpush2.msra.mxu1 %v454_v18  ;;  %562 = vmatpush2.msra.mxu0 %v454_v18  ;;  %v496_v18 = vld [vmem:[%s4432_s1 + $0x240] sm:$0xff] }
  0x41   :  { %2476 = vmatprep.subr.mxu1 %v2832_v0  ;;  %563 = vmatprep.subr.mxu0 %v2832_v0 }
  0x42   :  { %2508 = vmatpush2.msra.mxu1 %v453_v19  ;;  %564 = vmatpush2.msra.mxu0 %v453_v19  ;;  %v89_v19 = vld [vmem:[#allocation2 + $0x188] sm:$0xff] }
  0x43   :  { %2477 = vmatprep.subr.mxu1 %v2832_v0  ;;  %565 = vmatprep.subr.mxu0 %v2832_v0 }
  0x44   :  { %2509 = vmatpush2.msra.mxu1 %v452_v20  ;;  %566 = vmatpush2.msra.mxu0 %v452_v20  ;;  %v280_v20 = vld [vmem:[#allocation2 + $0x780] sm:$0xff] }
  0x45   :  { %2478 = vmatprep.subr.mxu1 %v2832_v0  ;;  %567 = vmatprep.subr.mxu0 %v2832_v0 }
  0x46   :  { %2510 = vmatpush2.msra.mxu1 %v451_v21  ;;  %568 = vmatpush2.msra.mxu0 %v451_v21  ;;  %v88_v21 = vld [vmem:[#allocation2 + $0x180] sm:$0xff] }
  0x47   :  { %2479 = vmatprep.subr.mxu1 %v2832_v0  ;;  %569 = vmatprep.subr.mxu0 %v2832_v0 }
  0x48   :  { %2511 = vmatpush2.msra.mxu1 %v450_v22  ;;  %570 = vmatpush2.msra.mxu0 %v450_v22  ;;  %v463_v22 = vld [vmem:[%s4432_s1 + $0x138] sm:$0xff] }
  0x49   :  { %2480 = vmatprep.subr.mxu1 %v2832_v0  ;;  %571 = vmatprep.subr.mxu0 %v2832_v0 }
  0x4a   :  { %2512 = vmatpush2.msra.mxu1 %v449_v23  ;;  %572 = vmatpush2.msra.mxu0 %v449_v23  ;;  %v287_v23 = vld [vmem:[#allocation2 + $0x7b8] sm:$0xff] }
  0x4b   :  { %2481 = vmatprep.subr.mxu1 %v2832_v0  ;;  %573 = vmatprep.subr.mxu0 %v2832_v0 }
  0x4c   :  { %2513 = vmatpush2.msra.mxu1 %v448_v24  ;;  %574 = vmatpush2.msra.mxu0 %v448_v24  ;;  %v495_v24 = vld [vmem:[%s4432_s1 + $0x238] sm:$0xff] }
  0x4d   :  { %2482 = vmatprep.subr.mxu1 %v2832_v0  ;;  %575 = vmatprep.subr.mxu0 %v2832_v0 }
  0x4e   :  { %2514 = vmatpush2.msra.mxu1 %v447_v25  ;;  %576 = vmatpush2.msra.mxu0 %v447_v25  ;;  %v95_v25 = vld [vmem:[#allocation2 + $0x1b8] sm:$0xff] }
  0x4f   :  { %2483 = vmatprep.subr.mxu1 %v2832_v0  ;;  %577 = vmatprep.subr.mxu0 %v2832_v0 }
  0x50   :  { %2515 = vmatpush2.msra.mxu1 %v446_v26  ;;  %578 = vmatpush2.msra.mxu0 %v446_v26  ;;  %v286_v26 = vld [vmem:[#allocation2 + $0x7b0] sm:$0xff] }
  0x51   :  { %2484 = vmatprep.subr.mxu1 %v2832_v0  ;;  %579 = vmatprep.subr.mxu0 %v2832_v0 }
  0x52   :  { %2516 = vmatpush2.msra.mxu1 %v445_v27  ;;  %580 = vmatpush2.msra.mxu0 %v445_v27  ;;  %v94_v27 = vld [vmem:[#allocation2 + $0x1b0] sm:$0xff] }
  0x53   :  { %2485 = vmatprep.subr.mxu1 %v2832_v0  ;;  %581 = vmatprep.subr.mxu0 %v2832_v0 }
  0x54   :  { %2517 = vmatpush2.msra.mxu1 %v444_v28  ;;  %582 = vmatpush2.msra.mxu0 %v444_v28  ;;  %v462_v28 = vld [vmem:[%s4432_s1 + $0x130] sm:$0xff] }
  0x55   :  { %2486 = vmatprep.subr.mxu1 %v2832_v0  ;;  %583 = vmatprep.subr.mxu0 %v2832_v0 }
  0x56   :  { %2518 = vmatpush2.msra.mxu1 %v443_v29  ;;  %584 = vmatpush2.msra.mxu0 %v443_v29  ;;  %v293_v29 = vld [vmem:[#allocation2 + $0x7e8] sm:$0xff] }
  0x57   :  { %2487 = vmatprep.subr.mxu1 %v2832_v0  ;;  %585 = vmatprep.subr.mxu0 %v2832_v0 }
  0x58   :  { %2519 = vmatpush2.msra.mxu1 %v442_v30  ;;  %586 = vmatpush2.msra.mxu0 %v442_v30  ;;  %v494_v30 = vld [vmem:[%s4432_s1 + $0x230] sm:$0xff] }
  0x59   :  { %2488 = vmatprep.subr.mxu1 %v2832_v0  ;;  %587 = vmatprep.subr.mxu0 %v2832_v0 }
  0x5a   :  { %2520 = vmatpush2.msra.mxu1 %v441_v31  ;;  %588 = vmatpush2.msra.mxu0 %v441_v31  ;;  %v101_v31 = vld [vmem:[#allocation2 + $0x1e8] sm:$0xff] }
  0x5b   :  { %2489 = vmatprep.subr.mxu1 %v2832_v0  ;;  %589 = vmatprep.subr.mxu0 %v2832_v0 }
  0x5c   :  { %2521 = vmatpush2.msra.mxu1 %v440_v32  ;;  %751 = vmatprep.mubr.f32.mxu1 %v233_v33  ;;  %v100_v33 = vld [vmem:[#allocation2 + $0x1e0] sm:$0xff] }
  0x5d   :  { %590 = vmatpush2.msra.mxu0 %v440_v32  ;;  %591 = vmatprep.mubr.f32.mxu0 %v41_v34  ;;  %v292_v32 = vld [vmem:[#allocation2 + $0x7e0] sm:$0xff]  ;;  %v461_v34 = vld [vmem:[%s4432_s1 + $0x128] sm:$0xff] }
  0x5e   :  { %752 = vmatmul.mubr.f32.vlgmr.msra.gmra.mxu1 %v232_v35  ;;  %912 = vmatprep.subr.mxu1 %v2832_v0  ;;  %v299_v35 = vld [vmem:[#allocation2 + $0x818] sm:$0xff] }
  0x5f   :  { %592 = vmatmul.mubr.f32.vlgmr.msra.gmra.mxu0 %v40_v36  ;;  %913 = vmatpush1.msra.mxu1 %v471_v37  ;;  %v493_v36 = vld [vmem:[%s4432_s1 + $0x228] sm:$0xff]  ;;  %v107_v37 = vld [vmem:[#allocation2 + $0x218] sm:$0xff] }
  0x60   :  { %1297 = vmatprep.subr.mxu0 %v2832_v0  ;;  %756 = vmatprep.mubr.f32.mxu1 %v239_v38  ;;  %v298_v38 = vld [vmem:[#allocation2 + $0x810] sm:$0xff] }
  0x61   :  { %1298 = vmatpush1.msra.mxu0 %v503_v39  ;;  %596 = vmatprep.mubr.f32.mxu0 %v47_v40  ;;  %v106_v39 = vld [vmem:[#allocation2 + $0x210] sm:$0xff]  ;;  %v460_v40 = vld [vmem:[%s4432_s1 + $0x120] sm:$0xff] }
  0x62   :  { %757 = vmatmul.mubr.f32.gmra.mxu1 %v238_v41  ;;  %914 = vmatprep.subr.mxu1 %v2832_v0  ;;  %v305_v41 = vld [vmem:[#allocation2 + $0x848] sm:$0xff] }
  0x63   :  { %597 = vmatmul.mubr.f32.gmra.mxu0 %v46_v42  ;;  %915 = vmatpush1.msra.mxu1 %v470_v43  ;;  %v492_v42 = vld [vmem:[%s4432_s1 + $0x220] sm:$0xff]  ;;  %v113_v43 = vld [vmem:[#allocation2 + $0x248] sm:$0xff] }
  0x64   :  { %1299 = vmatprep.subr.mxu0 %v2832_v0  ;;  %761 = vmatprep.mubr.f32.mxu1 %v245_v44  ;;  %v304_v44 = vld [vmem:[#allocation2 + $0x840] sm:$0xff] }
  0x65   :  { %1300 = vmatpush1.msra.mxu0 %v502_v45  ;;  %601 = vmatprep.mubr.f32.mxu0 %v53_v46  ;;  %v112_v45 = vld [vmem:[#allocation2 + $0x240] sm:$0xff]  ;;  %v459_v46 = vld [vmem:[%s4432_s1 + $0x118] sm:$0xff] }
  0x66   :  { %762 = vmatmul.mubr.f32.gmra.mxu1 %v244_v47  ;;  %916 = vmatprep.subr.mxu1 %v2832_v0  ;;  %v311_v47 = vld [vmem:[#allocation2 + $0x878] sm:$0xff] }
  0x67   :  { %602 = vmatmul.mubr.f32.gmra.mxu0 %v52_v48  ;;  %917 = vmatpush1.msra.mxu1 %v469_v49  ;;  %v491_v48 = vld [vmem:[%s4432_s1 + $0x218] sm:$0xff] }
  0x68   :  { %1301 = vmatprep.subr.mxu0 %v2832_v0  ;;  %766 = vmatprep.mubr.f32.mxu1 %v251_v50  ;;  %v119_v49 = vld [vmem:[#allocation2 + $0x278] sm:$0xff]  ;;  %v310_v50 = vld [vmem:[#allocation2 + $0x870] sm:$0xff] }
  0x69   :  { %1302 = vmatpush1.msra.mxu0 %v501_v51  ;;  %606 = vmatprep.mubr.f32.mxu0 %v59_v52  ;;  %v118_v51 = vld [vmem:[#allocation2 + $0x270] sm:$0xff] }
  0x6a   :  { %767 = vmatmul.mubr.f32.gmra.mxu1 %v250_v53  ;;  %918 = vmatprep.subr.mxu1 %v2832_v0  ;;  %v458_v52 = vld [vmem:[%s4432_s1 + $0x110] sm:$0xff]  ;;  %v317_v53 = vld [vmem:[#allocation2 + $0x8a8] sm:$0xff] }
  0x6b   :  { %607 = vmatmul.mubr.f32.gmra.mxu0 %v58_v54  ;;  %919 = vmatpush1.msra.mxu1 %v468_v55  ;;  %v490_v54 = vld [vmem:[%s4432_s1 + $0x210] sm:$0xff]  ;;  %v125_v55 = vld [vmem:[#allocation2 + $0x2a8] sm:$0xff] }
  0x6c   :  { %1303 = vmatprep.subr.mxu0 %v2832_v0  ;;  %771 = vmatprep.mubr.f32.mxu1 %v257_v56  ;;  %v316_v56 = vld [vmem:[#allocation2 + $0x8a0] sm:$0xff] }
  0x6d   :  { %1304 = vmatpush1.msra.mxu0 %v500_v57  ;;  %611 = vmatprep.mubr.f32.mxu0 %v65_v58  ;;  %v124_v57 = vld [vmem:[#allocation2 + $0x2a0] sm:$0xff]  ;;  %v457_v58 = vld [vmem:[%s4432_s1 + $0x108] sm:$0xff] }
  0x6e   :  { %772 = vmatmul.mubr.f32.gmra.mxu1 %v256_v59  ;;  %920 = vmatprep.subr.mxu1 %v2832_v0  ;;  %v323_v59 = vld [vmem:[#allocation2 + $0x8d8] sm:$0xff] }
  0x6f   :  { %612 = vmatmul.mubr.f32.gmra.mxu0 %v64_v60  ;;  %921 = vmatpush1.msra.mxu1 %v467_v61  ;;  %v489_v60 = vld [vmem:[%s4432_s1 + $0x208] sm:$0xff]  ;;  %v131_v61 = vld [vmem:[#allocation2 + $0x2d8] sm:$0xff] }
  0x70   :  { %1305 = vmatprep.subr.mxu0 %v2832_v0  ;;  %776 = vmatprep.mubr.f32.mxu1 %v263_v62  ;;  %v322_v62 = vld [vmem:[#allocation2 + $0x8d0] sm:$0xff] }
  0x71   :  { %1306 = vmatpush1.msra.mxu0 %v499_v63  ;;  %616 = vmatprep.mubr.f32.mxu0 %v71_v1  ;;  %v130_v63 = vld [vmem:[#allocation2 + $0x2d0] sm:$0xff]  ;;  %v456_v1 = vld [vmem:[%s4432_s1 + $0x100] sm:$0xff] }
  0x72   :  { %777 = vmatmul.mubr.f32.gmra.mxu1 %v262_v2  ;;  %922 = vmatprep.subr.mxu1 %v2832_v0  ;;  %v329_v2 = vld [vmem:[#allocation2 + $0x908] sm:$0xff] }
  0x73   :  { %617 = vmatmul.mubr.f32.gmra.mxu0 %v70_v3  ;;  %923 = vmatpush1.msra.mxu1 %v466_v4  ;;  %v488_v3 = vld [vmem:[%s4432_s1 + $0x200] sm:$0xff]  ;;  %v137_v4 = vld [vmem:[#allocation2 + $0x308] sm:$0xff] }
  0x74   :  { %1307 = vmatprep.subr.mxu0 %v2832_v0  ;;  %781 = vmatprep.mubr.f32.mxu1 %v269_v5  ;;  %v328_v5 = vld [vmem:[#allocation2 + $0x900] sm:$0xff] }
  0x75   :  { %1308 = vmatpush1.msra.mxu0 %v498_v6  ;;  %621 = vmatprep.mubr.f32.mxu0 %v77_v7  ;;  %v136_v6 = vld [vmem:[#allocation2 + $0x300] sm:$0xff]  ;;  %v487_v7 = vld [vmem:[%s4432_s1 + $0x1f8] sm:$0xff] }
  0x76   :  { %782 = vmatmul.mubr.f32.gmra.mxu1 %v268_v8  ;;  %924 = vmatprep.subr.mxu1 %v2832_v0  ;;  %v335_v8 = vld [vmem:[#allocation2 + $0x938] sm:$0xff] }
  0x77   :  { %622 = vmatmul.mubr.f32.gmra.mxu0 %v76_v9  ;;  %925 = vmatpush1.msra.mxu1 %v465_v10  ;;  %v519_v9 = vld [vmem:[%s4432_s1 + $0x2f8] sm:$0xff] }
  0x78   :  { %1309 = vmatprep.subr.mxu0 %v2832_v0  ;;  %786 = vmatprep.mubr.f32.mxu1 %v275_v11  ;;  %v143_v10 = vld [vmem:[#allocation2 + $0x338] sm:$0xff]  ;;  %v334_v11 = vld [vmem:[#allocation2 + $0x930] sm:$0xff] }
  0x79   :  { %1310 = vmatpush1.msra.mxu0 %v497_v12  ;;  %626 = vmatprep.mubr.f32.mxu0 %v83_v13  ;;  %v142_v12 = vld [vmem:[#allocation2 + $0x330] sm:$0xff] }
  0x7a   :  { %787 = vmatmul.mubr.f32.gmra.mxu1 %v274_v14  ;;  %926 = vmatprep.subr.mxu1 %v2832_v0  ;;  %v486_v13 = vld [vmem:[%s4432_s1 + $0x1f0] sm:$0xff]  ;;  %v341_v14 = vld [vmem:[#allocation2 + $0x968] sm:$0xff] }
  0x7b   :  { %627 = vmatmul.mubr.f32.gmra.mxu0 %v82_v15  ;;  %927 = vmatpush1.msra.mxu1 %v464_v16  ;;  %v518_v15 = vld [vmem:[%s4432_s1 + $0x2f0] sm:$0xff]  ;;  %v149_v16 = vld [vmem:[#allocation2 + $0x368] sm:$0xff] }
  0x7c   :  { %1311 = vmatprep.subr.mxu0 %v2832_v0  ;;  %791 = vmatprep.mubr.f32.mxu1 %v281_v17  ;;  %v340_v17 = vld [vmem:[#allocation2 + $0x960] sm:$0xff] }
  0x7d   :  { %1312 = vmatpush1.msra.mxu0 %v496_v18  ;;  %631 = vmatprep.mubr.f32.mxu0 %v89_v19  ;;  %v148_v18 = vld [vmem:[#allocation2 + $0x360] sm:$0xff]  ;;  %v485_v19 = vld [vmem:[%s4432_s1 + $0x1e8] sm:$0xff] }
  0x7e   :  { %792 = vmatmul.mubr.f32.gmra.mxu1 %v280_v20  ;;  %928 = vmatprep.subr.mxu1 %v2832_v0  ;;  %v347_v20 = vld [vmem:[#allocation2 + $0x998] sm:$0xff] }
  0x7f   :  { %632 = vmatmul.mubr.f32.gmra.mxu0 %v88_v21  ;;  %929 = vmatpush1.msra.mxu1 %v463_v22  ;;  %v517_v21 = vld [vmem:[%s4432_s1 + $0x2e8] sm:$0xff]  ;;  %v155_v22 = vld [vmem:[#allocation2 + $0x398] sm:$0xff] }
  0x80   :  { %1313 = vmatprep.subr.mxu0 %v2832_v0  ;;  %796 = vmatprep.mubr.f32.mxu1 %v287_v23  ;;  %v346_v23 = vld [vmem:[#allocation2 + $0x990] sm:$0xff] }
  0x81   :  { %1314 = vmatpush1.msra.mxu0 %v495_v24  ;;  %636 = vmatprep.mubr.f32.mxu0 %v95_v25  ;;  %v154_v24 = vld [vmem:[#allocation2 + $0x390] sm:$0xff]  ;;  %v484_v25 = vld [vmem:[%s4432_s1 + $0x1e0] sm:$0xff] }
  0x82   :  { %797 = vmatmul.mubr.f32.gmra.mxu1 %v286_v26  ;;  %930 = vmatprep.subr.mxu1 %v2832_v0  ;;  %v353_v26 = vld [vmem:[#allocation2 + $0x9c8] sm:$0xff] }
  0x83   :  { %637 = vmatmul.mubr.f32.gmra.mxu0 %v94_v27  ;;  %931 = vmatpush1.msra.mxu1 %v462_v28  ;;  %v516_v27 = vld [vmem:[%s4432_s1 + $0x2e0] sm:$0xff]  ;;  %v161_v28 = vld [vmem:[#allocation2 + $0x3c8] sm:$0xff] }
  0x84   :  { %1315 = vmatprep.subr.mxu0 %v2832_v0  ;;  %801 = vmatprep.mubr.f32.mxu1 %v293_v29  ;;  %v352_v29 = vld [vmem:[#allocation2 + $0x9c0] sm:$0xff] }
  0x85   :  { %1316 = vmatpush1.msra.mxu0 %v494_v30  ;;  %641 = vmatprep.mubr.f32.mxu0 %v101_v31  ;;  %v160_v30 = vld [vmem:[#allocation2 + $0x3c0] sm:$0xff]  ;;  %v483_v31 = vld [vmem:[%s4432_s1 + $0x1d8] sm:$0xff] }
  0x86   :  { %802 = vmatmul.mubr.f32.gmra.mxu1 %v292_v32  ;;  %932 = vmatprep.subr.mxu1 %v2832_v0  ;;  %v359_v32 = vld [vmem:[#allocation2 + $0x9f8] sm:$0xff] }
  0x87   :  { %642 = vmatmul.mubr.f32.gmra.mxu0 %v100_v33  ;;  %933 = vmatpush1.msra.mxu1 %v461_v34  ;;  %v515_v33 = vld [vmem:[%s4432_s1 + $0x2d8] sm:$0xff] }
  0x88   :  { %1317 = vmatprep.subr.mxu0 %v2832_v0  ;;  %806 = vmatprep.mubr.f32.mxu1 %v299_v35  ;;  %v167_v34 = vld [vmem:[#allocation2 + $0x3f8] sm:$0xff]  ;;  %v358_v35 = vld [vmem:[#allocation2 + $0x9f0] sm:$0xff] }
  0x89   :  { %1318 = vmatpush1.msra.mxu0 %v493_v36  ;;  %646 = vmatprep.mubr.f32.mxu0 %v107_v37  ;;  %v166_v36 = vld [vmem:[#allocation2 + $0x3f0] sm:$0xff] }
  0x8a   :  { %807 = vmatmul.mubr.f32.gmra.mxu1 %v298_v38  ;;  %934 = vmatprep.subr.mxu1 %v2832_v0  ;;  %v482_v37 = vld [vmem:[%s4432_s1 + $0x1d0] sm:$0xff]  ;;  %v365_v38 = vld [vmem:[#allocation2 + $0xa28] sm:$0xff] }
  0x8b   :  { %647 = vmatmul.mubr.f32.gmra.mxu0 %v106_v39  ;;  %935 = vmatpush1.msra.mxu1 %v460_v40  ;;  %v514_v39 = vld [vmem:[%s4432_s1 + $0x2d0] sm:$0xff]  ;;  %v173_v40 = vld [vmem:[#allocation2 + $0x428] sm:$0xff] }
  0x8c   :  { %1319 = vmatprep.subr.mxu0 %v2832_v0  ;;  %811 = vmatprep.mubr.f32.mxu1 %v305_v41  ;;  %v364_v41 = vld [vmem:[#allocation2 + $0xa20] sm:$0xff] }
  0x8d   :  { %1320 = vmatpush1.msra.mxu0 %v492_v42  ;;  %651 = vmatprep.mubr.f32.mxu0 %v113_v43  ;;  %v172_v42 = vld [vmem:[#allocation2 + $0x420] sm:$0xff]  ;;  %v481_v43 = vld [vmem:[%s4432_s1 + $0x1c8] sm:$0xff] }
  0x8e   :  { %812 = vmatmul.mubr.f32.gmra.mxu1 %v304_v44  ;;  %936 = vmatprep.subr.mxu1 %v2832_v0  ;;  %v371_v44 = vld [vmem:[#allocation2 + $0xa58] sm:$0xff] }
  0x8f   :  { %652 = vmatmul.mubr.f32.gmra.mxu0 %v112_v45  ;;  %937 = vmatpush1.msra.mxu1 %v459_v46  ;;  %v513_v45 = vld [vmem:[%s4432_s1 + $0x2c8] sm:$0xff]  ;;  %v179_v46 = vld [vmem:[#allocation2 + $0x458] sm:$0xff] }
  0x90   :  { %1321 = vmatprep.subr.mxu0 %v2832_v0  ;;  %816 = vmatprep.mubr.f32.mxu1 %v311_v47  ;;  %v370_v47 = vld [vmem:[#allocation2 + $0xa50] sm:$0xff] }
  0x91   :  { %1322 = vmatpush1.msra.mxu0 %v491_v48  ;;  %656 = vmatprep.mubr.f32.mxu0 %v119_v49  ;;  %v178_v48 = vld [vmem:[#allocation2 + $0x450] sm:$0xff]  ;;  %v480_v49 = vld [vmem:[%s4432_s1 + $0x1c0] sm:$0xff] }
  0x92   :  { %817 = vmatmul.mubr.f32.gmra.mxu1 %v310_v50  ;;  %938 = vmatprep.subr.mxu1 %v2832_v0  ;;  %v377_v50 = vld [vmem:[#allocation2 + $0xa88] sm:$0xff] }
  0x93   :  { %657 = vmatmul.mubr.f32.gmra.mxu0 %v118_v51  ;;  %939 = vmatpush1.msra.mxu1 %v458_v52  ;;  %v512_v51 = vld [vmem:[%s4432_s1 + $0x2c0] sm:$0xff]  ;;  %v185_v52 = vld [vmem:[#allocation2 + $0x488] sm:$0xff] }
  0x94   :  { %1323 = vmatprep.subr.mxu0 %v2832_v0  ;;  %821 = vmatprep.mubr.f32.mxu1 %v317_v53  ;;  %v376_v53 = vld [vmem:[#allocation2 + $0xa80] sm:$0xff] }
  0x95   :  { %1324 = vmatpush1.msra.mxu0 %v490_v54  ;;  %661 = vmatprep.mubr.f32.mxu0 %v125_v55  ;;  %v184_v54 = vld [vmem:[#allocation2 + $0x480] sm:$0xff]  ;;  %v479_v55 = vld [vmem:[%s4432_s1 + $0x1b8] sm:$0xff] }
  0x96   :  { %822 = vmatmul.mubr.f32.gmra.mxu1 %v316_v56  ;;  %940 = vmatprep.subr.mxu1 %v2832_v0  ;;  %v383_v56 = vld [vmem:[#allocation2 + $0xab8] sm:$0xff] }
  0x97   :  { %662 = vmatmul.mubr.f32.gmra.mxu0 %v124_v57  ;;  %941 = vmatpush1.msra.mxu1 %v457_v58  ;;  %v511_v57 = vld [vmem:[%s4432_s1 + $0x2b8] sm:$0xff] }
  0x98   :  { %1325 = vmatprep.subr.mxu0 %v2832_v0  ;;  %826 = vmatprep.mubr.f32.mxu1 %v323_v59  ;;  %v191_v58 = vld [vmem:[#allocation2 + $0x4b8] sm:$0xff]  ;;  %v382_v59 = vld [vmem:[#allocation2 + $0xab0] sm:$0xff] }
  0x99   :  { %1326 = vmatpush1.msra.mxu0 %v489_v60  ;;  %666 = vmatprep.mubr.f32.mxu0 %v131_v61  ;;  %v190_v60 = vld [vmem:[#allocation2 + $0x4b0] sm:$0xff] }
  0x9a   :  { %827 = vmatmul.mubr.f32.gmra.mxu1 %v322_v62  ;;  %942 = vmatprep.subr.mxu1 %v2832_v0  ;;  %v478_v61 = vld [vmem:[%s4432_s1 + $0x1b0] sm:$0xff]  ;;  %v389_v62 = vld [vmem:[#allocation2 + $0xae8] sm:$0xff] }
  0x9b   :  { %667 = vmatmul.mubr.f32.gmra.mxu0 %v130_v63  ;;  %943 = vmatpush1.msra.mxu1 %v456_v1  ;;  %v510_v63 = vld [vmem:[%s4432_s1 + $0x2b0] sm:$0xff]  ;;  %v197_v1 = vld [vmem:[#allocation2 + $0x4e8] sm:$0xff] }
  0x9c   :  { %1327 = vmatprep.subr.mxu0 %v2832_v0  ;;  %831 = vmatprep.mubr.f32.mxu1 %v329_v2  ;;  %v388_v2 = vld [vmem:[#allocation2 + $0xae0] sm:$0xff] }
  0x9d   :  { %1328 = vmatpush1.msra.mxu0 %v488_v3  ;;  %671 = vmatprep.mubr.f32.mxu0 %v137_v4  ;;  %v196_v3 = vld [vmem:[#allocation2 + $0x4e0] sm:$0xff]  ;;  %v477_v4 = vld [vmem:[%s4432_s1 + $0x1a8] sm:$0xff] }
  0x9e   :  { %832 = vmatmul.mubr.f32.gmra.mxu1 %v328_v5  ;;  %944 = vmatprep.subr.mxu1 %v2832_v0  ;;  %v395_v5 = vld [vmem:[#allocation2 + $0xb18] sm:$0xff] }
  0x9f   :  { %672 = vmatmul.mubr.f32.gmra.mxu0 %v136_v6  ;;  %945 = vmatpush2.msra.mxu1 %v487_v7  ;;  %v509_v6 = vld [vmem:[%s4432_s1 + $0x2a8] sm:$0xff]  ;;  %v203_v7 = vld [vmem:[#allocation2 + $0x518] sm:$0xff] }
  0xa0   :  { %1329 = vmatprep.subr.mxu0 %v2832_v0  ;;  %836 = vmatprep.mubr.f32.mxu1 %v335_v8  ;;  %v394_v8 = vld [vmem:[#allocation2 + $0xb10] sm:$0xff] }
  0xa1   :  { %1330 = vmatpush2.msra.mxu0 %v519_v9  ;;  %676 = vmatprep.mubr.f32.mxu0 %v143_v10  ;;  %v202_v9 = vld [vmem:[#allocation2 + $0x510] sm:$0xff]  ;;  %v476_v10 = vld [vmem:[%s4432_s1 + $0x1a0] sm:$0xff] }
  0xa2   :  { %837 = vmatmul.mubr.f32.gmra.mxu1 %v334_v11  ;;  %946 = vmatprep.subr.mxu1 %v2832_v0  ;;  %v401_v11 = vld [vmem:[#allocation2 + $0xb48] sm:$0xff] }
  0xa3   :  { %677 = vmatmul.mubr.f32.gmra.mxu0 %v142_v12  ;;  %947 = vmatpush2.msra.mxu1 %v486_v13  ;;  %v508_v12 = vld [vmem:[%s4432_s1 + $0x2a0] sm:$0xff]  ;;  %v209_v13 = vld [vmem:[#allocation2 + $0x548] sm:$0xff] }
  0xa4   :  { %1331 = vmatprep.subr.mxu0 %v2832_v0  ;;  %841 = vmatprep.mubr.f32.mxu1 %v341_v14  ;;  %v400_v14 = vld [vmem:[#allocation2 + $0xb40] sm:$0xff] }
  0xa5   :  { %1332 = vmatpush2.msra.mxu0 %v518_v15  ;;  %681 = vmatprep.mubr.f32.mxu0 %v149_v16  ;;  %v208_v15 = vld [vmem:[#allocation2 + $0x540] sm:$0xff]  ;;  %v475_v16 = vld [vmem:[%s4432_s1 + $0x198] sm:$0xff] }
  0xa6   :  { %842 = vmatmul.mubr.f32.gmra.mxu1 %v340_v17  ;;  %948 = vmatprep.subr.mxu1 %v2832_v0  ;;  %v407_v17 = vld [vmem:[#allocation2 + $0xb78] sm:$0xff] }
  0xa7   :  { %682 = vmatmul.mubr.f32.gmra.mxu0 %v148_v18  ;;  %949 = vmatpush2.msra.mxu1 %v485_v19  ;;  %v507_v18 = vld [vmem:[%s4432_s1 + $0x298] sm:$0xff] }
  0xa8   :  { %1333 = vmatprep.subr.mxu0 %v2832_v0  ;;  %846 = vmatprep.mubr.f32.mxu1 %v347_v20  ;;  %v215_v19 = vld [vmem:[#allocation2 + $0x578] sm:$0xff]  ;;  %v406_v20 = vld [vmem:[#allocation2 + $0xb70] sm:$0xff] }
  0xa9   :  { %1334 = vmatpush2.msra.mxu0 %v517_v21  ;;  %686 = vmatprep.mubr.f32.mxu0 %v155_v22  ;;  %v214_v21 = vld [vmem:[#allocation2 + $0x570] sm:$0xff] }
  0xaa   :  { %847 = vmatmul.mubr.f32.gmra.mxu1 %v346_v23  ;;  %950 = vmatprep.subr.mxu1 %v2832_v0  ;;  %v474_v22 = vld [vmem:[%s4432_s1 + $0x190] sm:$0xff]  ;;  %v413_v23 = vld [vmem:[#allocation2 + $0xba8] sm:$0xff] }
  0xab   :  { %687 = vmatmul.mubr.f32.gmra.mxu0 %v154_v24  ;;  %951 = vmatpush2.msra.mxu1 %v484_v25  ;;  %v506_v24 = vld [vmem:[%s4432_s1 + $0x290] sm:$0xff]  ;;  %v221_v25 = vld [vmem:[#allocation2 + $0x5a8] sm:$0xff] }
  0xac   :  { %1335 = vmatprep.subr.mxu0 %v2832_v0  ;;  %851 = vmatprep.mubr.f32.mxu1 %v353_v26  ;;  %v412_v26 = vld [vmem:[#allocation2 + $0xba0] sm:$0xff] }
  0xad   :  { %1336 = vmatpush2.msra.mxu0 %v516_v27  ;;  %691 = vmatprep.mubr.f32.mxu0 %v161_v28  ;;  %v220_v27 = vld [vmem:[#allocation2 + $0x5a0] sm:$0xff]  ;;  %v473_v28 = vld [vmem:[%s4432_s1 + $0x188] sm:$0xff] }
  0xae   :  { %852 = vmatmul.mubr.f32.gmra.mxu1 %v352_v29  ;;  %952 = vmatprep.subr.mxu1 %v2832_v0  ;;  %v419_v29 = vld [vmem:[#allocation2 + $0xbd8] sm:$0xff] }
  0xaf   :  { %692 = vmatmul.mubr.f32.gmra.mxu0 %v160_v30  ;;  %953 = vmatpush2.msra.mxu1 %v483_v31  ;;  %v505_v30 = vld [vmem:[%s4432_s1 + $0x288] sm:$0xff]  ;;  %v227_v31 = vld [vmem:[#allocation2 + $0x5d8] sm:$0xff] }
  0xb0   :  { %1337 = vmatprep.subr.mxu0 %v2832_v0  ;;  %856 = vmatprep.mubr.f32.mxu1 %v359_v32  ;;  %v418_v32 = vld [vmem:[#allocation2 + $0xbd0] sm:$0xff] }
  0xb1   :  { %1338 = vmatpush2.msra.mxu0 %v515_v33  ;;  %696 = vmatprep.mubr.f32.mxu0 %v167_v34  ;;  %v226_v33 = vld [vmem:[#allocation2 + $0x5d0] sm:$0xff]  ;;  %v472_v34 = vld [vmem:[%s4432_s1 + $0x180] sm:$0xff] }
  0xb2   :  { %857 = vmatmul.mubr.f32.gmra.mxu1 %v358_v35  ;;  %954 = vmatprep.subr.mxu1 %v2832_v0  ;;  %v43_v35 = vld [vmem:[#allocation2 + $0x18] sm:$0xff] }
  0xb3   :  { %697 = vmatmul.mubr.f32.gmra.mxu0 %v166_v36  ;;  %955 = vmatpush2.msra.mxu1 %v482_v37  ;;  %v504_v36 = vld [vmem:[%s4432_s1 + $0x280] sm:$0xff]  ;;  %v45_v37 = vld [vmem:[#allocation2 + $0x28] sm:$0xff] }
  0xb4   :  { %1339 = vmatprep.subr.mxu0 %v2832_v0  ;;  %861 = vmatprep.mubr.f32.mxu1 %v365_v38  ;;  %v42_v38 = vld [vmem:[#allocation2 + $0x10] sm:$0xff] }
  0xb5   :  { %1340 = vmatpush2.msra.mxu0 %v514_v39  ;;  %701 = vmatprep.mubr.f32.mxu0 %v173_v40  ;;  %v44_v39 = vld [vmem:[#allocation2 + $0x20] sm:$0xff]  ;;  %v49_v40 = vld [vmem:[#allocation2 + $0x48] sm:$0xff] }
  0xb6   :  { %862 = vmatmul.mubr.f32.gmra.mxu1 %v364_v41  ;;  %956 = vmatprep.subr.mxu1 %v2832_v0  ;;  %v51_v41 = vld [vmem:[#allocation2 + $0x58] sm:$0xff] }
  0xb7   :  { %702 = vmatmul.mubr.f32.gmra.mxu0 %v172_v42  ;;  %957 = vmatpush2.msra.mxu1 %v481_v43  ;;  %v48_v42 = vld [vmem:[#allocation2 + $0x40] sm:$0xff]  ;;  %v50_v43 = vld [vmem:[#allocation2 + $0x50] sm:$0xff] }
  0xb8   :  { %1341 = vmatprep.subr.mxu0 %v2832_v0  ;;  %866 = vmatprep.mubr.f32.mxu1 %v371_v44  ;;  %v55_v44 = vld [vmem:[#allocation2 + $0x78] sm:$0xff] }
  0xb9   :  { %1342 = vmatpush2.msra.mxu0 %v513_v45  ;;  %706 = vmatprep.mubr.f32.mxu0 %v179_v46  ;;  %v57_v45 = vld [vmem:[#allocation2 + $0x88] sm:$0xff]  ;;  %v54_v46 = vld [vmem:[#allocation2 + $0x70] sm:$0xff] }
  0xba   :  { %867 = vmatmul.mubr.f32.gmra.mxu1 %v370_v47  ;;  %958 = vmatprep.subr.mxu1 %v2832_v0  ;;  %v61_v47 = vld [vmem:[#allocation2 + $0xa8] sm:$0xff] }
  0xbb   :  { %707 = vmatmul.mubr.f32.gmra.mxu0 %v178_v48  ;;  %959 = vmatpush2.msra.mxu1 %v480_v49  ;;  %v63_v48 = vld [vmem:[#allocation2 + $0xb8] sm:$0xff]  ;;  %v60_v49 = vld [vmem:[#allocation2 + $0xa0] sm:$0xff] }
  0xbc   :  { %1343 = vmatprep.subr.mxu0 %v2832_v0  ;;  %871 = vmatprep.mubr.f32.mxu1 %v377_v50  ;;  %v62_v50 = vld [vmem:[#allocation2 + $0xb0] sm:$0xff] }
  0xbd   :  { %1344 = vmatpush2.msra.mxu0 %v512_v51  ;;  %711 = vmatprep.mubr.f32.mxu0 %v185_v52  ;;  %v67_v51 = vld [vmem:[#allocation2 + $0xd8] sm:$0xff]  ;;  %v69_v52 = vld [vmem:[#allocation2 + $0xe8] sm:$0xff] }
  0xbe   :  { %872 = vmatmul.mubr.f32.gmra.mxu1 %v376_v53  ;;  %960 = vmatprep.subr.mxu1 %v2832_v0  ;;  %v66_v53 = vld [vmem:[#allocation2 + $0xd0] sm:$0xff] }
  0xbf   :  { %712 = vmatmul.mubr.f32.gmra.mxu0 %v184_v54  ;;  %961 = vmatpush2.msra.mxu1 %v479_v55  ;;  %v68_v54 = vld [vmem:[#allocation2 + $0xe0] sm:$0xff]  ;;  %v73_v55 = vld [vmem:[#allocation2 + $0x108] sm:$0xff] }
  0xc0   :  { %1345 = vmatprep.subr.mxu0 %v2832_v0  ;;  %876 = vmatprep.mubr.f32.mxu1 %v383_v56  ;;  %v75_v56 = vld [vmem:[#allocation2 + $0x118] sm:$0xff] }
  0xc1   :  { %1346 = vmatpush2.msra.mxu0 %v511_v57  ;;  %716 = vmatprep.mubr.f32.mxu0 %v191_v58  ;;  %v72_v57 = vld [vmem:[#allocation2 + $0x100] sm:$0xff]  ;;  %v74_v58 = vld [vmem:[#allocation2 + $0x110] sm:$0xff] }
  0xc2   :  { %877 = vmatmul.mubr.f32.gmra.mxu1 %v382_v59  ;;  %962 = vmatprep.subr.mxu1 %v2832_v0  ;;  %v79_v59 = vld [vmem:[#allocation2 + $0x138] sm:$0xff] }
  0xc3   :  { %717 = vmatmul.mubr.f32.gmra.mxu0 %v190_v60  ;;  %963 = vmatpush2.msra.mxu1 %v478_v61  ;;  %v81_v60 = vld [vmem:[#allocation2 + $0x148] sm:$0xff]  ;;  %v78_v61 = vld [vmem:[#allocation2 + $0x130] sm:$0xff] }
  0xc4   :  { %1347 = vmatprep.subr.mxu0 %v2832_v0  ;;  %881 = vmatprep.mubr.f32.mxu1 %v389_v62  ;;  %v80_v62 = vld [vmem:[#allocation2 + $0x140] sm:$0xff] }
  0xc5   :  { %1348 = vmatpush2.msra.mxu0 %v510_v63  ;;  %721 = vmatprep.mubr.f32.mxu0 %v197_v1  ;;  %v85_v63 = vld [vmem:[#allocation2 + $0x168] sm:$0xff]  ;;  %v87_v1 = vld [vmem:[#allocation2 + $0x178] sm:$0xff] }
  0xc6   :  { %882 = vmatmul.mubr.f32.gmra.mxu1 %v388_v2  ;;  %964 = vmatprep.subr.mxu1 %v2832_v0  ;;  %v84_v2 = vld [vmem:[#allocation2 + $0x160] sm:$0xff] }
  0xc7   :  { %722 = vmatmul.mubr.f32.gmra.mxu0 %v196_v3  ;;  %965 = vmatpush2.msra.mxu1 %v477_v4  ;;  %v86_v3 = vld [vmem:[#allocation2 + $0x170] sm:$0xff]  ;;  %v91_v4 = vld [vmem:[#allocation2 + $0x198] sm:$0xff] }
  0xc8   :  { %1349 = vmatprep.subr.mxu0 %v2832_v0  ;;  %886 = vmatprep.mubr.f32.mxu1 %v395_v5  ;;  %v93_v5 = vld [vmem:[#allocation2 + $0x1a8] sm:$0xff] }
  0xc9   :  { %1350 = vmatpush2.msra.mxu0 %v509_v6  ;;  %726 = vmatprep.mubr.f32.mxu0 %v203_v7  ;;  %v90_v6 = vld [vmem:[#allocation2 + $0x190] sm:$0xff]  ;;  %v92_v7 = vld [vmem:[#allocation2 + $0x1a0] sm:$0xff] }
  0xca   :  { %887 = vmatmul.mubr.f32.gmra.mxu1 %v394_v8  ;;  %966 = vmatprep.subr.mxu1 %v2832_v0  ;;  %v97_v8 = vld [vmem:[#allocation2 + $0x1c8] sm:$0xff] }
  0xcb   :  { %727 = vmatmul.mubr.f32.gmra.mxu0 %v202_v9  ;;  %967 = vmatpush2.msra.mxu1 %v476_v10  ;;  %v99_v9 = vld [vmem:[#allocation2 + $0x1d8] sm:$0xff]  ;;  %v96_v10 = vld [vmem:[#allocation2 + $0x1c0] sm:$0xff] }
  0xcc   :  { %1351 = vmatprep.subr.mxu0 %v2832_v0  ;;  %891 = vmatprep.mubr.f32.mxu1 %v401_v11  ;;  %v98_v11 = vld [vmem:[#allocation2 + $0x1d0] sm:$0xff] }
  0xcd   :  { %1352 = vmatpush2.msra.mxu0 %v508_v12  ;;  %731 = vmatprep.mubr.f32.mxu0 %v209_v13  ;;  %v103_v12 = vld [vmem:[#allocation2 + $0x1f8] sm:$0xff]  ;;  %v105_v13 = vld [vmem:[#allocation2 + $0x208] sm:$0xff] }
  0xce   :  { %892 = vmatmul.mubr.f32.gmra.mxu1 %v400_v14  ;;  %968 = vmatprep.subr.mxu1 %v2832_v0  ;;  %v102_v14 = vld [vmem:[#allocation2 + $0x1f0] sm:$0xff] }
  0xcf   :  { %732 = vmatmul.mubr.f32.gmra.mxu0 %v208_v15  ;;  %969 = vmatpush2.msra.mxu1 %v475_v16  ;;  %v104_v15 = vld [vmem:[#allocation2 + $0x200] sm:$0xff]  ;;  %v109_v16 = vld [vmem:[#allocation2 + $0x228] sm:$0xff] }
  0xd0   :  { %1353 = vmatprep.subr.mxu0 %v2832_v0  ;;  %896 = vmatprep.mubr.f32.mxu1 %v407_v17  ;;  %v111_v17 = vld [vmem:[#allocation2 + $0x238] sm:$0xff] }
  0xd1   :  { %1354 = vmatpush2.msra.mxu0 %v507_v18  ;;  %736 = vmatprep.mubr.f32.mxu0 %v215_v19  ;;  %v108_v18 = vld [vmem:[#allocation2 + $0x220] sm:$0xff]  ;;  %v110_v19 = vld [vmem:[#allocation2 + $0x230] sm:$0xff] }
  0xd2   :  { %897 = vmatmul.mubr.f32.gmra.mxu1 %v406_v20  ;;  %970 = vmatprep.subr.mxu1 %v2832_v0  ;;  %v115_v20 = vld [vmem:[#allocation2 + $0x258] sm:$0xff] }
  0xd3   :  { %737 = vmatmul.mubr.f32.gmra.mxu0 %v214_v21  ;;  %971 = vmatpush2.msra.mxu1 %v474_v22  ;;  %v117_v21 = vld [vmem:[#allocation2 + $0x268] sm:$0xff]  ;;  %v114_v22 = vld [vmem:[#allocation2 + $0x250] sm:$0xff] }
  0xd4   :  { %1355 = vmatprep.subr.mxu0 %v2832_v0  ;;  %901 = vmatprep.mubr.f32.mxu1 %v413_v23  ;;  %v116_v23 = vld [vmem:[#allocation2 + $0x260] sm:$0xff] }
  0xd5   :  { %1356 = vmatpush2.msra.mxu0 %v506_v24  ;;  %741 = vmatprep.mubr.f32.mxu0 %v221_v25  ;;  %v121_v24 = vld [vmem:[#allocation2 + $0x288] sm:$0xff]  ;;  %v123_v25 = vld [vmem:[#allocation2 + $0x298] sm:$0xff] }
  0xd6   :  { %902 = vmatmul.mubr.f32.gmra.mxu1 %v412_v26  ;;  %972 = vmatprep.subr.mxu1 %v2832_v0  ;;  %v120_v26 = vld [vmem:[#allocation2 + $0x280] sm:$0xff] }
  0xd7   :  { %742 = vmatmul.mubr.f32.gmra.mxu0 %v220_v27  ;;  %973 = vmatpush2.msra.mxu1 %v473_v28  ;;  %v122_v27 = vld [vmem:[#allocation2 + $0x290] sm:$0xff]  ;;  %v127_v28 = vld [vmem:[#allocation2 + $0x2b8] sm:$0xff] }
  0xd8   :  { %1357 = vmatprep.subr.mxu0 %v2832_v0  ;;  %906 = vmatprep.mubr.f32.mxu1 %v419_v29  ;;  %v129_v29 = vld [vmem:[#allocation2 + $0x2c8] sm:$0xff] }
  0xd9   :  { %1358 = vmatpush2.msra.mxu0 %v505_v30  ;;  %746 = vmatprep.mubr.f32.mxu0 %v227_v31  ;;  %v126_v30 = vld [vmem:[#allocation2 + $0x2b0] sm:$0xff]  ;;  %v128_v31 = vld [vmem:[#allocation2 + $0x2c0] sm:$0xff] }
  0xda   :  { %907 = vmatmul.mubr.f32.gmra.mxu1 %v418_v32  ;;  %974 = vmatprep.subr.mxu1 %v2832_v0  ;;  %v133_v32 = vld [vmem:[#allocation2 + $0x2e8] sm:$0xff] }
  0xdb   :  { %747 = vmatmul.mubr.f32.gmra.mxu0 %v226_v33  ;;  %975 = vmatpush2.msra.mxu1 %v472_v34  ;;  %v135_v33 = vld [vmem:[#allocation2 + $0x2f8] sm:$0xff]  ;;  %v132_v34 = vld [vmem:[#allocation2 + $0x2e0] sm:$0xff] }
  0xdc   :  { %1359 = vmatprep.subr.mxu0 %v2832_v0  ;;  %976 = vmatprep.mubr.f32.mxu1 %v43_v35  ;;  %v56_v0 = vld [vmem:[#allocation2 + $0x80] sm:$0xff]  ;;  %v134_v35 = vld [vmem:[#allocation2 + $0x2f0] sm:$0xff] }
  0xdd   :  { %1360 = vmatpush2.msra.mxu0 %v504_v36  ;;  %1361 = vmatprep.mubr.f32.mxu0 %v45_v37  ;;  %v139_v36 = vld [vmem:[#allocation2 + $0x318] sm:$0xff]  ;;  %v141_v37 = vld [vmem:[#allocation2 + $0x328] sm:$0xff] }
  0xde   :  { %977 = vmatmul.mubr.f32.vlgmr.msra.gmra.mxu1 %v42_v38  ;;  %v138_v38 = vld [vmem:[#allocation2 + $0x310] sm:$0xff] }
  0xdf   :  { %1362 = vmatmul.mubr.f32.vlgmr.msra.gmra.mxu0 %v44_v39  ;;  %981 = vmatprep.mubr.f32.mxu1 %v49_v40  ;;  %v140_v39 = vld [vmem:[#allocation2 + $0x320] sm:$0xff]  ;;  %v145_v40 = vld [vmem:[#allocation2 + $0x348] sm:$0xff] }
  0xe0   :  { %1366 = vmatprep.mubr.f32.mxu0 %v51_v41  ;;  %v147_v41 = vld [vmem:[#allocation2 + $0x358] sm:$0xff] }
  0xe2   :  { %982 = vmatmul.mubr.f32.gmra.mxu1 %v48_v42 }
  0xe3   :  { %1367 = vmatmul.mubr.f32.gmra.mxu0 %v50_v43  ;;  %986 = vmatprep.mubr.f32.mxu1 %v55_v44  ;;  %v144_v44 = vld [vmem:[#allocation2 + $0x340] sm:$0xff] }
  0xe4   :  { %1371 = vmatprep.mubr.f32.mxu0 %v57_v45 }
  0xe6   :  { %987 = vmatmul.mubr.f32.gmra.mxu1 %v54_v46  ;;  %v146_v46 = vld [vmem:[#allocation2 + $0x350] sm:$0xff] }
  0xe7   :  { %1372 = vmatmul.mubr.f32.gmra.mxu0 %v56_v0  ;;  %991 = vmatprep.mubr.f32.mxu1 %v61_v47  ;;  %v151_v0 = vld [vmem:[#allocation2 + $0x378] sm:$0xff] }
  0xe8   :  { %1376 = vmatprep.mubr.f32.mxu0 %v63_v48  ;;  %v153_v48 = vld [vmem:[#allocation2 + $0x388] sm:$0xff] }
  0xea   :  { %992 = vmatmul.mubr.f32.gmra.mxu1 %v60_v49 }
  0xeb   :  { %1377 = vmatmul.mubr.f32.gmra.mxu0 %v62_v50  ;;  %996 = vmatprep.mubr.f32.mxu1 %v67_v51  ;;  %v150_v51 = vld [vmem:[#allocation2 + $0x370] sm:$0xff] }
  0xec   :  { %1381 = vmatprep.mubr.f32.mxu0 %v69_v52 }
  0xee   :  { %997 = vmatmul.mubr.f32.gmra.mxu1 %v66_v53  ;;  %v152_v53 = vld [vmem:[#allocation2 + $0x380] sm:$0xff] }
  0xef   :  { %1382 = vmatmul.mubr.f32.gmra.mxu0 %v68_v54  ;;  %1001 = vmatprep.mubr.f32.mxu1 %v73_v55  ;;  %v157_v54 = vld [vmem:[#allocation2 + $0x3a8] sm:$0xff] }
  0xf0   :  { %1386 = vmatprep.mubr.f32.mxu0 %v75_v56  ;;  %v159_v56 = vld [vmem:[#allocation2 + $0x3b8] sm:$0xff] }
  0xf2   :  { %1002 = vmatmul.mubr.f32.gmra.mxu1 %v72_v57 }
  0xf3   :  { %1387 = vmatmul.mubr.f32.gmra.mxu0 %v74_v58  ;;  %1006 = vmatprep.mubr.f32.mxu1 %v79_v59  ;;  %v156_v59 = vld [vmem:[#allocation2 + $0x3a0] sm:$0xff] }
  0xf4   :  { %1391 = vmatprep.mubr.f32.mxu0 %v81_v60 }
  0xf6   :  { %1007 = vmatmul.mubr.f32.gmra.mxu1 %v78_v61  ;;  %v158_v61 = vld [vmem:[#allocation2 + $0x3b0] sm:$0xff] }
  0xf7   :  { %1392 = vmatmul.mubr.f32.gmra.mxu0 %v80_v62  ;;  %1011 = vmatprep.mubr.f32.mxu1 %v85_v63  ;;  %v163_v62 = vld [vmem:[#allocation2 + $0x3d8] sm:$0xff] }
  0xf8   :  { %1396 = vmatprep.mubr.f32.mxu0 %v87_v1  ;;  %v165_v1 = vld [vmem:[#allocation2 + $0x3e8] sm:$0xff] }
  0xfa   :  { %1012 = vmatmul.mubr.f32.gmra.mxu1 %v84_v2 }
  0xfb   :  { %1397 = vmatmul.mubr.f32.gmra.mxu0 %v86_v3  ;;  %1016 = vmatprep.mubr.f32.mxu1 %v91_v4  ;;  %v162_v4 = vld [vmem:[#allocation2 + $0x3d0] sm:$0xff] }
  0xfc   :  { %1401 = vmatprep.mubr.f32.mxu0 %v93_v5 }
  0xfe   :  { %1017 = vmatmul.mubr.f32.gmra.mxu1 %v90_v6  ;;  %v164_v6 = vld [vmem:[#allocation2 + $0x3e0] sm:$0xff] }
  0xff   :  { %1402 = vmatmul.mubr.f32.gmra.mxu0 %v92_v7  ;;  %1021 = vmatprep.mubr.f32.mxu1 %v97_v8  ;;  %v169_v7 = vld [vmem:[#allocation2 + $0x408] sm:$0xff] }
 0x100   :  { %1406 = vmatprep.mubr.f32.mxu0 %v99_v9  ;;  %v171_v9 = vld [vmem:[#allocation2 + $0x418] sm:$0xff] }
 0x102   :  { %1022 = vmatmul.mubr.f32.gmra.mxu1 %v96_v10 }
 0x103   :  { %1407 = vmatmul.mubr.f32.gmra.mxu0 %v98_v11  ;;  %1026 = vmatprep.mubr.f32.mxu1 %v103_v12  ;;  %v168_v12 = vld [vmem:[#allocation2 + $0x400] sm:$0xff] }
 0x104   :  { %1411 = vmatprep.mubr.f32.mxu0 %v105_v13 }
 0x106   :  { %1027 = vmatmul.mubr.f32.gmra.mxu1 %v102_v14  ;;  %v170_v14 = vld [vmem:[#allocation2 + $0x410] sm:$0xff] }
 0x107   :  { %1412 = vmatmul.mubr.f32.gmra.mxu0 %v104_v15  ;;  %1031 = vmatprep.mubr.f32.mxu1 %v109_v16  ;;  %v175_v15 = vld [vmem:[#allocation2 + $0x438] sm:$0xff] }
 0x108   :  { %1416 = vmatprep.mubr.f32.mxu0 %v111_v17  ;;  %v177_v17 = vld [vmem:[#allocation2 + $0x448] sm:$0xff] }
 0x10a   :  { %1032 = vmatmul.mubr.f32.gmra.mxu1 %v108_v18 }
 0x10b   :  { %1417 = vmatmul.mubr.f32.gmra.mxu0 %v110_v19  ;;  %1036 = vmatprep.mubr.f32.mxu1 %v115_v20  ;;  %v174_v20 = vld [vmem:[#allocation2 + $0x430] sm:$0xff] }
 0x10c   :  { %1421 = vmatprep.mubr.f32.mxu0 %v117_v21 }
 0x10e   :  { %1037 = vmatmul.mubr.f32.gmra.mxu1 %v114_v22  ;;  %v176_v22 = vld [vmem:[#allocation2 + $0x440] sm:$0xff] }
 0x10f   :  { %1422 = vmatmul.mubr.f32.gmra.mxu0 %v116_v23  ;;  %1041 = vmatprep.mubr.f32.mxu1 %v121_v24  ;;  %v181_v23 = vld [vmem:[#allocation2 + $0x468] sm:$0xff] }
 0x110   :  { %1426 = vmatprep.mubr.f32.mxu0 %v123_v25  ;;  %v183_v25 = vld [vmem:[#allocation2 + $0x478] sm:$0xff] }
 0x112   :  { %1042 = vmatmul.mubr.f32.gmra.mxu1 %v120_v26 }
 0x113   :  { %1427 = vmatmul.mubr.f32.gmra.mxu0 %v122_v27  ;;  %1046 = vmatprep.mubr.f32.mxu1 %v127_v28  ;;  %v180_v28 = vld [vmem:[#allocation2 + $0x460] sm:$0xff] }
 0x114   :  { %1431 = vmatprep.mubr.f32.mxu0 %v129_v29 }
 0x116   :  { %1047 = vmatmul.mubr.f32.gmra.mxu1 %v126_v30  ;;  %v182_v30 = vld [vmem:[#allocation2 + $0x470] sm:$0xff] }
 0x117   :  { %1432 = vmatmul.mubr.f32.gmra.mxu0 %v128_v31  ;;  %1051 = vmatprep.mubr.f32.mxu1 %v133_v32  ;;  %v187_v31 = vld [vmem:[#allocation2 + $0x498] sm:$0xff] }
 0x118   :  { %1436 = vmatprep.mubr.f32.mxu0 %v135_v33  ;;  %v189_v33 = vld [vmem:[#allocation2 + $0x4a8] sm:$0xff] }
 0x11a   :  { %1052 = vmatmul.mubr.f32.gmra.mxu1 %v132_v34 }
 0x11b   :  { %1437 = vmatmul.mubr.f32.gmra.mxu0 %v134_v35  ;;  %1056 = vmatprep.mubr.f32.mxu1 %v139_v36  ;;  %v186_v36 = vld [vmem:[#allocation2 + $0x490] sm:$0xff] }
 0x11c   :  { %1441 = vmatprep.mubr.f32.mxu0 %v141_v37 }
 0x11e   :  { %v3275_v42 = vpop.f32.mrf.mxu1  ;;  %1057 = vmatmul.mubr.f32.gmra.mxu1 %v138_v38  ;;  %v188_v38 = vld [vmem:[#allocation2 + $0x4a0] sm:$0xff] }
 0x11f   :  { %v3277_v43 = vpop.f32.mrf.mxu0  ;;  %1442 = vmatmul.mubr.f32.gmra.mxu0 %v140_v39  ;;  %1061 = vmatprep.mubr.f32.mxu1 %v145_v40  ;;  %v193_v39 = vld [vmem:[#allocation2 + $0x4c8] sm:$0xff] }
 0x120   :  { %v755_v45 = vpop.f32.mrf.mxu1  ;;  %1446 = vmatprep.mubr.f32.mxu0 %v147_v41  ;;  %v195_v41 = vld [vmem:[#allocation2 + $0x4d8] sm:$0xff] }
 0x121   :  { %v595_v47 = vpop.f32.mrf.mxu0 }
 0x122   :  { %v3279_v49 = vpop.f32.mrf.mxu1  ;;  %1062 = vmatmul.mubr.f32.gmra.mxu1 %v144_v44  ;;  %v194_v47 = vld [vmem:[#allocation2 + $0x4d0] sm:$0xff] }
 0x123   :  { %v3281_v50 = vpop.f32.mrf.mxu0  ;;  %1447 = vmatmul.mubr.f32.gmra.mxu0 %v146_v46  ;;  %1066 = vmatprep.mubr.f32.mxu1 %v151_v0  ;;  %v192_v46 = vld [vmem:[#allocation2 + $0x4c0] sm:$0xff] }
 0x124   :  { %v760_v52 = vpop.f32.mrf.mxu1  ;;  %1451 = vmatprep.mubr.f32.mxu0 %v153_v48  ;;  %v199_v48 = vld [vmem:[#allocation2 + $0x4f8] sm:$0xff] }
 0x125   :  { %v600_v55 = vpop.f32.mrf.mxu0  ;;  %v201_v52 = vld [vmem:[#allocation2 + $0x508] sm:$0xff] }
 0x126   :  { %v3283_v57 = vpop.f32.mrf.mxu1  ;;  %1067 = vmatmul.mubr.f32.gmra.mxu1 %v150_v51  ;;  %v198_v55 = vld [vmem:[#allocation2 + $0x4f0] sm:$0xff] }
 0x127   :  { %v3285_v58 = vpop.f32.mrf.mxu0  ;;  %1452 = vmatmul.mubr.f32.gmra.mxu0 %v152_v53  ;;  %1071 = vmatprep.mubr.f32.mxu1 %v157_v54 }
 0x128   :  { %v765_v60 = vpop.f32.mrf.mxu1  ;;  %1456 = vmatprep.mubr.f32.mxu0 %v159_v56 }
 0x129   :  { %v605_v63 = vpop.f32.mrf.mxu0  ;;  %v205_v60 = vld [vmem:[#allocation2 + $0x528] sm:$0xff] }
 0x12a   :  { %v3287_v2 = vpop.f32.mrf.mxu1  ;;  %1072 = vmatmul.mubr.f32.gmra.mxu1 %v156_v59  ;;  %v200_v59 = vld [vmem:[#allocation2 + $0x500] sm:$0xff] }
 0x12b   :  { %v3289_v3 = vpop.f32.mrf.mxu0  ;;  %1457 = vmatmul.mubr.f32.gmra.mxu0 %v158_v61  ;;  %1076 = vmatprep.mubr.f32.mxu1 %v163_v62  ;;  %v207_v62 = vld [vmem:[#allocation2 + $0x538] sm:$0xff] }
 0x12c   :  { %v770_v5 = vpop.f32.mrf.mxu1  ;;  %1461 = vmatprep.mubr.f32.mxu0 %v165_v1 }
 0x12d   :  { %v610_v8 = vpop.f32.mrf.mxu0 }
 0x12e   :  { %v3291_v10 = vpop.f32.mrf.mxu1  ;;  %1077 = vmatmul.mubr.f32.gmra.mxu1 %v162_v4  ;;  %v204_v4 = vld [vmem:[#allocation2 + $0x520] sm:$0xff] }
 0x12f   :  { %v3293_v11 = vpop.f32.mrf.mxu0  ;;  %1462 = vmatmul.mubr.f32.gmra.mxu0 %v164_v6  ;;  %1081 = vmatprep.mubr.f32.mxu1 %v169_v7  ;;  %v206_v6 = vld [vmem:[#allocation2 + $0x530] sm:$0xff]  ;;  %v211_v7 = vld [vmem:[#allocation2 + $0x558] sm:$0xff] }
 0x130   :  { %v775_v13 = vpop.f32.mrf.mxu1  ;;  %1466 = vmatprep.mubr.f32.mxu0 %v171_v9  ;;  %v213_v9 = vld [vmem:[#allocation2 + $0x568] sm:$0xff] }
 0x131   :  { %v615_v16 = vpop.f32.mrf.mxu0 }
 0x132   :  { %v3295_v18 = vpop.f32.mrf.mxu1  ;;  %1082 = vmatmul.mubr.f32.gmra.mxu1 %v168_v12  ;;  %v212_v16 = vld [vmem:[#allocation2 + $0x560] sm:$0xff] }
 0x133   :  { %v3297_v19 = vpop.f32.mrf.mxu0  ;;  %1467 = vmatmul.mubr.f32.gmra.mxu0 %v170_v14  ;;  %1086 = vmatprep.mubr.f32.mxu1 %v175_v15  ;;  %v210_v14 = vld [vmem:[#allocation2 + $0x550] sm:$0xff] }
 0x134   :  { %v780_v21 = vpop.f32.mrf.mxu1  ;;  %1471 = vmatprep.mubr.f32.mxu0 %v177_v17  ;;  %v217_v17 = vld [vmem:[#allocation2 + $0x588] sm:$0xff] }
 0x135   :  { %v620_v24 = vpop.f32.mrf.mxu0  ;;  %v219_v21 = vld [vmem:[#allocation2 + $0x598] sm:$0xff] }
 0x136   :  { %v3299_v26 = vpop.f32.mrf.mxu1  ;;  %1087 = vmatmul.mubr.f32.gmra.mxu1 %v174_v20  ;;  %v216_v24 = vld [vmem:[#allocation2 + $0x580] sm:$0xff] }
 0x137   :  { %v3301_v27 = vpop.f32.mrf.mxu0  ;;  %1472 = vmatmul.mubr.f32.gmra.mxu0 %v176_v22  ;;  %1091 = vmatprep.mubr.f32.mxu1 %v181_v23 }
 0x138   :  { %v785_v29 = vpop.f32.mrf.mxu1  ;;  %1476 = vmatprep.mubr.f32.mxu0 %v183_v25 }
 0x139   :  { %v625_v32 = vpop.f32.mrf.mxu0  ;;  %v223_v29 = vld [vmem:[#allocation2 + $0x5b8] sm:$0xff] }
 0x13a   :  { %v3303_v34 = vpop.f32.mrf.mxu1  ;;  %1092 = vmatmul.mubr.f32.gmra.mxu1 %v180_v28  ;;  %v218_v28 = vld [vmem:[#allocation2 + $0x590] sm:$0xff] }
 0x13b   :  { %v3305_v35 = vpop.f32.mrf.mxu0  ;;  %1477 = vmatmul.mubr.f32.gmra.mxu0 %v182_v30  ;;  %1096 = vmatprep.mubr.f32.mxu1 %v187_v31  ;;  %v225_v31 = vld [vmem:[#allocation2 + $0x5c8] sm:$0xff] }
 0x13c   :  { %v790_v37 = vpop.f32.mrf.mxu1  ;;  %1481 = vmatprep.mubr.f32.mxu0 %v189_v33 }
 0x13d   :  { %v630_v40 = vpop.f32.mrf.mxu0 }
 0x13e   :  { %v3307_v44 = vpop.f32.mrf.mxu1  ;;  %1097 = vmatmul.mubr.f32.gmra.mxu1 %v186_v36  ;;  %v222_v36 = vld [vmem:[#allocation2 + $0x5b0] sm:$0xff] }
 0x13f   :  { %v3309_v45 = vpop.f32.mrf.mxu0  ;;  %1482 = vmatmul.mubr.f32.gmra.mxu0 %v188_v38  ;;  %1101 = vmatprep.mubr.f32.mxu1 %v193_v39  ;;  %v224_v38 = vld [vmem:[#allocation2 + $0x5c0] sm:$0xff]  ;;  %v229_v39 = vld [vmem:[#allocation2 + $0x5e8] sm:$0xff] }
 0x140   :  { %v795_v0 = vpop.f32.mrf.mxu1  ;;  %1486 = vmatprep.mubr.f32.mxu0 %v195_v41  ;;  %v231_v41 = vld [vmem:[#allocation2 + $0x5f8] sm:$0xff] }
 0x141   :  { %v635_v51 = vpop.f32.mrf.mxu0 }
 0x142   :  { %v3311_v53 = vpop.f32.mrf.mxu1  ;;  %1102 = vmatmul.mubr.f32.gmra.mxu1 %v192_v46  ;;  %v230_v51 = vld [vmem:[#allocation2 + $0x5f0] sm:$0xff] }
 0x143   :  { %v3313_v54 = vpop.f32.mrf.mxu0  ;;  %1487 = vmatmul.mubr.f32.gmra.mxu0 %v194_v47  ;;  %1106 = vmatprep.mubr.f32.mxu1 %v199_v48  ;;  %v228_v47 = vld [vmem:[#allocation2 + $0x5e0] sm:$0xff] }
 0x144   :  { %v800_v56 = vpop.f32.mrf.mxu1  ;;  %1491 = vmatprep.mubr.f32.mxu0 %v201_v52  ;;  %v235_v52 = vld [vmem:[#allocation2 + $0x618] sm:$0xff] }
 0x145   :  { %v640_v61 = vpop.f32.mrf.mxu0  ;;  %v237_v56 = vld [vmem:[#allocation2 + $0x628] sm:$0xff] }
 0x146   :  { %v3315_v63 = vpop.f32.mrf.mxu1  ;;  %1107 = vmatmul.mubr.f32.gmra.mxu1 %v198_v55  ;;  %v234_v61 = vld [vmem:[#allocation2 + $0x610] sm:$0xff] }
 0x147   :  { %v3317_v1 = vpop.f32.mrf.mxu0  ;;  %1492 = vmatmul.mubr.f32.gmra.mxu0 %v200_v59  ;;  %1111 = vmatprep.mubr.f32.mxu1 %v205_v60 }
 0x148   :  { %v805_v5 = vpop.f32.mrf.mxu1  ;;  %1496 = vmatprep.mubr.f32.mxu0 %v207_v62 }
 0x149   :  { %v645_v8 = vpop.f32.mrf.mxu0  ;;  %v241_v5 = vld [vmem:[#allocation2 + $0x648] sm:$0xff] }
 0x14a   :  { %v3319_v12 = vpop.f32.mrf.mxu1  ;;  %1112 = vmatmul.mubr.f32.gmra.mxu1 %v204_v4  ;;  %v236_v4 = vld [vmem:[#allocation2 + $0x620] sm:$0xff] }
 0x14b   :  { %v3321_v13 = vpop.f32.mrf.mxu0  ;;  %1497 = vmatmul.mubr.f32.gmra.mxu0 %v206_v6  ;;  %1116 = vmatprep.mubr.f32.mxu1 %v211_v7  ;;  %v243_v7 = vld [vmem:[#allocation2 + $0x658] sm:$0xff] }
 0x14c   :  { %v810_v15 = vpop.f32.mrf.mxu1  ;;  %1501 = vmatprep.mubr.f32.mxu0 %v213_v9 }
 0x14d   :  { %v650_v20 = vpop.f32.mrf.mxu0 }
 0x14e   :  { %v3323_v22 = vpop.f32.mrf.mxu1  ;;  %1117 = vmatmul.mubr.f32.gmra.mxu1 %v210_v14  ;;  %v240_v14 = vld [vmem:[#allocation2 + $0x640] sm:$0xff] }
 0x14f   :  { %v3325_v23 = vpop.f32.mrf.mxu0  ;;  %1502 = vmatmul.mubr.f32.gmra.mxu0 %v212_v16  ;;  %1121 = vmatprep.mubr.f32.mxu1 %v217_v17  ;;  %v242_v16 = vld [vmem:[#allocation2 + $0x650] sm:$0xff]  ;;  %v247_v17 = vld [vmem:[#allocation2 + $0x678] sm:$0xff] }
 0x150   :  { %v815_v25 = vpop.f32.mrf.mxu1  ;;  %1506 = vmatprep.mubr.f32.mxu0 %v219_v21  ;;  %v249_v21 = vld [vmem:[#allocation2 + $0x688] sm:$0xff] }
 0x151   :  { %v655_v30 = vpop.f32.mrf.mxu0 }
 0x152   :  { %v3327_v32 = vpop.f32.mrf.mxu1  ;;  %1122 = vmatmul.mubr.f32.gmra.mxu1 %v216_v24  ;;  %v248_v30 = vld [vmem:[#allocation2 + $0x680] sm:$0xff] }
 0x153   :  { %v3329_v33 = vpop.f32.mrf.mxu0  ;;  %1507 = vmatmul.mubr.f32.gmra.mxu0 %v218_v28  ;;  %1126 = vmatprep.mubr.f32.mxu1 %v223_v29  ;;  %v246_v28 = vld [vmem:[#allocation2 + $0x670] sm:$0xff] }
 0x154   :  { %v820_v37 = vpop.f32.mrf.mxu1  ;;  %1511 = vmatprep.mubr.f32.mxu0 %v225_v31  ;;  %v253_v31 = vld [vmem:[#allocation2 + $0x6a8] sm:$0xff] }
 0x155   :  { %v660_v40 = vpop.f32.mrf.mxu0  ;;  %v255_v37 = vld [vmem:[#allocation2 + $0x6b8] sm:$0xff] }
 0x156   :  { %v3331_v46 = vpop.f32.mrf.mxu1  ;;  %1127 = vmatmul.mubr.f32.gmra.mxu1 %v222_v36  ;;  %v252_v40 = vld [vmem:[#allocation2 + $0x6a0] sm:$0xff] }
 0x157   :  { %v3333_v0 = vpop.f32.mrf.mxu0  ;;  %1512 = vmatmul.mubr.f32.gmra.mxu0 %v224_v38  ;;  %1131 = vmatprep.mubr.f32.mxu1 %v229_v39 }
 0x158   :  { %v825_v48 = vpop.f32.mrf.mxu1  ;;  %1516 = vmatprep.mubr.f32.mxu0 %v231_v41 }
 0x159   :  { %v665_v55 = vpop.f32.mrf.mxu0  ;;  %v259_v48 = vld [vmem:[#allocation2 + $0x6d8] sm:$0xff] }
 0x15a   :  { %v3335_v59 = vpop.f32.mrf.mxu1  ;;  %1132 = vmatmul.mubr.f32.gmra.mxu1 %v228_v47  ;;  %v254_v47 = vld [vmem:[#allocation2 + $0x6b0] sm:$0xff] }
 0x15b   :  { %4450 = vst [vmem:[#allocation8_spill] sm:$0xff] %v3335_v59  ;;  %v3337_v60 = vpop.f32.mrf.mxu0  ;;  %1517 = vmatmul.mubr.f32.gmra.mxu0 %v230_v51  ;;  %1136 = vmatprep.mubr.f32.mxu1 %v235_v52  ;;  %v261_v52 = vld [vmem:[#allocation2 + $0x6e8] sm:$0xff] }
 0x15c   :  { %v830_v62 = vpop.f32.mrf.mxu1  ;;  %1521 = vmatprep.mubr.f32.mxu0 %v237_v56 }
 0x15d   :  { %v670_v6 = vpop.f32.mrf.mxu0 }
 0x15e   :  { %v3339_v8 = vpop.f32.mrf.mxu1  ;;  %1137 = vmatmul.mubr.f32.gmra.mxu1 %v234_v61  ;;  %v258_v61 = vld [vmem:[#allocation2 + $0x6d0] sm:$0xff] }
 0x15f   :  { %4451 = vst [vmem:[#allocation9_spill] sm:$0xff] %v3339_v8  ;;  %v3341_v9 = vpop.f32.mrf.mxu0  ;;  %1522 = vmatmul.mubr.f32.gmra.mxu0 %v236_v4  ;;  %1141 = vmatprep.mubr.f32.mxu1 %v241_v5  ;;  %v260_v4 = vld [vmem:[#allocation2 + $0x6e0] sm:$0xff]  ;;  %v265_v5 = vld [vmem:[#allocation2 + $0x708] sm:$0xff] }
 0x160   :  { %v835_v15 = vpop.f32.mrf.mxu1  ;;  %1526 = vmatprep.mubr.f32.mxu0 %v243_v7  ;;  %v267_v7 = vld [vmem:[#allocation2 + $0x718] sm:$0xff] }
 0x161   :  { %v675_v20 = vpop.f32.mrf.mxu0 }
 0x162   :  { %v3343_v24 = vpop.f32.mrf.mxu1  ;;  %1142 = vmatmul.mubr.f32.gmra.mxu1 %v240_v14  ;;  %v266_v20 = vld [vmem:[#allocation2 + $0x710] sm:$0xff] }
 0x163   :  { %4452 = vst [vmem:[#allocation10_spill] sm:$0xff] %v3343_v24  ;;  %v3345_v25 = vpop.f32.mrf.mxu0  ;;  %1527 = vmatmul.mubr.f32.gmra.mxu0 %v242_v16  ;;  %1146 = vmatprep.mubr.f32.mxu1 %v247_v17  ;;  %v264_v16 = vld [vmem:[#allocation2 + $0x700] sm:$0xff]  ;;  %v338_v24 = vld [vmem:[#allocation2 + $0x950] sm:$0xff] }
 0x164   :  { %v840_v29 = vpop.f32.mrf.mxu1  ;;  %1531 = vmatprep.mubr.f32.mxu0 %v249_v21  ;;  %v271_v21 = vld [vmem:[#allocation2 + $0x738] sm:$0xff] }
 0x165   :  { %v680_v36 = vpop.f32.mrf.mxu0  ;;  %v273_v29 = vld [vmem:[#allocation2 + $0x748] sm:$0xff] }
 0x166   :  { %v3347_v38 = vpop.f32.mrf.mxu1  ;;  %1147 = vmatmul.mubr.f32.gmra.mxu1 %v246_v28  ;;  %v270_v36 = vld [vmem:[#allocation2 + $0x730] sm:$0xff] }
 0x167   :  { %4453 = vst [vmem:[#allocation11_spill] sm:$0xff] %v3347_v38  ;;  %v3349_v39 = vpop.f32.mrf.mxu0  ;;  %1532 = vmatmul.mubr.f32.gmra.mxu0 %v248_v30  ;;  %1151 = vmatprep.mubr.f32.mxu1 %v253_v31 }
 0x168   :  { %v845_v41 = vpop.f32.mrf.mxu1  ;;  %1536 = vmatprep.mubr.f32.mxu0 %v255_v37 }
 0x169   :  { %v685_v51 = vpop.f32.mrf.mxu0  ;;  %v277_v41 = vld [vmem:[#allocation2 + $0x768] sm:$0xff] }
 0x16a   :  { %v3351_v55 = vpop.f32.mrf.mxu1  ;;  %1152 = vmatmul.mubr.f32.gmra.mxu1 %v252_v40  ;;  %v272_v40 = vld [vmem:[#allocation2 + $0x740] sm:$0xff] }
 0x16b   :  { %4454 = vst [vmem:[#allocation12_spill] sm:$0xff] %v3351_v55  ;;  %v3353_v56 = vpop.f32.mrf.mxu0  ;;  %1537 = vmatmul.mubr.f32.gmra.mxu0 %v254_v47  ;;  %1156 = vmatprep.mubr.f32.mxu1 %v259_v48  ;;  %v279_v48 = vld [vmem:[#allocation2 + $0x778] sm:$0xff]  ;;  %v333_v55 = vld [vmem:[#allocation2 + $0x928] sm:$0xff] }
 0x16c   :  { %v850_v62 = vpop.f32.mrf.mxu1  ;;  %1541 = vmatprep.mubr.f32.mxu0 %v261_v52 }
 0x16d   :  { %v690_v6 = vpop.f32.mrf.mxu0 }
 0x16e   :  { %v3355_v14 = vpop.f32.mrf.mxu1  ;;  %1157 = vmatmul.mubr.f32.gmra.mxu1 %v258_v61  ;;  %v276_v61 = vld [vmem:[#allocation2 + $0x760] sm:$0xff] }
 0x16f   :  { %4455 = vst [vmem:[#allocation13_spill] sm:$0xff] %v3355_v14  ;;  %v3357_v15 = vpop.f32.mrf.mxu0  ;;  %1542 = vmatmul.mubr.f32.gmra.mxu0 %v260_v4  ;;  %1161 = vmatprep.mubr.f32.mxu1 %v265_v5  ;;  %v278_v4 = vld [vmem:[#allocation2 + $0x770] sm:$0xff]  ;;  %v283_v5 = vld [vmem:[#allocation2 + $0x798] sm:$0xff] }
 0x170   :  { %v855_v17 = vpop.f32.mrf.mxu1  ;;  %1546 = vmatprep.mubr.f32.mxu0 %v267_v7  ;;  %v285_v7 = vld [vmem:[#allocation2 + $0x7a8] sm:$0xff]  ;;  %v327_v14 = vld [vmem:[#allocation2 + $0x8f8] sm:$0xff] }
 0x171   :  { %v695_v28 = vpop.f32.mrf.mxu0 }
 0x172   :  { %v3359_v30 = vpop.f32.mrf.mxu1  ;;  %1162 = vmatmul.mubr.f32.gmra.mxu1 %v264_v16  ;;  %v284_v28 = vld [vmem:[#allocation2 + $0x7a0] sm:$0xff] }
 0x173   :  { %4456 = vst [vmem:[#allocation14_spill] sm:$0xff] %v3359_v30  ;;  %v3361_v31 = vpop.f32.mrf.mxu0  ;;  %1547 = vmatmul.mubr.f32.gmra.mxu0 %v266_v20  ;;  %1166 = vmatprep.mubr.f32.mxu1 %v271_v21  ;;  %v282_v20 = vld [vmem:[#allocation2 + $0x790] sm:$0xff]  ;;  %v321_v30 = vld [vmem:[#allocation2 + $0x8c8] sm:$0xff] }
 0x174   :  { %v860_v37 = vpop.f32.mrf.mxu1  ;;  %1551 = vmatprep.mubr.f32.mxu0 %v273_v29  ;;  %v289_v29 = vld [vmem:[#allocation2 + $0x7c8] sm:$0xff] }
 0x175   :  { %v700_v47 = vpop.f32.mrf.mxu0  ;;  %v291_v37 = vld [vmem:[#allocation2 + $0x7d8] sm:$0xff] }
 0x176   :  { %v3363_v51 = vpop.f32.mrf.mxu1  ;;  %1167 = vmatmul.mubr.f32.gmra.mxu1 %v270_v36  ;;  %v288_v47 = vld [vmem:[#allocation2 + $0x7c0] sm:$0xff] }
 0x177   :  { %4457 = vst [vmem:[#allocation15_spill] sm:$0xff] %v3363_v51  ;;  %v3365_v52 = vpop.f32.mrf.mxu0  ;;  %1552 = vmatmul.mubr.f32.gmra.mxu0 %v272_v40  ;;  %1171 = vmatprep.mubr.f32.mxu1 %v277_v41  ;;  %v315_v51 = vld [vmem:[#allocation2 + $0x898] sm:$0xff] }
 0x178   :  { %v865_v62 = vpop.f32.mrf.mxu1  ;;  %1556 = vmatprep.mubr.f32.mxu0 %v279_v48 }
 0x179   :  { %v705_v6 = vpop.f32.mrf.mxu0  ;;  %v295_v62 = vld [vmem:[#allocation2 + $0x7f8] sm:$0xff] }
 0x17a   :  { %v3367_v16 = vpop.f32.mrf.mxu1  ;;  %1172 = vmatmul.mubr.f32.gmra.mxu1 %v276_v61  ;;  %v290_v61 = vld [vmem:[#allocation2 + $0x7d0] sm:$0xff] }
 0x17b   :  { %4458 = vst [vmem:[#allocation16_spill] sm:$0xff] %v3367_v16  ;;  %v3369_v17 = vpop.f32.mrf.mxu0  ;;  %1557 = vmatmul.mubr.f32.gmra.mxu0 %v278_v4  ;;  %1176 = vmatprep.mubr.f32.mxu1 %v283_v5  ;;  %v297_v5 = vld [vmem:[#allocation2 + $0x808] sm:$0xff] }
 0x17c   :  { %v870_v21 = vpop.f32.mrf.mxu1  ;;  %1561 = vmatprep.mubr.f32.mxu0 %v285_v7  ;;  %v309_v16 = vld [vmem:[#allocation2 + $0x868] sm:$0xff] }
 0x17d   :  { %v710_v36 = vpop.f32.mrf.mxu0  ;;  %v294_v21 = vld [vmem:[#allocation2 + $0x7f0] sm:$0xff] }
 0x17e   :  { %v3371_v40 = vpop.f32.mrf.mxu1  ;;  %1177 = vmatmul.mubr.f32.gmra.mxu1 %v282_v20  ;;  %v296_v36 = vld [vmem:[#allocation2 + $0x800] sm:$0xff] }
 0x17f   :  { %4459 = vst [vmem:[#allocation17_spill] sm:$0xff] %v3371_v40  ;;  %v3373_v41 = vpop.f32.mrf.mxu0  ;;  %1562 = vmatmul.mubr.f32.gmra.mxu0 %v284_v28  ;;  %1181 = vmatprep.mubr.f32.mxu1 %v289_v29  ;;  %v301_v28 = vld [vmem:[#allocation2 + $0x828] sm:$0xff]  ;;  %v303_v40 = vld [vmem:[#allocation2 + $0x838] sm:$0xff] }
 0x180   :  { %v875_v48 = vpop.f32.mrf.mxu1  ;;  %1566 = vmatprep.mubr.f32.mxu0 %v291_v37 }
 0x181   :  { %v715_v4 = vpop.f32.mrf.mxu0 }
 0x182   :  { %v3375_v6 = vpop.f32.mrf.mxu1  ;;  %1182 = vmatmul.mubr.f32.gmra.mxu1 %v288_v47  ;;  %v300_v4 = vld [vmem:[#allocation2 + $0x820] sm:$0xff] }
 0x183   :  { %4460 = vst [vmem:[#allocation18_spill] sm:$0xff] %v3375_v6  ;;  %v3377_v7 = vpop.f32.mrf.mxu0  ;;  %1567 = vmatmul.mubr.f32.gmra.mxu0 %v290_v61  ;;  %1186 = vmatprep.mubr.f32.mxu1 %v295_v62  ;;  %v302_v6 = vld [vmem:[#allocation2 + $0x830] sm:$0xff]  ;;  %v307_v61 = vld [vmem:[#allocation2 + $0x858] sm:$0xff] }
 0x184   :  { %v880_v20 = vpop.f32.mrf.mxu1  ;;  %1571 = vmatprep.mubr.f32.mxu0 %v297_v5 }
 0x185   :  { %v720_v29 = vpop.f32.mrf.mxu0 }
 0x186   :  { %v3379_v48 = vpop.f32.mrf.mxu1  ;;  %1187 = vmatmul.mubr.f32.gmra.mxu1 %v294_v21  ;;  %v306_v29 = vld [vmem:[#allocation2 + $0x850] sm:$0xff] }
 0x187   :  { %4461 = vst [vmem:[#allocation19_spill] sm:$0xff] %v3379_v48  ;;  %v3381_v37 = vpop.f32.mrf.mxu0  ;;  %1572 = vmatmul.mubr.f32.gmra.mxu0 %v296_v36  ;;  %1191 = vmatprep.mubr.f32.mxu1 %v301_v28  ;;  %v308_v48 = vld [vmem:[#allocation2 + $0x860] sm:$0xff]  ;;  %v313_v36 = vld [vmem:[#allocation2 + $0x888] sm:$0xff] }
 0x188   :  { %v885_v47 = vpop.f32.mrf.mxu1  ;;  %1576 = vmatprep.mubr.f32.mxu0 %v303_v40 }
 0x189   :  { %v725_v62 = vpop.f32.mrf.mxu0 }
 0x18a   :  { %v3383_v20 = vpop.f32.mrf.mxu1  ;;  %1192 = vmatmul.mubr.f32.gmra.mxu1 %v300_v4  ;;  %v312_v62 = vld [vmem:[#allocation2 + $0x880] sm:$0xff] }
 0x18b   :  { %4462 = vst [vmem:[#allocation20_spill] sm:$0xff] %v3383_v20  ;;  %v3385_v5 = vpop.f32.mrf.mxu0  ;;  %1577 = vmatmul.mubr.f32.gmra.mxu0 %v302_v6  ;;  %1196 = vmatprep.mubr.f32.mxu1 %v307_v61  ;;  %v314_v20 = vld [vmem:[#allocation2 + $0x890] sm:$0xff]  ;;  %v319_v6 = vld [vmem:[#allocation2 + $0x8b8] sm:$0xff] }
 0x18c   :  { %v890_v21 = vpop.f32.mrf.mxu1  ;;  %1581 = vmatprep.mubr.f32.mxu0 %v309_v16 }
 0x18d   :  { %v730_v28 = vpop.f32.mrf.mxu0 }
 0x18e   :  { %v3387_v47 = vpop.f32.mrf.mxu1  ;;  %1197 = vmatmul.mubr.f32.gmra.mxu1 %v306_v29  ;;  %v318_v28 = vld [vmem:[#allocation2 + $0x8b0] sm:$0xff] }
 0x18f   :  { %4463 = vst [vmem:[#allocation21_spill] sm:$0xff] %v3387_v47  ;;  %v3389_v40 = vpop.f32.mrf.mxu0  ;;  %1582 = vmatmul.mubr.f32.gmra.mxu0 %v308_v48  ;;  %1201 = vmatprep.mubr.f32.mxu1 %v313_v36  ;;  %v320_v47 = vld [vmem:[#allocation2 + $0x8c0] sm:$0xff]  ;;  %v325_v48 = vld [vmem:[#allocation2 + $0x8e8] sm:$0xff] }
 0x190   :  { %v895_v4 = vpop.f32.mrf.mxu1  ;;  %1586 = vmatprep.mubr.f32.mxu0 %v315_v51 }
 0x191   :  { %v735_v61 = vpop.f32.mrf.mxu0 }
 0x192   :  { %v3391_v21 = vpop.f32.mrf.mxu1  ;;  %1202 = vmatmul.mubr.f32.gmra.mxu1 %v312_v62  ;;  %v324_v61 = vld [vmem:[#allocation2 + $0x8e0] sm:$0xff] }
 0x193   :  { %4464 = vst [vmem:[#allocation22_spill] sm:$0xff] %v3391_v21  ;;  %v3393_v16 = vpop.f32.mrf.mxu0  ;;  %1587 = vmatmul.mubr.f32.gmra.mxu0 %v314_v20  ;;  %1206 = vmatprep.mubr.f32.mxu1 %v319_v6  ;;  %v326_v21 = vld [vmem:[#allocation2 + $0x8f0] sm:$0xff]  ;;  %v331_v20 = vld [vmem:[#allocation2 + $0x918] sm:$0xff] }
 0x194   :  { %v900_v29 = vpop.f32.mrf.mxu1  ;;  %1591 = vmatprep.mubr.f32.mxu0 %v321_v30 }
 0x195   :  { %v740_v36 = vpop.f32.mrf.mxu0 }
 0x196   :  { %v3395_v4 = vpop.f32.mrf.mxu1  ;;  %1207 = vmatmul.mubr.f32.gmra.mxu1 %v318_v28  ;;  %v330_v36 = vld [vmem:[#allocation2 + $0x910] sm:$0xff]  ;;  %v3403_v28 = vld [vmem:[#allocation4] ss:$0 sm:$0xff] }
 0x197   :  { %4465 = vst [vmem:[#allocation23_spill] sm:$0xff] %v3395_v4  ;;  %v3397_v51 = vpop.f32.mrf.mxu0  ;;  %1592 = vmatmul.mubr.f32.gmra.mxu0 %v320_v47  ;;  %1211 = vmatprep.mubr.f32.mxu1 %v325_v48  ;;  %v332_v47 = vld [vmem:[#allocation2 + $0x920] sm:$0xff]  ;;  %v337_v48 = vld [vmem:[#allocation2 + $0x948] sm:$0xff] }
 0x198   :  { %v905_v62 = vpop.f32.mrf.mxu1  ;;  %1596 = vmatprep.mubr.f32.mxu0 %v327_v14  ;;  %v594_v14 = vadd.f32 %v3403_v28, %v3277_v43 }
 0x199   :  { %v745_v6 = vpop.f32.mrf.mxu0 }
 0x19a   :  { %v3399_v29 = vpop.f32.mrf.mxu1  ;;  %1212 = vmatmul.mubr.f32.gmra.mxu1 %v324_v61  ;;  %v339_v6 = vld [vmem:[#allocation2 + $0x958] sm:$0xff] }
 0x19b   :  { %4466 = vst [vmem:[#allocation24_spill] sm:$0xff] %v3399_v29  ;;  %v3401_v30 = vpop.f32.mrf.mxu0  ;;  %1597 = vmatmul.mubr.f32.gmra.mxu0 %v326_v21  ;;  %1216 = vmatprep.mubr.f32.mxu1 %v331_v20  ;;  %v336_v21 = vld [vmem:[#allocation2 + $0x940] sm:$0xff] }
 0x19c   :  { %v910_v4 = vpop.f32.mrf.mxu1  ;;  %1601 = vmatprep.mubr.f32.mxu0 %v333_v55  ;;  %v599_v55 = vadd.f32 %v3403_v28, %v3281_v50  ;;  %v604_v50 = vadd.f32 %v3403_v28, %v3285_v58  ;;  %v609_v58 = vadd.f32 %v3403_v28, %v3289_v3  ;;  %v614_v3 = vadd.f32 %v3403_v28, %v3293_v11 }
 0x19d   :  { %v750_v62 = vpop.f32.mrf.mxu0  ;;  %v343_v4 = vld [vmem:[#allocation2 + $0x978] sm:$0xff]  ;;  %v619_v11 = vadd.f32 %v3403_v28, %v3297_v19  ;;  %v624_v19 = vadd.f32 %v3403_v28, %v3301_v27  ;;  %v629_v27 = vadd.f32 %v3403_v28, %v3305_v35  ;;  %v634_v35 = vadd.f32 %v3403_v28, %v3309_v45 }
 0x19e   :  { %v978_v38 = vpop.f32.mrf.mxu1  ;;  %1217 = vmatmul.mubr.f32.gmra.mxu1 %v330_v36  ;;  %v345_v62 = vld [vmem:[#allocation2 + $0x988] sm:$0xff]  ;;  %v639_v45 = vadd.f32 %v3403_v28, %v3313_v54  ;;  %v644_v54 = vadd.f32 %v3403_v28, %v3317_v1  ;;  %v649_v1 = vadd.f32 %v3403_v28, %v3321_v13  ;;  %v654_v13 = vadd.f32 %v3403_v28, %v3325_v23 }
 0x19f   :  { %v979_v29 = vadd.f32 %v978_v38, %v594_v14  ;;  %v1363_v61 = vpop.f32.mrf.mxu0  ;;  %1602 = vmatmul.mubr.f32.gmra.mxu0 %v332_v47  ;;  %1221 = vmatprep.mubr.f32.mxu1 %v337_v48  ;;  %v342_v48 = vld [vmem:[#allocation2 + $0x970] sm:$0xff]  ;;  %v659_v23 = vadd.f32 %v3403_v28, %v3329_v33  ;;  %v664_v33 = vadd.f32 %v3403_v28, %v3333_v0 }
 0x1a0   :  { %v980_v20 = vpop.f32.mrf.mxu1  ;;  %1606 = vmatprep.mubr.f32.mxu0 %v339_v6  ;;  %v344_v6 = vld [vmem:[#allocation2 + $0x980] sm:$0xff]  ;;  %v669_v0 = vadd.f32 %v3403_v28, %v3337_v60 }
 0x1a1   :  { %v3409_v8 = vadd.f32 %v1363_v61, %v979_v29  ;;  %v1365_v43 = vpop.f32.mrf.mxu0  ;;  %v349_v20 = vld [vmem:[#allocation2 + $0x9a8] sm:$0xff] }
 0x1a2   :  { %v983_v59 = vpop.f32.mrf.mxu1  ;;  %1222 = vmatmul.mubr.f32.gmra.mxu1 %v336_v21  ;;  %v351_v21 = vld [vmem:[#allocation2 + $0x9b8] sm:$0xff]  ;;  %v348_v43 = vld [vmem:[#allocation2 + $0x9a0] sm:$0xff] }
 0x1a3   :  { %v984_v36 = vadd.f32 %v983_v59, %v599_v55  ;;  %v1368_v38 = vpop.f32.mrf.mxu0  ;;  %1607 = vmatmul.mubr.f32.gmra.mxu0 %v338_v24  ;;  %v1683_v47 = vsel %vm1682_vm0, %v3409_v8, -inf  ;;  %1226 = vmatprep.mubr.f32.mxu1 %v343_v4 }
 0x1a4   :  { %v985_v14 = vpop.f32.mrf.mxu1  ;;  %1684 = vmax.xlane.f32.xlu0 %v1683_v47  ;;  %1611 = vmatprep.mubr.f32.mxu0 %v345_v62  ;;  %v350_v47 = vld [vmem:[#allocation2 + $0x9b0] sm:$0xff] }
 0x1a5   :  { %v3415_v29 = vadd.f32 %v1368_v38, %v984_v36  ;;  %v1370_v61 = vpop.f32.mrf.mxu0  ;;  %v355_v14 = vld [vmem:[#allocation2 + $0x9d8] sm:$0xff] }
 0x1a6   :  { %v988_v59 = vpop.f32.mrf.mxu1  ;;  %1227 = vmatmul.mubr.f32.gmra.mxu1 %v342_v48  ;;  %v357_v48 = vld [vmem:[#allocation2 + $0x9e8] sm:$0xff] }
 0x1a7   :  { %v989_v24 = vadd.f32 %v988_v59, %v604_v50  ;;  %v1373_v55 = vpop.f32.mrf.mxu0  ;;  %1612 = vmatmul.mubr.f32.gmra.mxu0 %v344_v6  ;;  %v1686_v4 = vsel %vm1682_vm0, %v3415_v29, -inf  ;;  %1231 = vmatprep.mubr.f32.mxu1 %v349_v20  ;;  %v354_v59 = vld [vmem:[#allocation2 + $0x9d0] sm:$0xff] }
 0x1a8   :  { %v990_v62 = vpop.f32.mrf.mxu1  ;;  %1687 = vmax.xlane.f32.xlu0 %v1686_v4  ;;  %1616 = vmatprep.mubr.f32.mxu0 %v351_v21  ;;  %v356_v4 = vld [vmem:[#allocation2 + $0x9e0] sm:$0xff] }
 0x1a9   :  { %v3421_v36 = vadd.f32 %v1373_v55, %v989_v24  ;;  %v1375_v38 = vpop.f32.mrf.mxu0  ;;  %v361_v62 = vld [vmem:[#allocation2 + $0xa08] sm:$0xff] }
 0x1aa   :  { %v993_v50 = vpop.f32.mrf.mxu1  ;;  %1232 = vmatmul.mubr.f32.gmra.mxu1 %v348_v43  ;;  %v363_v43 = vld [vmem:[#allocation2 + $0xa18] sm:$0xff] }
 0x1ab   :  { %v994_v6 = vadd.f32 %v993_v50, %v609_v58  ;;  %v1378_v61 = vpop.f32.mrf.mxu0  ;;  %1617 = vmatmul.mubr.f32.gmra.mxu0 %v350_v47  ;;  %v1689_v20 = vsel %vm1682_vm0, %v3421_v36, -inf  ;;  %1236 = vmatprep.mubr.f32.mxu1 %v355_v14  ;;  %v360_v50 = vld [vmem:[#allocation2 + $0xa00] sm:$0xff] }
 0x1ac   :  { %v995_v21 = vpop.f32.mrf.mxu1  ;;  %1690 = vmax.xlane.f32.xlu1 %v1689_v20  ;;  %1621 = vmatprep.mubr.f32.mxu0 %v357_v48  ;;  %v362_v20 = vld [vmem:[#allocation2 + $0xa10] sm:$0xff] }
 0x1ad   :  { %v3427_v24 = vadd.f32 %v1378_v61, %v994_v6  ;;  %v1380_v55 = vpop.f32.mrf.mxu0  ;;  %v367_v21 = vld [vmem:[#allocation2 + $0xa38] sm:$0xff] }
 0x1ae   :  { %v998_v58 = vpop.f32.mrf.mxu1  ;;  %1237 = vmatmul.mubr.f32.gmra.mxu1 %v354_v59  ;;  %v369_v59 = vld [vmem:[#allocation2 + $0xa48] sm:$0xff] }
 0x1af   :  { %v999_v47 = vadd.f32 %v998_v58, %v614_v3  ;;  %v1383_v38 = vpop.f32.mrf.mxu0  ;;  %1622 = vmatmul.mubr.f32.gmra.mxu0 %v356_v4  ;;  %v1692_v14 = vsel %vm1682_vm0, %v3427_v24, -inf  ;;  %1241 = vmatprep.mubr.f32.mxu1 %v361_v62  ;;  %v366_v58 = vld [vmem:[#allocation2 + $0xa30] sm:$0xff] }
 0x1b0   :  { %v1000_v48 = vpop.f32.mrf.mxu1  ;;  %1693 = vmax.xlane.f32.xlu1 %v1692_v14  ;;  %1626 = vmatprep.mubr.f32.mxu0 %v363_v43  ;;  %v368_v14 = vld [vmem:[#allocation2 + $0xa40] sm:$0xff] }
 0x1b1   :  { %v3433_v6 = vadd.f32 %v1383_v38, %v999_v47  ;;  %v1385_v61 = vpop.f32.mrf.mxu0  ;;  %v373_v48 = vld [vmem:[#allocation2 + $0xa68] sm:$0xff] }
 0x1b2   :  { %v1003_v3 = vpop.f32.mrf.mxu1  ;;  %1242 = vmatmul.mubr.f32.gmra.mxu1 %v360_v50  ;;  %v375_v50 = vld [vmem:[#allocation2 + $0xa78] sm:$0xff] }
 0x1b3   :  { %v1004_v4 = vadd.f32 %v1003_v3, %v619_v11  ;;  %v1388_v55 = vpop.f32.mrf.mxu0  ;;  %1627 = vmatmul.mubr.f32.gmra.mxu0 %v362_v20  ;;  %v1695_v62 = vsel %vm1682_vm0, %v3433_v6, -inf  ;;  %1246 = vmatprep.mubr.f32.mxu1 %v367_v21  ;;  %v372_v3 = vld [vmem:[#allocation2 + $0xa60] sm:$0xff] }
 0x1b4   :  { %v1005_v43 = vpop.f32.mrf.mxu1  ;;  %1696 = vmax.xlane.f32.xlu0 %v1695_v62  ;;  %1631 = vmatprep.mubr.f32.mxu0 %v369_v59  ;;  %v374_v62 = vld [vmem:[#allocation2 + $0xa70] sm:$0xff] }
 0x1b5   :  { %v3439_v47 = vadd.f32 %v1388_v55, %v1004_v4  ;;  %v1390_v38 = vpop.f32.mrf.mxu0  ;;  %v379_v43 = vld [vmem:[#allocation2 + $0xa98] sm:$0xff] }
 0x1b6   :  { %v1008_v11 = vpop.f32.mrf.mxu1  ;;  %1247 = vmatmul.mubr.f32.gmra.mxu1 %v366_v58  ;;  %v381_v58 = vld [vmem:[#allocation2 + $0xaa8] sm:$0xff] }
 0x1b7   :  { %v1009_v20 = vadd.f32 %v1008_v11, %v624_v19  ;;  %v1393_v61 = vpop.f32.mrf.mxu0  ;;  %1632 = vmatmul.mubr.f32.gmra.mxu0 %v368_v14  ;;  %v1698_v21 = vsel %vm1682_vm0, %v3439_v47, -inf  ;;  %1251 = vmatprep.mubr.f32.mxu1 %v373_v48  ;;  %v378_v11 = vld [vmem:[#allocation2 + $0xa90] sm:$0xff] }
 0x1b8   :  { %v1010_v59 = vpop.f32.mrf.mxu1  ;;  %1699 = vmax.xlane.f32.xlu1 %v1698_v21  ;;  %1636 = vmatprep.mubr.f32.mxu0 %v375_v50  ;;  %v380_v21 = vld [vmem:[#allocation2 + $0xaa0] sm:$0xff] }
 0x1b9   :  { %v3445_v4 = vadd.f32 %v1393_v61, %v1009_v20  ;;  %v1395_v55 = vpop.f32.mrf.mxu0  ;;  %v385_v59 = vld [vmem:[#allocation2 + $0xac8] sm:$0xff] }
 0x1ba   :  { %v1013_v19 = vpop.f32.mrf.mxu1  ;;  %1252 = vmatmul.mubr.f32.gmra.mxu1 %v372_v3  ;;  %v387_v3 = vld [vmem:[#allocation2 + $0xad8] sm:$0xff] }
 0x1bb   :  { %v1014_v14 = vadd.f32 %v1013_v19, %v629_v27  ;;  %v1398_v38 = vpop.f32.mrf.mxu0  ;;  %1637 = vmatmul.mubr.f32.gmra.mxu0 %v374_v62  ;;  %v1701_v48 = vsel %vm1682_vm0, %v3445_v4, -inf  ;;  %1256 = vmatprep.mubr.f32.mxu1 %v379_v43  ;;  %v384_v19 = vld [vmem:[#allocation2 + $0xac0] sm:$0xff] }
 0x1bc   :  { %v1015_v50 = vpop.f32.mrf.mxu1  ;;  %1702 = vmax.xlane.f32.xlu0 %v1701_v48  ;;  %1641 = vmatprep.mubr.f32.mxu0 %v381_v58  ;;  %v386_v48 = vld [vmem:[#allocation2 + $0xad0] sm:$0xff] }
 0x1bd   :  { %v3451_v20 = vadd.f32 %v1398_v38, %v1014_v14  ;;  %v1400_v61 = vpop.f32.mrf.mxu0  ;;  %v391_v50 = vld [vmem:[#allocation2 + $0xaf8] sm:$0xff] }
 0x1be   :  { %v1018_v27 = vpop.f32.mrf.mxu1  ;;  %1257 = vmatmul.mubr.f32.gmra.mxu1 %v378_v11  ;;  %v393_v11 = vld [vmem:[#allocation2 + $0xb08] sm:$0xff] }
 0x1bf   :  { %v1019_v62 = vadd.f32 %v1018_v27, %v634_v35  ;;  %v1403_v55 = vpop.f32.mrf.mxu0  ;;  %1642 = vmatmul.mubr.f32.gmra.mxu0 %v380_v21  ;;  %v1704_v43 = vsel %vm1682_vm0, %v3451_v20, -inf  ;;  %1261 = vmatprep.mubr.f32.mxu1 %v385_v59  ;;  %v390_v27 = vld [vmem:[#allocation2 + $0xaf0] sm:$0xff] }
 0x1c0   :  { %v1020_v58 = vpop.f32.mrf.mxu1  ;;  %1705 = vmax.xlane.f32.xlu1 %v1704_v43  ;;  %1646 = vmatprep.mubr.f32.mxu0 %v387_v3  ;;  %v392_v43 = vld [vmem:[#allocation2 + $0xb00] sm:$0xff] }
 0x1c1   :  { %v3457_v14 = vadd.f32 %v1403_v55, %v1019_v62  ;;  %v1405_v38 = vpop.f32.mrf.mxu0  ;;  %v397_v58 = vld [vmem:[#allocation2 + $0xb28] sm:$0xff] }
 0x1c2   :  { %v1023_v35 = vpop.f32.mrf.mxu1  ;;  %1262 = vmatmul.mubr.f32.gmra.mxu1 %v384_v19  ;;  %v399_v19 = vld [vmem:[#allocation2 + $0xb38] sm:$0xff] }
 0x1c3   :  { %v1024_v21 = vadd.f32 %v1023_v35, %v639_v45  ;;  %v1408_v61 = vpop.f32.mrf.mxu0  ;;  %1647 = vmatmul.mubr.f32.gmra.mxu0 %v386_v48  ;;  %v1707_v59 = vsel %vm1682_vm0, %v3457_v14, -inf  ;;  %1266 = vmatprep.mubr.f32.mxu1 %v391_v50  ;;  %v396_v35 = vld [vmem:[#allocation2 + $0xb20] sm:$0xff] }
 0x1c4   :  { %v1025_v3 = vpop.f32.mrf.mxu1  ;;  %1708 = vmax.xlane.f32.xlu0 %v1707_v59  ;;  %1651 = vmatprep.mubr.f32.mxu0 %v393_v11  ;;  %v398_v59 = vld [vmem:[#allocation2 + $0xb30] sm:$0xff] }
 0x1c5   :  { %v3463_v62 = vadd.f32 %v1408_v61, %v1024_v21  ;;  %v1410_v55 = vpop.f32.mrf.mxu0  ;;  %v403_v3 = vld [vmem:[#allocation2 + $0xb58] sm:$0xff] }
 0x1c6   :  { %v1028_v45 = vpop.f32.mrf.mxu1  ;;  %1267 = vmatmul.mubr.f32.gmra.mxu1 %v390_v27  ;;  %v405_v27 = vld [vmem:[#allocation2 + $0xb68] sm:$0xff] }
 0x1c7   :  { %v1029_v48 = vadd.f32 %v1028_v45, %v644_v54  ;;  %v1413_v38 = vpop.f32.mrf.mxu0  ;;  %1652 = vmatmul.mubr.f32.gmra.mxu0 %v392_v43  ;;  %v1710_v50 = vsel %vm1682_vm0, %v3463_v62, -inf  ;;  %1271 = vmatprep.mubr.f32.mxu1 %v397_v58  ;;  %v402_v45 = vld [vmem:[#allocation2 + $0xb50] sm:$0xff] }
 0x1c8   :  { %v1030_v11 = vpop.f32.mrf.mxu1  ;;  %1711 = vmax.xlane.f32.xlu1 %v1710_v50  ;;  %1656 = vmatprep.mubr.f32.mxu0 %v399_v19  ;;  %v404_v50 = vld [vmem:[#allocation2 + $0xb60] sm:$0xff] }
 0x1c9   :  { %v3469_v21 = vadd.f32 %v1413_v38, %v1029_v48  ;;  %v1415_v61 = vpop.f32.mrf.mxu0  ;;  %v409_v11 = vld [vmem:[#allocation2 + $0xb88] sm:$0xff] }
 0x1ca   :  { %v1033_v54 = vpop.f32.mrf.mxu1  ;;  %1272 = vmatmul.mubr.f32.gmra.mxu1 %v396_v35  ;;  %v411_v35 = vld [vmem:[#allocation2 + $0xb98] sm:$0xff] }
 0x1cb   :  { %v1034_v43 = vadd.f32 %v1033_v54, %v649_v1  ;;  %v1418_v55 = vpop.f32.mrf.mxu0  ;;  %1657 = vmatmul.mubr.f32.gmra.mxu0 %v398_v59  ;;  %v1713_v58 = vsel %vm1682_vm0, %v3469_v21, -inf  ;;  %1276 = vmatprep.mubr.f32.mxu1 %v403_v3  ;;  %v408_v54 = vld [vmem:[#allocation2 + $0xb80] sm:$0xff] }
 0x1cc   :  { %v1035_v19 = vpop.f32.mrf.mxu1  ;;  %1714 = vmax.xlane.f32.xlu0 %v1713_v58  ;;  %1661 = vmatprep.mubr.f32.mxu0 %v405_v27  ;;  %v410_v58 = vld [vmem:[#allocation2 + $0xb90] sm:$0xff] }
 0x1cd   :  { %v3475_v48 = vadd.f32 %v1418_v55, %v1034_v43  ;;  %v1420_v38 = vpop.f32.mrf.mxu0  ;;  %v415_v19 = vld [vmem:[#allocation2 + $0xbb8] sm:$0xff] }
 0x1ce   :  { %v1038_v1 = vpop.f32.mrf.mxu1  ;;  %1277 = vmatmul.mubr.f32.gmra.mxu1 %v402_v45  ;;  %v417_v45 = vld [vmem:[#allocation2 + $0xbc8] sm:$0xff] }
 0x1cf   :  { %v1039_v59 = vadd.f32 %v1038_v1, %v654_v13  ;;  %v1423_v61 = vpop.f32.mrf.mxu0  ;;  %1662 = vmatmul.mubr.f32.gmra.mxu0 %v404_v50  ;;  %v1716_v3 = vsel %vm1682_vm0, %v3475_v48, -inf  ;;  %1281 = vmatprep.mubr.f32.mxu1 %v409_v11  ;;  %v414_v1 = vld [vmem:[#allocation2 + $0xbb0] sm:$0xff] }
 0x1d0   :  { %v1040_v27 = vpop.f32.mrf.mxu1  ;;  %1717 = vmax.xlane.f32.xlu1 %v1716_v3  ;;  %1666 = vmatprep.mubr.f32.mxu0 %v411_v35  ;;  %v416_v3 = vld [vmem:[#allocation2 + $0xbc0] sm:$0xff] }
 0x1d1   :  { %v3481_v43 = vadd.f32 %v1423_v61, %v1039_v59  ;;  %v1425_v55 = vpop.f32.mrf.mxu0  ;;  %v421_v27 = vld [vmem:[#allocation2 + $0xbe8] sm:$0xff] }
 0x1d2   :  { %v1043_v13 = vpop.f32.mrf.mxu1  ;;  %1282 = vmatmul.mubr.f32.gmra.mxu1 %v408_v54  ;;  %v423_v54 = vld [vmem:[#allocation2 + $0xbf8] sm:$0xff] }
 0x1d3   :  { %v1044_v50 = vadd.f32 %v1043_v13, %v659_v23  ;;  %v1428_v38 = vpop.f32.mrf.mxu0  ;;  %1667 = vmatmul.mubr.f32.gmra.mxu0 %v410_v58  ;;  %v1719_v11 = vsel %vm1682_vm0, %v3481_v43, -inf  ;;  %1286 = vmatprep.mubr.f32.mxu1 %v415_v19  ;;  %v420_v13 = vld [vmem:[#allocation2 + $0xbe0] sm:$0xff] }
 0x1d4   :  { %v1045_v35 = vpop.f32.mrf.mxu1  ;;  %1720 = vmax.xlane.f32.xlu0 %v1719_v11  ;;  %1671 = vmatprep.mubr.f32.mxu0 %v417_v45  ;;  %v422_v11 = vld [vmem:[#allocation2 + $0xbf0] sm:$0xff] }
 0x1d5   :  { %v3487_v59 = vadd.f32 %v1428_v38, %v1044_v50  ;;  %v1430_v61 = vpop.f32.mrf.mxu0 }
 0x1d6   :  { %v1048_v23 = vpop.f32.mrf.mxu1  ;;  %1287 = vmatmul.mubr.f32.gmra.mxu1 %v414_v1  ;;  %v674_v61 = vadd.f32 %v3403_v28, %v3341_v9 }
 0x1d7   :  { %v1049_v58 = vadd.f32 %v1048_v23, %v664_v33  ;;  %v1433_v55 = vpop.f32.mrf.mxu0  ;;  %1672 = vmatmul.mubr.f32.gmra.mxu0 %v416_v3  ;;  %v1722_v19 = vsel %vm1682_vm0, %v3487_v59, -inf  ;;  %1291 = vmatprep.mubr.f32.mxu1 %v421_v27 }
 0x1d8   :  { %v1050_v45 = vpop.f32.mrf.mxu1  ;;  %1723 = vmax.xlane.f32.xlu1 %v1722_v19  ;;  %1676 = vmatprep.mubr.f32.mxu0 %v423_v54 }
 0x1d9   :  { %v3493_v50 = vadd.f32 %v1433_v55, %v1049_v58  ;;  %v1435_v38 = vpop.f32.mrf.mxu0  ;;  %v679_v45 = vadd.f32 %v3403_v28, %v3345_v25 }
 0x1da   :  { %v1053_v35 = vpop.f32.mrf.mxu1  ;;  %1292 = vmatmul.mubr.f32.gmra.mxu1 %v420_v13 }
 0x1db   :  { %v1054_v1 = vadd.f32 %v1053_v35, %v669_v0  ;;  %v1438_v33 = vpop.f32.mrf.mxu0  ;;  %1677 = vmatmul.mubr.f32.gmra.mxu0 %v422_v11  ;;  %v1725_v3 = vsel %vm1682_vm0, %v3493_v50, -inf }
 0x1dc   :  { %v1055_v27 = vpop.f32.mrf.mxu1  ;;  %1726 = vmax.xlane.f32.xlu0 %v1725_v3  ;;  %v684_v3 = vadd.f32 %v3403_v28, %v3349_v39 }
 0x1dd   :  { %v3499_v54 = vadd.f32 %v1438_v33, %v1054_v1  ;;  %v1440_v23 = vpop.f32.mrf.mxu0 }
 0x1de   :  { %v1058_v60 = vpop.f32.mrf.mxu1 }
 0x1df   :  { %v1059_v58 = vadd.f32 %v1058_v60, %v674_v61  ;;  %v1443_v55 = vpop.f32.mrf.mxu0  ;;  %v1728_v19 = vsel %vm1682_vm0, %v3499_v54, -inf }
 0x1e0   :  { %v1060_v13 = vpop.f32.mrf.mxu1  ;;  %1729 = vmax.xlane.f32.xlu1 %v1728_v19  ;;  %v689_v19 = vadd.f32 %v3403_v28, %v3353_v56 }
 0x1e1   :  { %v3505_v11 = vadd.f32 %v1443_v55, %v1059_v58  ;;  %v1445_v0 = vpop.f32.mrf.mxu0 }
 0x1e2   :  { %v1063_v38 = vpop.f32.mrf.mxu1 }
 0x1e3   :  { %v1064_v35 = vadd.f32 %v1063_v38, %v679_v45  ;;  %v1448_v9 = vpop.f32.mrf.mxu0  ;;  %v1731_v1 = vsel %vm1682_vm0, %v3505_v11, -inf }
 0x1e4   :  { %v1065_v33 = vpop.f32.mrf.mxu1  ;;  %1732 = vmax.xlane.f32.xlu0 %v1731_v1  ;;  %v694_v1 = vadd.f32 %v3403_v28, %v3357_v15 }
 0x1e5   :  { %v3511_v27 = vadd.f32 %v1448_v9, %v1064_v35  ;;  %v1450_v61 = vpop.f32.mrf.mxu0 }
 0x1e6   :  { %v1068_v23 = vpop.f32.mrf.mxu1 }
 0x1e7   :  { %v1069_v60 = vadd.f32 %v1068_v23, %v684_v3  ;;  %v1453_v25 = vpop.f32.mrf.mxu0  ;;  %v1734_v58 = vsel %vm1682_vm0, %v3511_v27, -inf }
 0x1e8   :  { %v1070_v55 = vpop.f32.mrf.mxu1  ;;  %1735 = vmax.xlane.f32.xlu1 %v1734_v58  ;;  %v699_v58 = vadd.f32 %v3403_v28, %v3361_v31 }
 0x1e9   :  { %v3517_v13 = vadd.f32 %v1453_v25, %v1069_v60  ;;  %v1455_v45 = vpop.f32.mrf.mxu0 }
 0x1ea   :  { %v1073_v0 = vpop.f32.mrf.mxu1 }
 0x1eb   :  { %v1074_v38 = vadd.f32 %v1073_v0, %v689_v19  ;;  %v1458_v39 = vpop.f32.mrf.mxu0  ;;  %v1737_v35 = vsel %vm1682_vm0, %v3517_v13, -inf }
 0x1ec   :  { %v1075_v9 = vpop.f32.mrf.mxu1  ;;  %1738 = vmax.xlane.f32.xlu0 %v1737_v35  ;;  %v704_v35 = vadd.f32 %v3403_v28, %v3365_v52 }
 0x1ed   :  { %v3523_v33 = vadd.f32 %v1458_v39, %v1074_v38  ;;  %v1460_v3 = vpop.f32.mrf.mxu0 }
 0x1ee   :  { %v1078_v61 = vpop.f32.mrf.mxu1 }
 0x1ef   :  { %v1079_v23 = vadd.f32 %v1078_v61, %v694_v1  ;;  %v1463_v56 = vpop.f32.mrf.mxu0  ;;  %v1740_v60 = vsel %vm1682_vm0, %v3523_v33, -inf }
 0x1f0   :  { %v1080_v25 = vpop.f32.mrf.mxu1  ;;  %1741 = vmax.xlane.f32.xlu1 %v1740_v60  ;;  %v709_v60 = vadd.f32 %v3403_v28, %v3369_v17 }
 0x1f1   :  { %v3529_v55 = vadd.f32 %v1463_v56, %v1079_v23  ;;  %v1465_v19 = vpop.f32.mrf.mxu0 }
 0x1f2   :  { %v1083_v45 = vpop.f32.mrf.mxu1 }
 0x1f3   :  { %v1084_v0 = vadd.f32 %v1083_v45, %v699_v58  ;;  %v1468_v15 = vpop.f32.mrf.mxu0  ;;  %v1743_v38 = vsel %vm1682_vm0, %v3529_v55, -inf }
 0x1f4   :  { %v1085_v39 = vpop.f32.mrf.mxu1  ;;  %1744 = vmax.xlane.f32.xlu0 %v1743_v38  ;;  %v714_v38 = vadd.f32 %v3403_v28, %v3373_v41 }
 0x1f5   :  { %v3535_v9 = vadd.f32 %v1468_v15, %v1084_v0  ;;  %v1470_v1 = vpop.f32.mrf.mxu0 }
 0x1f6   :  { %v1088_v3 = vpop.f32.mrf.mxu1 }
 0x1f7   :  { %v1089_v61 = vadd.f32 %v1088_v3, %v704_v35  ;;  %v1473_v31 = vpop.f32.mrf.mxu0  ;;  %v1746_v23 = vsel %vm1682_vm0, %v3535_v9, -inf }
 0x1f8   :  { %v1090_v56 = vpop.f32.mrf.mxu1  ;;  %1747 = vmax.xlane.f32.xlu1 %v1746_v23  ;;  %v719_v23 = vadd.f32 %v3403_v28, %v3377_v7 }
 0x1f9   :  { %v3541_v25 = vadd.f32 %v1473_v31, %v1089_v61  ;;  %v1475_v58 = vpop.f32.mrf.mxu0 }
 0x1fa   :  { %v1093_v19 = vpop.f32.mrf.mxu1 }
 0x1fb   :  { %v1094_v45 = vadd.f32 %v1093_v19, %v709_v60  ;;  %v1478_v52 = vpop.f32.mrf.mxu0  ;;  %v1749_v0 = vsel %vm1682_vm0, %v3541_v25, -inf }
 0x1fc   :  { %v1095_v15 = vpop.f32.mrf.mxu1  ;;  %1750 = vmax.xlane.f32.xlu0 %v1749_v0  ;;  %v724_v0 = vadd.f32 %v3403_v28, %v3381_v37 }
 0x1fd   :  { %v3547_v39 = vadd.f32 %v1478_v52, %v1094_v45  ;;  %v1480_v35 = vpop.f32.mrf.mxu0 }
 0x1fe   :  { %v1098_v1 = vpop.f32.mrf.mxu1 }
 0x1ff   :  { %v1099_v3 = vadd.f32 %v1098_v1, %v714_v38  ;;  %v1483_v17 = vpop.f32.mrf.mxu0  ;;  %v1752_v61 = vsel %vm1682_vm0, %v3547_v39, -inf }
 0x200   :  { %v1100_v31 = vpop.f32.mrf.mxu1  ;;  %1753 = vmax.xlane.f32.xlu1 %v1752_v61  ;;  %v729_v61 = vadd.f32 %v3403_v28, %v3385_v5 }
 0x201   :  { %v3553_v56 = vadd.f32 %v1483_v17, %v1099_v3  ;;  %v1485_v60 = vpop.f32.mrf.mxu0 }
 0x202   :  { %v1103_v58 = vpop.f32.mrf.mxu1 }
 0x203   :  { %v1104_v19 = vadd.f32 %v1103_v58, %v719_v23  ;;  %v1488_v41 = vpop.f32.mrf.mxu0  ;;  %v1755_v45 = vsel %vm1682_vm0, %v3553_v56, -inf }
 0x204   :  { %v1105_v52 = vpop.f32.mrf.mxu1  ;;  %1756 = vmax.xlane.f32.xlu0 %v1755_v45  ;;  %v734_v45 = vadd.f32 %v3403_v28, %v3389_v40 }
 0x205   :  { %v3559_v15 = vadd.f32 %v1488_v41, %v1104_v19  ;;  %v1490_v38 = vpop.f32.mrf.mxu0 }
 0x206   :  { %v1108_v35 = vpop.f32.mrf.mxu1 }
 0x207   :  { %v1109_v1 = vadd.f32 %v1108_v35, %v724_v0  ;;  %v1493_v7 = vpop.f32.mrf.mxu0  ;;  %v1758_v3 = vsel %vm1682_vm0, %v3559_v15, -inf }
 0x208   :  { %v1110_v17 = vpop.f32.mrf.mxu1  ;;  %1759 = vmax.xlane.f32.xlu1 %v1758_v3  ;;  %v739_v3 = vadd.f32 %v3403_v28, %v3393_v16 }
 0x209   :  { %v3565_v31 = vadd.f32 %v1493_v7, %v1109_v1  ;;  %v1495_v23 = vpop.f32.mrf.mxu0 }
 0x20a   :  { %v1113_v60 = vpop.f32.mrf.mxu1 }
 0x20b   :  { %v1114_v58 = vadd.f32 %v1113_v60, %v729_v61  ;;  %v1498_v37 = vpop.f32.mrf.mxu0  ;;  %v1761_v19 = vsel %vm1682_vm0, %v3565_v31, -inf }
 0x20c   :  { %v1115_v41 = vpop.f32.mrf.mxu1  ;;  %1762 = vmax.xlane.f32.xlu0 %v1761_v19  ;;  %v744_v19 = vadd.f32 %v3403_v28, %v3397_v51 }
 0x20d   :  { %v3571_v52 = vadd.f32 %v1498_v37, %v1114_v58  ;;  %v1500_v0 = vpop.f32.mrf.mxu0 }
 0x20e   :  { %v1118_v38 = vpop.f32.mrf.mxu1 }
 0x20f   :  { %v1119_v35 = vadd.f32 %v1118_v38, %v734_v45  ;;  %v1503_v5 = vpop.f32.mrf.mxu0  ;;  %v1764_v1 = vsel %vm1682_vm0, %v3571_v52, -inf }
 0x210   :  { %v1120_v7 = vpop.f32.mrf.mxu1  ;;  %1765 = vmax.xlane.f32.xlu1 %v1764_v1  ;;  %v749_v1 = vadd.f32 %v3403_v28, %v3401_v30 }
 0x211   :  { %v3577_v17 = vadd.f32 %v1503_v5, %v1119_v35  ;;  %v1505_v61 = vpop.f32.mrf.mxu0 }
 0x212   :  { %v1123_v23 = vpop.f32.mrf.mxu1 }
 0x213   :  { %v1124_v60 = vadd.f32 %v1123_v23, %v739_v3  ;;  %v1508_v40 = vpop.f32.mrf.mxu0  ;;  %v1767_v58 = vsel %vm1682_vm0, %v3577_v17, -inf }
 0x214   :  { %v1125_v37 = vpop.f32.mrf.mxu1  ;;  %1768 = vmax.xlane.f32.xlu0 %v1767_v58  ;;  %v754_v58 = vadd.f32 %v3403_v28, %v3275_v42 }
 0x215   :  { %v3583_v41 = vadd.f32 %v1508_v40, %v1124_v60  ;;  %v1510_v45 = vpop.f32.mrf.mxu0 }
 0x216   :  { %v1128_v0 = vpop.f32.mrf.mxu1 }
 0x217   :  { %v1129_v38 = vadd.f32 %v1128_v0, %v744_v19  ;;  %v1513_v16 = vpop.f32.mrf.mxu0  ;;  %v1770_v35 = vsel %vm1682_vm0, %v3583_v41, -inf }
 0x218   :  { %v1130_v5 = vpop.f32.mrf.mxu1  ;;  %1771 = vmax.xlane.f32.xlu1 %v1770_v35  ;;  %v759_v35 = vadd.f32 %v3403_v28, %v3279_v49 }
 0x219   :  { %v3589_v7 = vadd.f32 %v1513_v16, %v1129_v38  ;;  %v1515_v3 = vpop.f32.mrf.mxu0 }
 0x21a   :  { %v1133_v61 = vpop.f32.mrf.mxu1 }
 0x21b   :  { %v1134_v23 = vadd.f32 %v1133_v61, %v749_v1  ;;  %v1518_v51 = vpop.f32.mrf.mxu0  ;;  %v1773_v60 = vsel %vm1682_vm0, %v3589_v7, -inf }
 0x21c   :  { %v1135_v40 = vpop.f32.mrf.mxu1  ;;  %1774 = vmax.xlane.f32.xlu0 %v1773_v60  ;;  %v764_v60 = vadd.f32 %v3403_v28, %v3283_v57 }
 0x21d   :  { %v3595_v37 = vadd.f32 %v1518_v51, %v1134_v23  ;;  %v1520_v19 = vpop.f32.mrf.mxu0 }
 0x21e   :  { %v1138_v45 = vpop.f32.mrf.mxu1 }
 0x21f   :  { %v1139_v0 = vadd.f32 %v1138_v45, %v754_v58  ;;  %v1523_v30 = vpop.f32.mrf.mxu0  ;;  %v1776_v38 = vsel %vm1682_vm0, %v3595_v37, -inf }
 0x220   :  { %v1140_v16 = vpop.f32.mrf.mxu1  ;;  %1777 = vmax.xlane.f32.xlu1 %v1776_v38  ;;  %v769_v38 = vadd.f32 %v3403_v28, %v3287_v2 }
 0x221   :  { %v3601_v5 = vadd.f32 %v1523_v30, %v1139_v0  ;;  %v1525_v1 = vpop.f32.mrf.mxu0 }
 0x222   :  { %v1143_v3 = vpop.f32.mrf.mxu1 }
 0x223   :  { %v1144_v61 = vadd.f32 %v1143_v3, %v759_v35  ;;  %v1528_v42 = vpop.f32.mrf.mxu0  ;;  %v1779_v23 = vsel %vm1682_vm0, %v3601_v5, -inf }
 0x224   :  { %v1145_v51 = vpop.f32.mrf.mxu1  ;;  %1780 = vmax.xlane.f32.xlu0 %v1779_v23  ;;  %v774_v23 = vadd.f32 %v3403_v28, %v3291_v10 }
 0x225   :  { %v3607_v40 = vadd.f32 %v1528_v42, %v1144_v61  ;;  %v1530_v58 = vpop.f32.mrf.mxu0 }
 0x226   :  { %v1148_v19 = vpop.f32.mrf.mxu1 }
 0x227   :  { %v1149_v45 = vadd.f32 %v1148_v19, %v764_v60  ;;  %v1533_v49 = vpop.f32.mrf.mxu0  ;;  %v1782_v0 = vsel %vm1682_vm0, %v3607_v40, -inf }
 0x228   :  { %v1150_v30 = vpop.f32.mrf.mxu1  ;;  %1783 = vmax.xlane.f32.xlu1 %v1782_v0 }
 0x229   :  { %v3613_v16 = vadd.f32 %v1533_v49, %v1149_v45  ;;  %v1535_v35 = vpop.f32.mrf.mxu0 }
 0x22a   :  { %v1153_v1 = vpop.f32.mrf.mxu1  ;;  %v779_v35 = vadd.f32 %v3403_v28, %v3295_v18 }
 0x22b   :  { %v1154_v3 = vadd.f32 %v1153_v1, %v769_v38  ;;  %v1538_v57 = vpop.f32.mrf.mxu0  ;;  %v1785_v61 = vsel %vm1682_vm0, %v3613_v16, -inf }
 0x22c   :  { %v1155_v42 = vpop.f32.mrf.mxu1  ;;  %1786 = vmax.xlane.f32.xlu0 %v1785_v61 }
 0x22d   :  { %v3619_v51 = vadd.f32 %v1538_v57, %v1154_v3  ;;  %v1540_v60 = vpop.f32.mrf.mxu0  ;;  %v1685_v58 = vpop.xlane.xlu0 %1684 }
 0x22e   :  { %v1875_v2 = vsub.f32 %v3409_v8, %v1685_v58  ;;  %v1158_v19 = vpop.f32.mrf.mxu1 }
 0x22f   :  { %v1159_v45 = vadd.f32 %v1158_v19, %v774_v23  ;;  %v1543_v49 = vpop.f32.mrf.mxu0  ;;  %v1788_v0 = vsel %vm1682_vm0, %v3619_v51, -inf }
 0x230   :  { %v1939_v30 = vmul.f32 1.442695, %v1875_v2  ;;  %v1160_v38 = vpop.f32.mrf.mxu1  ;;  %1789 = vmax.xlane.f32.xlu1 %v1788_v0  ;;  %v784_v2 = vadd.f32 %v3403_v28, %v3299_v26 }
 0x231   :  { %v3626_v1 = vadd.f32 %v1543_v49, %v1159_v45  ;;  %v1545_v10 = vpop.f32.mrf.mxu0  ;;  %v1688_v3 = vpop.xlane.xlu0 %1687 }
 0x232   :  { %2527 = vpow2.f32 %v1939_v30  ;;  %v1876_v57 = vsub.f32 %v3415_v29, %v1688_v3  ;;  %v1163_v8 = vpop.f32.mrf.mxu1  ;;  %v789_v3 = vadd.f32 %v3403_v28, %v3303_v34 }
 0x233   :  { %v1164_v61 = vadd.f32 %v1163_v8, %v779_v35  ;;  %v1548_v42 = vpop.f32.mrf.mxu0  ;;  %v1791_v23 = vsel %vm1682_vm0, %v3626_v1, -inf }
 0x234   :  { %v1941_v60 = vmul.f32 1.442695, %v1876_v57  ;;  %v1165_v58 = vpop.f32.mrf.mxu1  ;;  %1792 = vmax.xlane.f32.xlu0 %v1791_v23 }
 0x235   :  { %v3633_v18 = vadd.f32 %v1548_v42, %v1164_v61  ;;  %v1550_v19 = vpop.f32.mrf.mxu0  ;;  %v1691_v45 = vpop.xlane.xlu1 %1690 }
 0x236   :  { %2529 = vpow2.f32 %v1941_v60  ;;  %v1877_v49 = vsub.f32 %v3421_v36, %v1691_v45  ;;  %v1168_v29 = vpop.f32.mrf.mxu1  ;;  %v794_v19 = vadd.f32 %v3403_v28, %v3307_v44  ;;  %v3656_v28 = vld [vmem:[#allocation4] ss:$0 sm:$0xff] }
 0x237   :  { %v1169_v0 = vadd.f32 %v1168_v29, %v784_v2  ;;  %v1553_v30 = vpop.f32.mrf.mxu0  ;;  %v1794_v38 = vsel %vm1682_vm0, %v3633_v18, -inf }
 0x238   :  { %v1943_v35 = vmul.f32 1.442695, %v1877_v49  ;;  %v1170_v10 = vpop.f32.mrf.mxu1  ;;  %1795 = vmax.xlane.f32.xlu1 %v1794_v38 }
 0x239   :  { %v3640_v26 = vadd.f32 %v1553_v30, %v1169_v0  ;;  %v1555_v57 = vpop.f32.mrf.mxu0  ;;  %v1694_v8 = vpop.xlane.xlu1 %1693 }
 0x23a   :  { %2531 = vpow2.f32 %v1943_v35  ;;  %v1878_v61 = vsub.f32 %v3427_v24, %v1694_v8  ;;  %v1173_v36 = vpop.f32.mrf.mxu1  ;;  %v799_v57 = vadd.f32 %v3656_v28, %v3311_v53 }
 0x23b   :  { %v1174_v42 = vadd.f32 %v1173_v36, %v789_v3  ;;  %v1558_v23 = vpop.f32.mrf.mxu0  ;;  %v1797_v60 = vsel %vm1682_vm0, %v3640_v26, -inf }
 0x23c   :  { %v1945_v58 = vmul.f32 1.442695, %v1878_v61  ;;  %v1175_v2 = vpop.f32.mrf.mxu1  ;;  %1798 = vmax.xlane.f32.xlu0 %v1797_v60 }
 0x23d   :  { %v3647_v34 = vadd.f32 %v1558_v23, %v1174_v42  ;;  %v1560_v45 = vpop.f32.mrf.mxu0  ;;  %v1697_v49 = vpop.xlane.xlu0 %1696 }
 0x23e   :  { %2533 = vpow2.f32 %v1945_v58  ;;  %v1879_v29 = vsub.f32 %v3433_v6, %v1697_v49  ;;  %v1178_v24 = vpop.f32.mrf.mxu1  ;;  %v804_v49 = vadd.f32 %v3656_v28, %v3315_v63 }
 0x23f   :  { %v3650_v0 = vpop.eup %2527  ;;  %v1179_v30 = vadd.f32 %v1178_v24, %v794_v19  ;;  %v1563_v38 = vpop.f32.mrf.mxu0  ;;  %v1800_v35 = vsel %vm1682_vm0, %v3647_v34, -inf }
 0x240   :  { %v1947_v10 = vmul.f32 1.442695, %v1879_v29  ;;  %v1180_v3 = vpop.f32.mrf.mxu1  ;;  %1801 = vmax.xlane.f32.xlu1 %v1800_v35  ;;  %v2067_v44 = vsel %vm1682_vm0, %v3650_v0, 0.0 }
 0x241   :  { %v3660_v6 = vadd.f32 %v1563_v38, %v1179_v30  ;;  %v1565_v8 = vpop.f32.mrf.mxu0  ;;  %v1700_v61 = vpop.xlane.xlu1 %1699  ;;  %2068 = vadd.xlane.f32.xlu0 %v2067_v44 }
 0x242   :  { %2535 = vpow2.f32 %v1947_v10  ;;  %v1880_v36 = vsub.f32 %v3439_v47, %v1700_v61  ;;  %v1183_v42 = vpop.f32.mrf.mxu1  ;;  %v809_v61 = vadd.f32 %v3656_v28, %v3319_v12 }
 0x243   :  { %v3663_v23 = vpop.eup %2529  ;;  %v1184_v60 = vadd.f32 %v1183_v42, %v799_v57  ;;  %v1568_v58 = vpop.f32.mrf.mxu0  ;;  %v1803_v2 = vsel %vm1682_vm0, %v3660_v6, -inf }
 0x244   :  { %v1949_v19 = vmul.f32 1.442695, %v1880_v36  ;;  %v1185_v45 = vpop.f32.mrf.mxu1  ;;  %v2070_v53 = vsel %vm1682_vm0, %v3663_v23, 0.0 }
 0x245   :  { %v3671_v29 = vadd.f32 %v1568_v58, %v1184_v60  ;;  %v1570_v24 = vpop.f32.mrf.mxu0  ;;  %1804 = vmax.xlane.f32.xlu0 %v1803_v2  ;;  %2071 = vadd.xlane.f32.xlu1 %v2070_v53  ;;  %v1703_v47 = vpop.xlane.xlu0 %1702 }
 0x246   :  { %2537 = vpow2.f32 %v1949_v19  ;;  %v1881_v30 = vsub.f32 %v3445_v4, %v1703_v47  ;;  %v1188_v38 = vpop.f32.mrf.mxu1  ;;  %v814_v47 = vadd.f32 %v3656_v28, %v3323_v22 }
 0x247   :  { %v3674_v35 = vpop.eup %2531  ;;  %v1189_v10 = vadd.f32 %v1188_v38, %v804_v49  ;;  %v1573_v3 = vpop.f32.mrf.mxu0  ;;  %v1806_v44 = vsel %vm1682_vm0, %v3671_v29, -inf }
 0x248   :  { %v1951_v57 = vmul.f32 1.442695, %v1881_v30  ;;  %v1190_v8 = vpop.f32.mrf.mxu1  ;;  %v2073_v63 = vsel %vm1682_vm0, %v3674_v35, 0.0 }
 0x249   :  { %v3682_v36 = vadd.f32 %v1573_v3, %v1189_v10  ;;  %v1575_v42 = vpop.f32.mrf.mxu0  ;;  %v1706_v4 = vpop.xlane.xlu1 %1705  ;;  %2074 = vadd.xlane.f32.xlu0 %v2073_v63  ;;  %1807 = vmax.xlane.f32.xlu1 %v1806_v44 }
 0x24a   :  { %2539 = vpow2.f32 %v1951_v57  ;;  %v1882_v60 = vsub.f32 %v3451_v20, %v1706_v4  ;;  %v1193_v58 = vpop.f32.mrf.mxu1  ;;  %v819_v4 = vadd.f32 %v3656_v28, %v3327_v32 }
 0x24b   :  { %v3685_v2 = vpop.eup %2533  ;;  %v1194_v19 = vadd.f32 %v1193_v58, %v809_v61  ;;  %v1578_v45 = vpop.f32.mrf.mxu0  ;;  %v1809_v53 = vsel %vm1682_vm0, %v3682_v36, -inf }
 0x24c   :  { %v1953_v49 = vmul.f32 1.442695, %v1882_v60  ;;  %v1195_v24 = vpop.f32.mrf.mxu1  ;;  %v2076_v12 = vsel %vm1682_vm0, %v3685_v2, 0.0 }
 0x24d   :  { %v3693_v30 = vadd.f32 %v1578_v45, %v1194_v19  ;;  %v1580_v38 = vpop.f32.mrf.mxu0  ;;  %1810 = vmax.xlane.f32.xlu0 %v1809_v53  ;;  %2077 = vadd.xlane.f32.xlu1 %v2076_v12  ;;  %v1709_v20 = vpop.xlane.xlu0 %1708 }
 0x24e   :  { %2541 = vpow2.f32 %v1953_v49  ;;  %v1883_v10 = vsub.f32 %v3457_v14, %v1709_v20  ;;  %v1198_v3 = vpop.f32.mrf.mxu1  ;;  %v824_v20 = vadd.f32 %v3656_v28, %v3331_v46 }
 0x24f   :  { %v3696_v44 = vpop.eup %2535  ;;  %v1199_v57 = vadd.f32 %v1198_v3, %v814_v47  ;;  %v1583_v8 = vpop.f32.mrf.mxu0  ;;  %v1812_v63 = vsel %vm1682_vm0, %v3693_v30, -inf }
 0x250   :  { %v1955_v61 = vmul.f32 1.442695, %v1883_v10  ;;  %v1200_v42 = vpop.f32.mrf.mxu1  ;;  %v2079_v22 = vsel %vm1682_vm0, %v3696_v44, 0.0 }
 0x251   :  { %v3704_v60 = vadd.f32 %v1583_v8, %v1199_v57  ;;  %v1585_v58 = vpop.f32.mrf.mxu0  ;;  %v1712_v14 = vpop.xlane.xlu1 %1711  ;;  %1813 = vmax.xlane.f32.xlu1 %v1812_v63  ;;  %2080 = vadd.xlane.f32.xlu0 %v2079_v22 }
 0x252   :  { %2543 = vpow2.f32 %v1955_v61  ;;  %v1884_v19 = vsub.f32 %v3463_v62, %v1712_v14  ;;  %v1203_v45 = vpop.f32.mrf.mxu1  ;;  %v4467_v14 = vld [vmem:[#allocation8_spill] sm:$0xff] }
 0x253   :  { %v3707_v53 = vpop.eup %2537  ;;  %v1204_v49 = vadd.f32 %v1203_v45, %v819_v4  ;;  %v1588_v24 = vpop.f32.mrf.mxu0  ;;  %v1815_v12 = vsel %vm1682_vm0, %v3704_v60, -inf }
 0x254   :  { %v1957_v47 = vmul.f32 1.442695, %v1884_v19  ;;  %v1205_v38 = vpop.f32.mrf.mxu1  ;;  %v2082_v32 = vsel %vm1682_vm0, %v3707_v53, 0.0  ;;  %v829_v19 = vadd.f32 %v3656_v28, %v4467_v14 }
 0x255   :  { %v3715_v10 = vadd.f32 %v1588_v24, %v1204_v49  ;;  %v1590_v3 = vpop.f32.mrf.mxu0  ;;  %2083 = vadd.xlane.f32.xlu1 %v2082_v32  ;;  %1816 = vmax.xlane.f32.xlu0 %v1815_v12  ;;  %v1715_v62 = vpop.xlane.xlu0 %1714 }
 0x256   :  { %2545 = vpow2.f32 %v1957_v47  ;;  %v1885_v57 = vsub.f32 %v3469_v21, %v1715_v62  ;;  %v1208_v8 = vpop.f32.mrf.mxu1 }
 0x257   :  { %v3718_v63 = vpop.eup %2539  ;;  %v1209_v61 = vadd.f32 %v1208_v8, %v824_v20  ;;  %v1593_v42 = vpop.f32.mrf.mxu0  ;;  %v1818_v22 = vsel %vm1682_vm0, %v3715_v10, -inf  ;;  %v4468_v8 = vld [vmem:[#allocation9_spill] sm:$0xff] }
 0x258   :  { %v1959_v4 = vmul.f32 1.442695, %v1885_v57  ;;  %v1210_v58 = vpop.f32.mrf.mxu1  ;;  %v2085_v46 = vsel %vm1682_vm0, %v3718_v63, 0.0 }
 0x259   :  { %v3726_v45 = vadd.f32 %v1593_v42, %v1209_v61  ;;  %v1595_v49 = vpop.f32.mrf.mxu0  ;;  %v1718_v21 = vpop.xlane.xlu1 %1717  ;;  %1819 = vmax.xlane.f32.xlu1 %v1818_v22  ;;  %2086 = vadd.xlane.f32.xlu0 %v2085_v46  ;;  %v834_v61 = vadd.f32 %v3656_v28, %v4468_v8 }
 0x25a   :  { %2547 = vpow2.f32 %v1959_v4  ;;  %v1886_v24 = vsub.f32 %v3475_v48, %v1718_v21  ;;  %v1213_v12 = vpop.f32.mrf.mxu1 }
 0x25b   :  { %v3729_v47 = vpop.eup %2541  ;;  %v1214_v38 = vadd.f32 %v1213_v12, %v829_v19  ;;  %v1598_v32 = vpop.f32.mrf.mxu0  ;;  %v1821_v20 = vsel %vm1682_vm0, %v3726_v45, -inf }
 0x25c   :  { %v1961_v3 = vmul.f32 1.442695, %v1886_v24  ;;  %v1215_v62 = vpop.f32.mrf.mxu1  ;;  %v2088_v57 = vsel %vm1682_vm0, %v3729_v47, 0.0 }
 0x25d   :  { %v3737_v42 = vadd.f32 %v1598_v32, %v1214_v38  ;;  %v1600_v22 = vpop.f32.mrf.mxu0  ;;  %2089 = vadd.xlane.f32.xlu1 %v2088_v57  ;;  %1822 = vmax.xlane.f32.xlu0 %v1821_v20  ;;  %v1721_v48 = vpop.xlane.xlu0 %1720  ;;  %v4469_v38 = vld [vmem:[#allocation10_spill] sm:$0xff] }
 0x25e   :  { %2549 = vpow2.f32 %v1961_v3  ;;  %v1887_v4 = vsub.f32 %v3481_v43, %v1721_v48  ;;  %v1218_v58 = vpop.f32.mrf.mxu1  ;;  %v839_v32 = vadd.f32 %v3656_v28, %v4469_v38 }
 0x25f   :  { %v3740_v46 = vpop.eup %2543  ;;  %v1219_v14 = vadd.f32 %v1218_v58, %v834_v61  ;;  %v1603_v19 = vpop.f32.mrf.mxu0  ;;  %v1824_v49 = vsel %vm1682_vm0, %v3737_v42, -inf }
 0x260   :  { %v1963_v21 = vmul.f32 1.442695, %v1887_v4  ;;  %v1220_v24 = vpop.f32.mrf.mxu1  ;;  %v2091_v12 = vsel %vm1682_vm0, %v3740_v46, 0.0 }
 0x261   :  { %v3748_v20 = vadd.f32 %v1603_v19, %v1219_v14  ;;  %v1605_v3 = vpop.f32.mrf.mxu0  ;;  %v1724_v43 = vpop.xlane.xlu1 %1723  ;;  %1825 = vmax.xlane.f32.xlu1 %v1824_v49  ;;  %2092 = vadd.xlane.f32.xlu0 %v2091_v12  ;;  %v4470_v19 = vld [vmem:[#allocation11_spill] sm:$0xff] }
 0x262   :  { %2551 = vpow2.f32 %v1963_v21  ;;  %v1888_v62 = vsub.f32 %v3487_v59, %v1724_v43  ;;  %v1223_v57 = vpop.f32.mrf.mxu1  ;;  %v844_v49 = vadd.f32 %v3656_v28, %v4470_v19 }
 0x263   :  { %v3751_v8 = vpop.eup %2545  ;;  %v1224_v61 = vadd.f32 %v1223_v57, %v839_v32  ;;  %v1608_v22 = vpop.f32.mrf.mxu0  ;;  %v1827_v48 = vsel %vm1682_vm0, %v3748_v20, -inf }
 0x264   :  { %v1965_v4 = vmul.f32 1.442695, %v1888_v62  ;;  %v1225_v58 = vpop.f32.mrf.mxu1  ;;  %v2094_v14 = vsel %vm1682_vm0, %v3751_v8, 0.0 }
 0x265   :  { %v3759_v24 = vadd.f32 %v1608_v22, %v1224_v61  ;;  %v1610_v21 = vpop.f32.mrf.mxu0  ;;  %2095 = vadd.xlane.f32.xlu1 %v2094_v14  ;;  %1828 = vmax.xlane.f32.xlu0 %v1827_v48  ;;  %v1727_v59 = vpop.xlane.xlu0 %1726  ;;  %v4472_v22 = vld [vmem:[#allocation12_spill] sm:$0xff] }
 0x266   :  { %2553 = vpow2.f32 %v1965_v4  ;;  %v1889_v12 = vsub.f32 %v3493_v50, %v1727_v59  ;;  %v1228_v38 = vpop.f32.mrf.mxu1  ;;  %v849_v48 = vadd.f32 %v3656_v28, %v4472_v22 }
 0x267   :  { %v3762_v32 = vpop.eup %2547  ;;  %v1229_v3 = vadd.f32 %v1228_v38, %v844_v49  ;;  %v1613_v43 = vpop.f32.mrf.mxu0  ;;  %v1830_v62 = vsel %vm1682_vm0, %v3759_v24, -inf }
 0x268   :  { %4471 = vst [vmem:[#allocation8_spill] sm:$0xff] %v3762_v32  ;;  %v1967_v57 = vmul.f32 1.442695, %v1889_v12  ;;  %v1230_v58 = vpop.f32.mrf.mxu1  ;;  %v2097_v61 = vsel %vm1682_vm0, %v3762_v32, 0.0 }
 0x269   :  { %v3770_v14 = vadd.f32 %v1613_v43, %v1229_v3  ;;  %v1615_v4 = vpop.f32.mrf.mxu0  ;;  %v1730_v50 = vpop.xlane.xlu1 %1729  ;;  %1831 = vmax.xlane.f32.xlu1 %v1830_v62  ;;  %2098 = vadd.xlane.f32.xlu0 %v2097_v61  ;;  %v4474_v43 = vld [vmem:[#allocation13_spill] sm:$0xff] }
 0x26a   :  { %2555 = vpow2.f32 %v1967_v57  ;;  %v1890_v19 = vsub.f32 %v3499_v54, %v1730_v50  ;;  %v1233_v49 = vpop.f32.mrf.mxu1  ;;  %v854_v62 = vadd.f32 %v3656_v28, %v4474_v43 }
 0x26b   :  { %v3773_v21 = vpop.eup %2549  ;;  %v1234_v59 = vadd.f32 %v1233_v49, %v849_v48  ;;  %v1618_v12 = vpop.f32.mrf.mxu0  ;;  %v1833_v38 = vsel %vm1682_vm0, %v3770_v14, -inf }
 0x26c   :  { %4473 = vst [vmem:[#allocation9_spill] sm:$0xff] %v3773_v21  ;;  %v1969_v58 = vmul.f32 1.442695, %v1890_v19  ;;  %v1235_v32 = vpop.f32.mrf.mxu1  ;;  %v2100_v3 = vsel %vm1682_vm0, %v3773_v21, 0.0 }
 0x26d   :  { %v3781_v61 = vadd.f32 %v1618_v12, %v1234_v59  ;;  %v1620_v57 = vpop.f32.mrf.mxu0  ;;  %2101 = vadd.xlane.f32.xlu1 %v2100_v3  ;;  %1834 = vmax.xlane.f32.xlu0 %v1833_v38  ;;  %v1733_v54 = vpop.xlane.xlu0 %1732  ;;  %v4476_v12 = vld [vmem:[#allocation14_spill] sm:$0xff] }
 0x26e   :  { %2557 = vpow2.f32 %v1969_v58  ;;  %v1891_v22 = vsub.f32 %v3505_v11, %v1733_v54  ;;  %v1238_v48 = vpop.f32.mrf.mxu1  ;;  %v859_v38 = vadd.f32 %v3656_v28, %v4476_v12 }
 0x26f   :  { %v3784_v4 = vpop.eup %2551  ;;  %v1239_v50 = vadd.f32 %v1238_v48, %v854_v62  ;;  %v1623_v32 = vpop.f32.mrf.mxu0  ;;  %v1836_v19 = vsel %vm1682_vm0, %v3781_v61, -inf }
 0x270   :  { %4475 = vst [vmem:[#allocation10_spill] sm:$0xff] %v3784_v4  ;;  %v1971_v49 = vmul.f32 1.442695, %v1891_v22  ;;  %v1240_v21 = vpop.f32.mrf.mxu1  ;;  %v2103_v59 = vsel %vm1682_vm0, %v3784_v4, 0.0 }
 0x271   :  { %v3792_v3 = vadd.f32 %v1623_v32, %v1239_v50  ;;  %v1625_v58 = vpop.f32.mrf.mxu0  ;;  %v1736_v11 = vpop.xlane.xlu1 %1735  ;;  %1837 = vmax.xlane.f32.xlu1 %v1836_v19  ;;  %2104 = vadd.xlane.f32.xlu0 %v2103_v59  ;;  %v4479_v32 = vld [vmem:[#allocation15_spill] sm:$0xff] }
 0x272   :  { %2559 = vpow2.f32 %v1971_v49  ;;  %v1892_v43 = vsub.f32 %v3511_v27, %v1736_v11  ;;  %v1243_v62 = vpop.f32.mrf.mxu1  ;;  %v864_v19 = vadd.f32 %v3656_v28, %v4479_v32 }
 0x273   :  { %4477 = vst [vmem:[#allocation11_spill] sm:$0xff] %v3792_v3  ;;  %v3795_v57 = vpop.eup %2553  ;;  %v1244_v54 = vadd.f32 %v1243_v62, %v859_v38  ;;  %v1628_v21 = vpop.f32.mrf.mxu0  ;;  %v1839_v22 = vsel %vm1682_vm0, %v3792_v3, -inf  ;;  %v4482_v62 = vld [vmem:[#allocation16_spill] sm:$0xff] }
 0x274   :  { %4478 = vst [vmem:[#allocation12_spill] sm:$0xff] %v3795_v57  ;;  %v1973_v48 = vmul.f32 1.442695, %v1892_v43  ;;  %v1245_v4 = vpop.f32.mrf.mxu1  ;;  %v2106_v50 = vsel %vm1682_vm0, %v3795_v57, 0.0  ;;  %v4488_v57 = vld [vmem:[#allocation18_spill] sm:$0xff] }
 0x275   :  { %v3803_v59 = vadd.f32 %v1628_v21, %v1244_v54  ;;  %v1630_v49 = vpop.f32.mrf.mxu0  ;;  %2107 = vadd.xlane.f32.xlu1 %v2106_v50  ;;  %1840 = vmax.xlane.f32.xlu0 %v1839_v22  ;;  %v869_v54 = vadd.f32 %v3656_v28, %v4482_v62 }
 0x276   :  { %2561 = vpow2.f32 %v1973_v48  ;;  %v1248_v27 = vpop.f32.mrf.mxu1 }
 0x277   :  { %4480 = vst [vmem:[#allocation13_spill] sm:$0xff] %v3803_v59  ;;  %v3805_v12 = vpop.eup %2555  ;;  %v1249_v38 = vadd.f32 %v1248_v27, %v864_v19  ;;  %v1633_v58 = vpop.f32.mrf.mxu0  ;;  %v1842_v4 = vsel %vm1682_vm0, %v3803_v59, -inf }
 0x278   :  { %4481 = vst [vmem:[#allocation14_spill] sm:$0xff] %v3805_v12  ;;  %v1250_v11 = vpop.f32.mrf.mxu1  ;;  %v2109_v43 = vsel %vm1682_vm0, %v3805_v12, 0.0  ;;  %v4485_v12 = vld [vmem:[#allocation17_spill] sm:$0xff] }
 0x279   :  { %v3813_v21 = vadd.f32 %v1633_v58, %v1249_v38  ;;  %v1635_v50 = vpop.f32.mrf.mxu0  ;;  %1843 = vmax.xlane.f32.xlu1 %v1842_v4  ;;  %2110 = vadd.xlane.f32.xlu0 %v2109_v43  ;;  %v874_v62 = vadd.f32 %v3656_v28, %v4485_v12  ;;  %v879_v12 = vadd.f32 %v3656_v28, %v4488_v57 }
 0x27a   :  { %v1253_v22 = vpop.f32.mrf.mxu1 }
 0x27b   :  { %4483 = vst [vmem:[#allocation15_spill] sm:$0xff] %v3813_v21  ;;  %v3815_v48 = vpop.eup %2557  ;;  %v1254_v32 = vadd.f32 %v1253_v22, %v869_v54  ;;  %v1638_v19 = vpop.f32.mrf.mxu0  ;;  %v1845_v49 = vsel %vm1682_vm0, %v3813_v21, -inf  ;;  %v4491_v21 = vld [vmem:[#allocation19_spill] sm:$0xff] }
 0x27c   :  { %4484 = vst [vmem:[#allocation16_spill] sm:$0xff] %v3815_v48  ;;  %v1255_v27 = vpop.f32.mrf.mxu1  ;;  %v2112_v11 = vsel %vm1682_vm0, %v3815_v48, 0.0  ;;  %v884_v57 = vadd.f32 %v3656_v28, %v4491_v21 }
 0x27d   :  { %v3823_v38 = vadd.f32 %v1638_v19, %v1254_v32  ;;  %v1640_v58 = vpop.f32.mrf.mxu0  ;;  %2113 = vadd.xlane.f32.xlu1 %v2112_v11  ;;  %1846 = vmax.xlane.f32.xlu0 %v1845_v49 }
 0x27e   :  { %v1258_v4 = vpop.f32.mrf.mxu1 }
 0x27f   :  { %4486 = vst [vmem:[#allocation17_spill] sm:$0xff] %v3823_v38  ;;  %v3825_v43 = vpop.eup %2559  ;;  %v1259_v54 = vadd.f32 %v1258_v4, %v874_v62  ;;  %v1643_v50 = vpop.f32.mrf.mxu0  ;;  %v1848_v22 = vsel %vm1682_vm0, %v3823_v38, -inf }
 0x280   :  { %4487 = vst [vmem:[#allocation25_spill] sm:$0xff] %v3825_v43  ;;  %v1260_v27 = vpop.f32.mrf.mxu1  ;;  %v2115_v48 = vsel %vm1682_vm0, %v3825_v43, 0.0  ;;  %v1739_v62 = vpop.xlane.xlu0 %1738 }
 0x281   :  { %v3833_v32 = vadd.f32 %v1643_v50, %v1259_v54  ;;  %v1645_v19 = vpop.f32.mrf.mxu0  ;;  %1849 = vmax.xlane.f32.xlu1 %v1848_v22  ;;  %2116 = vadd.xlane.f32.xlu0 %v2115_v48  ;;  %v1742_v48 = vpop.xlane.xlu1 %1741 }
 0x282   :  { %v1263_v49 = vpop.f32.mrf.mxu1 }
 0x283   :  { %4489 = vst [vmem:[#allocation18_spill] sm:$0xff] %v3833_v32  ;;  %v3835_v11 = vpop.eup %2561  ;;  %v1264_v58 = vadd.f32 %v1263_v49, %v879_v12  ;;  %v1648_v4 = vpop.f32.mrf.mxu0  ;;  %v1851_v27 = vsel %vm1682_vm0, %v3833_v32, -inf  ;;  %v1893_v12 = vsub.f32 %v3517_v13, %v1739_v62 }
 0x284   :  { %4490 = vst [vmem:[#allocation26_spill] sm:$0xff] %v3835_v11  ;;  %v1265_v38 = vpop.f32.mrf.mxu1  ;;  %v2118_v43 = vsel %vm1682_vm0, %v3835_v11, 0.0  ;;  %v1745_v19 = vpop.xlane.xlu0 %1744  ;;  %v4493_v11 = vld [vmem:[#allocation20_spill] sm:$0xff] }
 0x285   :  { %v3843_v54 = vadd.f32 %v1648_v4, %v1264_v58  ;;  %v1650_v50 = vpop.f32.mrf.mxu0  ;;  %2119 = vadd.xlane.f32.xlu1 %v2118_v43  ;;  %1852 = vmax.xlane.f32.xlu0 %v1851_v27  ;;  %v889_v3 = vadd.f32 %v3656_v28, %v4493_v11  ;;  %v1894_v43 = vsub.f32 %v3523_v33, %v1742_v48  ;;  %v1748_v4 = vpop.xlane.xlu1 %1747  ;;  %v4495_v11 = vld [vmem:[#allocation21_spill] sm:$0xff] }
 0x286   :  { %v1268_v22 = vpop.f32.mrf.mxu1  ;;  %v1975_v50 = vmul.f32 1.442695, %v1893_v12  ;;  %v1895_v13 = vsub.f32 %v3529_v55, %v1745_v19 }
 0x287   :  { %4492 = vst [vmem:[#allocation19_spill] sm:$0xff] %v3843_v54  ;;  %v1269_v49 = vadd.f32 %v1268_v22, %v884_v57  ;;  %v1653_v59 = vpop.f32.mrf.mxu0  ;;  %v1854_v38 = vsel %vm1682_vm0, %v3843_v54, -inf  ;;  %v1977_v48 = vmul.f32 1.442695, %v1894_v43 }
 0x288   :  { %v1270_v32 = vpop.f32.mrf.mxu1  ;;  %v1751_v62 = vpop.xlane.xlu0 %1750  ;;  %2563 = vpow2.f32 %v1975_v50 }
 0x289   :  { %v3850_v21 = vadd.f32 %v1653_v59, %v1269_v49  ;;  %v1655_v58 = vpop.f32.mrf.mxu0  ;;  %1855 = vmax.xlane.f32.xlu1 %v1854_v38  ;;  %v894_v59 = vadd.f32 %v3656_v28, %v4495_v11  ;;  %v1896_v49 = vsub.f32 %v3535_v9, %v1748_v4  ;;  %v1897_v12 = vsub.f32 %v3541_v25, %v1751_v62  ;;  %v1754_v19 = vpop.xlane.xlu1 %1753  ;;  %v4496_v11 = vld [vmem:[#allocation22_spill] sm:$0xff] }
 0x28a   :  { %v1273_v27 = vpop.f32.mrf.mxu1  ;;  %v899_v9 = vadd.f32 %v3656_v28, %v4496_v11  ;;  %2565 = vpow2.f32 %v1977_v48  ;;  %v1898_v50 = vsub.f32 %v3547_v39, %v1754_v19 }
 0x28b   :  { %4494 = vst [vmem:[#allocation20_spill] sm:$0xff] %v3850_v21  ;;  %v1274_v57 = vadd.f32 %v1273_v27, %v889_v3  ;;  %v1658_v22 = vpop.f32.mrf.mxu0  ;;  %v1857_v32 = vsel %vm1682_vm0, %v3850_v21, -inf  ;;  %v1979_v3 = vmul.f32 1.442695, %v1895_v13  ;;  %v1981_v4 = vmul.f32 1.442695, %v1896_v49 }
 0x28c   :  { %v1275_v54 = vpop.f32.mrf.mxu1  ;;  %1858 = vmax.xlane.f32.xlu0 %v1857_v32  ;;  %v1983_v25 = vmul.f32 1.442695, %v1897_v12  ;;  %v4497_v49 = vld [vmem:[#allocation23_spill] sm:$0xff] }
 0x28d   :  { %v3859_v38 = vadd.f32 %v1658_v22, %v1274_v57  ;;  %v1660_v33 = vpop.f32.mrf.mxu0  ;;  %v1757_v32 = vpop.xlane.xlu0 %1756  ;;  %2567 = vpow2.f32 %v1979_v3  ;;  %v1985_v3 = vmul.f32 1.442695, %v1898_v50 }
 0x28e   :  { %v1278_v55 = vpop.f32.mrf.mxu1  ;;  %v1899_v62 = vsub.f32 %v3553_v56, %v1757_v32  ;;  %2569 = vpow2.f32 %v1981_v4  ;;  %v4498_v4 = vld [vmem:[#allocation24_spill] sm:$0xff] }
 0x28f   :  { %v1279_v58 = vadd.f32 %v1278_v55, %v894_v59  ;;  %v1663_v27 = vpop.f32.mrf.mxu0  ;;  %v1860_v54 = vsel %vm1682_vm0, %v3859_v38, -inf  ;;  %2571 = vpow2.f32 %v1983_v25 }
 0x290   :  { %v1280_v21 = vpop.f32.mrf.mxu1  ;;  %1861 = vmax.xlane.f32.xlu1 %v1860_v54  ;;  %2573 = vpow2.f32 %v1985_v3 }
 0x291   :  { %v3866_v57 = vadd.f32 %v1663_v27, %v1279_v58  ;;  %v1665_v43 = vpop.f32.mrf.mxu0  ;;  %v1760_v22 = vpop.xlane.xlu1 %1759  ;;  %v904_v58 = vadd.f32 %v3656_v28, %v4497_v49  ;;  %v1987_v27 = vmul.f32 1.442695, %v1899_v62 }
 0x292   :  { %v1283_v13 = vpop.f32.mrf.mxu1  ;;  %v1900_v56 = vsub.f32 %v3559_v15, %v1760_v22 }
 0x293   :  { %v1284_v59 = vadd.f32 %v1283_v13, %v899_v9  ;;  %v1668_v33 = vpop.f32.mrf.mxu0  ;;  %v1863_v21 = vsel %vm1682_vm0, %v3866_v57, -inf  ;;  %v909_v13 = vadd.f32 %v3656_v28, %v4498_v4  ;;  %2575 = vpow2.f32 %v1987_v27 }
 0x294   :  { %v1285_v55 = vpop.f32.mrf.mxu1  ;;  %1864 = vmax.xlane.f32.xlu0 %v1863_v21  ;;  %v1989_v15 = vmul.f32 1.442695, %v1900_v56 }
 0x295   :  { %v3874_v48 = vadd.f32 %v1668_v33, %v1284_v59  ;;  %v1670_v12 = vpop.f32.mrf.mxu0  ;;  %v1763_v39 = vpop.xlane.xlu0 %1762 }
 0x296   :  { %v1288_v19 = vpop.f32.mrf.mxu1  ;;  %v1901_v54 = vsub.f32 %v3565_v31, %v1763_v39  ;;  %v3887_v49 = vpop.eup %2563  ;;  %2577 = vpow2.f32 %v1989_v15 }
 0x297   :  { %v1289_v32 = vadd.f32 %v1288_v19, %v904_v58  ;;  %v1673_v11 = vpop.f32.mrf.mxu0  ;;  %v1866_v9 = vsel %vm1682_vm0, %v3874_v48, -inf  ;;  %v3892_v56 = vpop.eup %2565  ;;  %v2121_v27 = vsel %vm1682_vm0, %v3887_v49, 0.0 }
 0x298   :  { %v1290_v43 = vpop.f32.mrf.mxu1  ;;  %1867 = vmax.xlane.f32.xlu1 %v1866_v9  ;;  %v1991_v31 = vmul.f32 1.442695, %v1901_v54  ;;  %v2124_v4 = vsel %vm1682_vm0, %v3892_v56, 0.0 }
 0x299   :  { %v3882_v59 = vadd.f32 %v1673_v11, %v1289_v32  ;;  %v1675_v25 = vpop.f32.mrf.mxu0  ;;  %v1766_v50 = vpop.xlane.xlu1 %1765 }
 0x29a   :  { %v1902_v62 = vsub.f32 %v3571_v52, %v1766_v50  ;;  %v1293_v22 = vpop.f32.mrf.mxu1  ;;  %2579 = vpow2.f32 %v1991_v31  ;;  %v3898_v54 = vpop.eup %2567 }
 0x29b   :  { %v1294_v33 = vadd.f32 %v1293_v22, %v909_v13  ;;  %v1678_v21 = vpop.f32.mrf.mxu0  ;;  %v1869_v55 = vsel %vm1682_vm0, %v3882_v59, -inf  ;;  %v3900_v9 = vpop.eup %2569  ;;  %v2127_v13 = vsel %vm1682_vm0, %v3898_v54, 0.0 }
 0x29c   :  { %v1295_v58 = vpop.f32.mrf.mxu1  ;;  %1870 = vmax.xlane.f32.xlu0 %v1869_v55  ;;  %v1993_v3 = vmul.f32 1.442695, %v1902_v62  ;;  %v3903_v43 = vpop.eup %2571 }
 0x29d   :  { %v3889_v28 = vadd.f32 %v1678_v21, %v1294_v33  ;;  %v1680_v12 = vpop.f32.mrf.mxu0  ;;  %v1769_v39 = vpop.xlane.xlu0 %1768  ;;  %v2133_v22 = vsel %vm1682_vm0, %v3903_v43, 0.0 }
 0x29e   :  { %v1903_v52 = vsub.f32 %v3577_v17, %v1769_v39  ;;  %2581 = vpow2.f32 %v1993_v3  ;;  %v3910_v62 = vpop.eup %2573 }
 0x29f   :  { %v1872_v19 = vsel %vm1682_vm0, %v3889_v28, -inf }
 0x2a0   :  { %v1995_v32 = vmul.f32 1.442695, %v1903_v52  ;;  %1873 = vmax.xlane.f32.xlu1 %v1872_v19  ;;  %2122 = vadd.xlane.f32.xlu0 %v2121_v27  ;;  %v3916_v31 = vpop.eup %2575 }
 0x2a1   :  { %v1772_v11 = vpop.xlane.xlu1 %1771  ;;  %v2139_v12 = vsel %vm1682_vm0, %v3916_v31, 0.0 }
 0x2a2   :  { %v1904_v17 = vsub.f32 %v3583_v41, %v1772_v11  ;;  %2583 = vpow2.f32 %v1995_v32  ;;  %v2130_v41 = vsel %vm1682_vm0, %v3900_v9, 0.0 }
 0x2a3   :  { %v3919_v58 = vpop.eup %2577 }
 0x2a4   :  { %v1997_v25 = vmul.f32 1.442695, %v1904_v17  ;;  %2125 = vadd.xlane.f32.xlu1 %v2124_v4  ;;  %2128 = vadd.xlane.f32.xlu0 %v2127_v13 }
 0x2a5   :  { %v1775_v50 = vpop.xlane.xlu0 %1774 }
 0x2a6   :  { %v1905_v15 = vsub.f32 %v3589_v7, %v1775_v50  ;;  %2585 = vpow2.f32 %v1997_v25  ;;  %v2136_v7 = vsel %vm1682_vm0, %v3910_v62, 0.0 }
 0x2a7   :  { %v3925_v39 = vpop.eup %2579 }
 0x2a8   :  { %v1999_v33 = vmul.f32 1.442695, %v1905_v15  ;;  %2131 = vadd.xlane.f32.xlu1 %v2130_v41  ;;  %2134 = vadd.xlane.f32.xlu0 %v2133_v22  ;;  %v2145_v32 = vsel %vm1682_vm0, %v3925_v39, 0.0 }
 0x2a9   :  { %v1778_v21 = vpop.xlane.xlu1 %1777 }
 0x2aa   :  { %2587 = vpow2.f32 %v1999_v33  ;;  %v1906_v55 = vsub.f32 %v3595_v37, %v1778_v21  ;;  %v2142_v37 = vsel %vm1682_vm0, %v3919_v58, 0.0 }
 0x2ab   :  { %v3928_v27 = vpop.eup %2581 }
 0x2ac   :  { %v2001_v3 = vmul.f32 1.442695, %v1906_v55  ;;  %2137 = vadd.xlane.f32.xlu1 %v2136_v7  ;;  %2140 = vadd.xlane.f32.xlu0 %v2139_v12 }
 0x2ad   :  { %v1781_v52 = vpop.xlane.xlu0 %1780 }
 0x2ae   :  { %2589 = vpow2.f32 %v2001_v3  ;;  %v1907_v19 = vsub.f32 %v3601_v5, %v1781_v52  ;;  %v2148_v5 = vsel %vm1682_vm0, %v3928_v27, 0.0 }
 0x2af   :  { %v3934_v11 = vpop.eup %2583 }
 0x2b0   :  { %v2003_v17 = vmul.f32 1.442695, %v1907_v19  ;;  %2143 = vadd.xlane.f32.xlu1 %v2142_v37  ;;  %2146 = vadd.xlane.f32.xlu0 %v2145_v32  ;;  %v2151_v25 = vsel %vm1682_vm0, %v3934_v11, 0.0 }
 0x2b1   :  { %v1784_v4 = vpop.xlane.xlu1 %1783 }
 0x2b2   :  { %2591 = vpow2.f32 %v2003_v17  ;;  %v1908_v13 = vsub.f32 %v3607_v40, %v1784_v4 }
 0x2b3   :  { %v3941_v50 = vpop.eup %2585 }
 0x2b4   :  { %v2005_v15 = vmul.f32 1.442695, %v1908_v13  ;;  %2149 = vadd.xlane.f32.xlu1 %v2148_v5  ;;  %2152 = vadd.xlane.f32.xlu0 %v2151_v25  ;;  %v2154_v40 = vsel %vm1682_vm0, %v3941_v50, 0.0 }
 0x2b5   :  { %v1787_v41 = vpop.xlane.xlu0 %1786 }
 0x2b6   :  { %2593 = vpow2.f32 %v2005_v15  ;;  %v1909_v22 = vsub.f32 %v3613_v16, %v1787_v41 }
 0x2b7   :  { %v3944_v33 = vpop.eup %2587 }
 0x2b8   :  { %v2007_v21 = vmul.f32 1.442695, %v1909_v22  ;;  %2155 = vadd.xlane.f32.xlu1 %v2154_v40  ;;  %v2157_v55 = vsel %vm1682_vm0, %v3944_v33, 0.0 }
 0x2b9   :  { %v1790_v7 = vpop.xlane.xlu1 %1789  ;;  %2158 = vadd.xlane.f32.xlu0 %v2157_v55 }
 0x2ba   :  { %2595 = vpow2.f32 %v2007_v21  ;;  %v1910_v12 = vsub.f32 %v3619_v51, %v1790_v7 }
 0x2bb   :  { %v3951_v3 = vpop.eup %2589 }
 0x2bc   :  { %v2009_v52 = vmul.f32 1.442695, %v1910_v12  ;;  %v2160_v16 = vsel %vm1682_vm0, %v3951_v3, 0.0 }
 0x2bd   :  { %2161 = vadd.xlane.f32.xlu1 %v2160_v16  ;;  %v1793_v19 = vpop.xlane.xlu0 %1792 }
 0x2be   :  { %2597 = vpow2.f32 %v2009_v52  ;;  %v1911_v37 = vsub.f32 %v3626_v1, %v1793_v19 }
 0x2bf   :  { %v3956_v32 = vpop.eup %2591 }
 0x2c0   :  { %v2011_v17 = vmul.f32 1.442695, %v1911_v37  ;;  %v2163_v4 = vsel %vm1682_vm0, %v3956_v32, 0.0 }
 0x2c1   :  { %v1796_v13 = vpop.xlane.xlu1 %1795  ;;  %2164 = vadd.xlane.f32.xlu0 %v2163_v4 }
 0x2c2   :  { %2599 = vpow2.f32 %v2011_v17  ;;  %v1912_v51 = vsub.f32 %v3633_v18, %v1796_v13 }
 0x2c3   :  { %v3961_v5 = vpop.eup %2593 }
 0x2c4   :  { %v2013_v25 = vmul.f32 1.442695, %v1912_v51  ;;  %v2166_v15 = vsel %vm1682_vm0, %v3961_v5, 0.0 }
 0x2c5   :  { %2167 = vadd.xlane.f32.xlu1 %v2166_v15  ;;  %v1799_v41 = vpop.xlane.xlu0 %1798 }
 0x2c6   :  { %2601 = vpow2.f32 %v2013_v25  ;;  %v1913_v1 = vsub.f32 %v3640_v26, %v1799_v41 }
 0x2c7   :  { %v3966_v22 = vpop.eup %2595 }
 0x2c8   :  { %v2015_v40 = vmul.f32 1.442695, %v1913_v1  ;;  %v2169_v21 = vsel %vm1682_vm0, %v3966_v22, 0.0 }
 0x2c9   :  { %v1802_v55 = vpop.xlane.xlu1 %1801  ;;  %2170 = vadd.xlane.f32.xlu0 %v2169_v21 }
 0x2ca   :  { %2603 = vpow2.f32 %v2015_v40  ;;  %v1914_v18 = vsub.f32 %v3647_v34, %v1802_v55  ;;  %v2069_v7 = vpop.xlane.xlu0 %2068 }
 0x2cb   :  { %v3971_v12 = vpop.eup %2597  ;;  %2605 = vrcp.f32 %v2069_v7 }
 0x2cc   :  { %v2017_v52 = vmul.f32 1.442695, %v1914_v18  ;;  %v2172_v16 = vsel %vm1682_vm0, %v3971_v12, 0.0 }
 0x2cd   :  { %2173 = vadd.xlane.f32.xlu1 %v2172_v16 }
 0x2ce   :  { %2607 = vpow2.f32 %v2017_v52  ;;  %v2072_v26 = vpop.xlane.xlu1 %2071  ;;  %v1805_v19 = vpop.xlane.xlu0 %1804 }
 0x2cf   :  { %v3975_v37 = vpop.eup %2599  ;;  %2609 = vrcp.f32 %v2072_v26  ;;  %v1915_v17 = vsub.f32 %v3660_v6, %v1805_v19 }
 0x2d0   :  { %v2175_v34 = vsel %vm1682_vm0, %v3975_v37, 0.0 }
 0x2d1   :  { %v2019_v4 = vmul.f32 1.442695, %v1915_v17  ;;  %2176 = vadd.xlane.f32.xlu0 %v2175_v34 }
 0x2d2   :  { %v1808_v13 = vpop.xlane.xlu1 %1807  ;;  %v2075_v51 = vpop.xlane.xlu0 %2074 }
 0x2d3   :  { %v3980_v25 = vpop.eup %2601  ;;  %2611 = vpow2.f32 %v2019_v4  ;;  %v1916_v15 = vsub.f32 %v3671_v29, %v1808_v13 }
 0x2d4   :  { %2613 = vrcp.f32 %v2075_v51  ;;  %v2178_v41 = vsel %vm1682_vm0, %v3980_v25, 0.0 }
 0x2d5   :  { %v2021_v1 = vmul.f32 1.442695, %v1916_v15  ;;  %2179 = vadd.xlane.f32.xlu1 %v2178_v41 }
 0x2d6   :  { %v2078_v40 = vpop.xlane.xlu1 %2077  ;;  %v1811_v6 = vpop.xlane.xlu0 %1810 }
 0x2d7   :  { %v3985_v21 = vpop.eup %2603  ;;  %2615 = vpow2.f32 %v2021_v1  ;;  %v1917_v55 = vsub.f32 %v3682_v36, %v1811_v6 }
 0x2d8   :  { %v2606_v18 = vpop.eup %2605  ;;  %2617 = vrcp.f32 %v2078_v40  ;;  %v2181_v7 = vsel %vm1682_vm0, %v3985_v21, 0.0 }
 0x2d9   :  { %v2323_v29 = vmul.f32 %v2606_v18, %v3650_v0  ;;  %v2023_v52 = vmul.f32 1.442695, %v1917_v55  ;;  %2182 = vadd.xlane.f32.xlu0 %v2181_v7 }
 0x2da   :  { %v1814_v16 = vpop.xlane.xlu1 %1813  ;;  %v2081_v26 = vpop.xlane.xlu0 %2080 }
 0x2db   :  { %v3991_v19 = vpop.eup %2607  ;;  %2387 = vst.msk [vmem:[%s4434_s3] sm:$0xff] %vm1682_vm0, %v2323_v29  ;;  %2619 = vpow2.f32 %v2023_v52  ;;  %v1918_v36 = vsub.f32 %v3693_v30, %v1814_v16 }
 0x2dc   :  { %v2610_v17 = vpop.eup %2609  ;;  %2621 = vrcp.f32 %v2081_v26  ;;  %v2184_v34 = vsel %vm1682_vm0, %v3991_v19, 0.0 }
 0x2dd   :  { %v2324_v0 = vmul.f32 %v2610_v17, %v3663_v23  ;;  %v2025_v4 = vmul.f32 1.442695, %v1918_v36  ;;  %2185 = vadd.xlane.f32.xlu1 %v2184_v34 }
 0x2de   :  { %v2084_v13 = vpop.xlane.xlu1 %2083  ;;  %v1817_v51 = vpop.xlane.xlu0 %1816 }
 0x2df   :  { %2388 = vst.msk [vmem:[%s4434_s3 + $0x8] sm:$0xff] %vm1682_vm0, %v2324_v0  ;;  %2623 = vpow2.f32 %v2025_v4  ;;  %v1919_v15 = vsub.f32 %v3704_v60, %v1817_v51 }
 0x2e0   :  { %v4006_v30 = vpop.eup %2611  ;;  %2625 = vrcp.f32 %v2084_v13 }
 0x2e1   :  { %v2614_v41 = vpop.eup %2613  ;;  %v2027_v1 = vmul.f32 1.442695, %v1919_v15  ;;  %v2187_v23 = vsel %vm1682_vm0, %v4006_v30, 0.0 }
 0x2e2   :  { %v2325_v40 = vmul.f32 %v2614_v41, %v3674_v35  ;;  %v1820_v6 = vpop.xlane.xlu1 %1819  ;;  %2188 = vadd.xlane.f32.xlu0 %v2187_v23  ;;  %v2087_v55 = vpop.xlane.xlu0 %2086 }
 0x2e3   :  { %2627 = vpow2.f32 %v2027_v1  ;;  %v1920_v18 = vsub.f32 %v3715_v10, %v1820_v6 }
 0x2e4   :  { %v4012_v7 = vpop.eup %2615  ;;  %2389 = vst.msk [vmem:[%s4434_s3 + $0x10] sm:$0xff] %vm1682_vm0, %v2325_v40  ;;  %2629 = vrcp.f32 %v2087_v55 }
 0x2e5   :  { %v2618_v60 = vpop.eup %2617  ;;  %v2029_v29 = vmul.f32 1.442695, %v1920_v18  ;;  %v2190_v52 = vsel %vm1682_vm0, %v4012_v7, 0.0 }
 0x2e6   :  { %v2326_v35 = vmul.f32 %v2618_v60, %v3685_v2  ;;  %2191 = vadd.xlane.f32.xlu1 %v2190_v52  ;;  %v2090_v16 = vpop.xlane.xlu1 %2089  ;;  %v1823_v26 = vpop.xlane.xlu0 %1822 }
 0x2e7   :  { %2631 = vpow2.f32 %v2029_v29  ;;  %v1921_v10 = vsub.f32 %v3726_v45, %v1823_v26 }
 0x2e8   :  { %v4022_v36 = vpop.eup %2619  ;;  %2390 = vst.msk [vmem:[%s4434_s3 + $0x18] sm:$0xff] %vm1682_vm0, %v2326_v35  ;;  %2633 = vrcp.f32 %v2090_v16 }
 0x2e9   :  { %v2622_v17 = vpop.eup %2621  ;;  %v2031_v34 = vmul.f32 1.442695, %v1921_v10  ;;  %v2193_v0 = vsel %vm1682_vm0, %v4022_v36, 0.0 }
 0x2ea   :  { %v2327_v2 = vmul.f32 %v2622_v17, %v3696_v44  ;;  %v1826_v4 = vpop.xlane.xlu1 %1825  ;;  %2194 = vadd.xlane.f32.xlu0 %v2193_v0  ;;  %v2093_v13 = vpop.xlane.xlu0 %2092 }
 0x2eb   :  { %2635 = vpow2.f32 %v2031_v34  ;;  %v1922_v45 = vsub.f32 %v3737_v42, %v1826_v4 }
 0x2ec   :  { %v4032_v51 = vpop.eup %2623  ;;  %2391 = vst.msk [vmem:[%s4434_s3 + $0x20] sm:$0xff] %vm1682_vm0, %v2327_v2  ;;  %2637 = vrcp.f32 %v2093_v13 }
 0x2ed   :  { %v2626_v15 = vpop.eup %2625  ;;  %v2033_v41 = vmul.f32 1.442695, %v1922_v45  ;;  %v2196_v1 = vsel %vm1682_vm0, %v4032_v51, 0.0 }
 0x2ee   :  { %v2328_v44 = vmul.f32 %v2626_v15, %v3707_v53  ;;  %2197 = vadd.xlane.f32.xlu1 %v2196_v1  ;;  %v2096_v23 = vpop.xlane.xlu1 %2095  ;;  %v1829_v40 = vpop.xlane.xlu0 %1828 }
 0x2ef   :  { %2639 = vpow2.f32 %v2033_v41  ;;  %v1923_v42 = vsub.f32 %v3748_v20, %v1829_v40 }
 0x2f0   :  { %v4042_v6 = vpop.eup %2627  ;;  %2392 = vst.msk [vmem:[%s4434_s3 + $0x28] sm:$0xff] %vm1682_vm0, %v2328_v44  ;;  %2641 = vrcp.f32 %v2096_v23 }
 0x2f1   :  { %v2630_v55 = vpop.eup %2629  ;;  %v2035_v18 = vmul.f32 1.442695, %v1923_v42  ;;  %v2199_v60 = vsel %vm1682_vm0, %v4042_v6, 0.0 }
 0x2f2   :  { %v2329_v53 = vmul.f32 %v2630_v55, %v3718_v63  ;;  %v1832_v29 = vpop.xlane.xlu1 %1831  ;;  %2200 = vadd.xlane.f32.xlu0 %v2199_v60  ;;  %v2099_v52 = vpop.xlane.xlu0 %2098 }
 0x2f3   :  { %2643 = vpow2.f32 %v2035_v18  ;;  %v1924_v20 = vsub.f32 %v3759_v24, %v1832_v29 }
 0x2f4   :  { %v4052_v35 = vpop.eup %2631  ;;  %2393 = vst.msk [vmem:[%s4434_s3 + $0x30] sm:$0xff] %vm1682_vm0, %v2329_v53  ;;  %2645 = vrcp.f32 %v2099_v52 }
 0x2f5   :  { %v2634_v16 = vpop.eup %2633  ;;  %v2037_v26 = vmul.f32 1.442695, %v1924_v20  ;;  %v2202_v10 = vsel %vm1682_vm0, %v4052_v35, 0.0 }
 0x2f6   :  { %v2330_v63 = vmul.f32 %v2634_v16, %v3729_v47  ;;  %2203 = vadd.xlane.f32.xlu1 %v2202_v10  ;;  %v2102_v17 = vpop.xlane.xlu1 %2101  ;;  %v1835_v34 = vpop.xlane.xlu0 %1834 }
 0x2f7   :  { %2647 = vpow2.f32 %v2037_v26  ;;  %v1925_v24 = vsub.f32 %v3770_v14, %v1835_v34  ;;  %v4501_v26 = vld [vmem:[#allocation13_spill] sm:$0xff] }
 0x2f8   :  { %v4062_v0 = vpop.eup %2635  ;;  %2394 = vst.msk [vmem:[%s4434_s3 + $0x38] sm:$0xff] %vm1682_vm0, %v2330_v63  ;;  %2649 = vrcp.f32 %v2102_v17 }
 0x2f9   :  { %v2638_v2 = vpop.eup %2637  ;;  %v2039_v4 = vmul.f32 1.442695, %v1925_v24  ;;  %v2205_v13 = vsel %vm1682_vm0, %v4062_v0, 0.0 }
 0x2fa   :  { %v2331_v47 = vmul.f32 %v2638_v2, %v3740_v46  ;;  %v1838_v45 = vpop.xlane.xlu1 %1837  ;;  %2206 = vadd.xlane.f32.xlu0 %v2205_v13  ;;  %v2105_v15 = vpop.xlane.xlu0 %2104  ;;  %v4502_v2 = vld [vmem:[#allocation9_spill] sm:$0xff] }
 0x2fb   :  { %2651 = vpow2.f32 %v2039_v4  ;;  %v1926_v14 = vsub.f32 %v3781_v61, %v1838_v45  ;;  %v4499_v61 = vld [vmem:[#allocation11_spill] sm:$0xff] }
 0x2fc   :  { %v4072_v41 = vpop.eup %2639  ;;  %2395 = vst.msk [vmem:[%s4434_s3 + $0x40] sm:$0xff] %vm1682_vm0, %v2331_v47  ;;  %2653 = vrcp.f32 %v2105_v15  ;;  %v4503_v45 = vld [vmem:[#allocation15_spill] sm:$0xff] }
 0x2fd   :  { %v2642_v1 = vpop.eup %2641  ;;  %v2041_v44 = vmul.f32 1.442695, %v1926_v14  ;;  %v2208_v23 = vsel %vm1682_vm0, %v4072_v41, 0.0 }
 0x2fe   :  { %v2332_v46 = vmul.f32 %v2642_v1, %v3751_v8  ;;  %2209 = vadd.xlane.f32.xlu1 %v2208_v23  ;;  %v2108_v40 = vpop.xlane.xlu1 %2107  ;;  %v1841_v42 = vpop.xlane.xlu0 %1840  ;;  %v4500_v8 = vld [vmem:[#allocation8_spill] sm:$0xff] }
 0x2ff   :  { %2655 = vpow2.f32 %v2041_v44  ;;  %v1927_v55 = vsub.f32 %v4499_v61, %v1841_v42 }
 0x300   :  { %v4082_v18 = vpop.eup %2643  ;;  %2396 = vst.msk [vmem:[%s4434_s3 + $0x48] sm:$0xff] %vm1682_vm0, %v2332_v46  ;;  %2657 = vrcp.f32 %v2108_v40  ;;  %v4504_v46 = vld [vmem:[#allocation10_spill] sm:$0xff] }
 0x301   :  { %v2646_v60 = vpop.eup %2645  ;;  %v2043_v53 = vmul.f32 1.442695, %v1927_v55  ;;  %v2211_v29 = vsel %vm1682_vm0, %v4082_v18, 0.0  ;;  %v4505_v55 = vld [vmem:[#allocation17_spill] sm:$0xff] }
 0x302   :  { %v2333_v52 = vmul.f32 %v2646_v60, %v4500_v8  ;;  %v1844_v20 = vpop.xlane.xlu1 %1843  ;;  %2212 = vadd.xlane.f32.xlu0 %v2211_v29  ;;  %v2111_v16 = vpop.xlane.xlu0 %2110 }
 0x303   :  { %2659 = vpow2.f32 %v2043_v53  ;;  %v1928_v10 = vsub.f32 %v4501_v26, %v1844_v20  ;;  %v4506_v20 = vld [vmem:[#allocation12_spill] sm:$0xff] }
 0x304   :  { %v4092_v63 = vpop.eup %2647  ;;  %2397 = vst.msk [vmem:[%s4434_s3 + $0x50] sm:$0xff] %vm1682_vm0, %v2333_v52  ;;  %2661 = vrcp.f32 %v2111_v16 }
 0x305   :  { %v2650_v17 = vpop.eup %2649  ;;  %v2045_v34 = vmul.f32 1.442695, %v1928_v10  ;;  %v2214_v24 = vsel %vm1682_vm0, %v4092_v63, 0.0 }
 0x306   :  { %v2334_v4 = vmul.f32 %v2650_v17, %v4502_v2  ;;  %2215 = vadd.xlane.f32.xlu1 %v2214_v24  ;;  %v2114_v13 = vpop.xlane.xlu1 %2113  ;;  %v1847_v47 = vpop.xlane.xlu0 %1846  ;;  %v4507_v17 = vld [vmem:[#allocation18_spill] sm:$0xff] }
 0x307   :  { %2663 = vpow2.f32 %v2045_v34  ;;  %v1929_v15 = vsub.f32 %v4503_v45, %v1847_v47  ;;  %v4508_v47 = vld [vmem:[#allocation14_spill] sm:$0xff] }
 0x308   :  { %v4102_v14 = vpop.eup %2651  ;;  %2398 = vst.msk [vmem:[%s4434_s3 + $0x58] sm:$0xff] %vm1682_vm0, %v2334_v4  ;;  %2665 = vrcp.f32 %v2114_v13 }
 0x309   :  { %v2654_v1 = vpop.eup %2653  ;;  %v2047_v44 = vmul.f32 1.442695, %v1929_v15  ;;  %v2217_v23 = vsel %vm1682_vm0, %v4102_v14, 0.0 }
 0x30a   :  { %v2335_v40 = vmul.f32 %v2654_v1, %v4504_v46  ;;  %v1850_v42 = vpop.xlane.xlu1 %1849  ;;  %2218 = vadd.xlane.f32.xlu0 %v2217_v23  ;;  %v2117_v61 = vpop.xlane.xlu0 %2116  ;;  %v4509_v1 = vld [vmem:[#allocation19_spill] sm:$0xff] }
 0x30b   :  { %2667 = vpow2.f32 %v2047_v44  ;;  %v1930_v60 = vsub.f32 %v4505_v55, %v1850_v42  ;;  %v4510_v55 = vld [vmem:[#allocation16_spill] sm:$0xff] }
 0x30c   :  { %v4112_v53 = vpop.eup %2655  ;;  %2399 = vst.msk [vmem:[%s4434_s3 + $0x60] sm:$0xff] %vm1682_vm0, %v2335_v40  ;;  %2669 = vrcp.f32 %v2117_v61 }
 0x30d   :  { %v2658_v29 = vpop.eup %2657  ;;  %v2049_v8 = vmul.f32 1.442695, %v1930_v60  ;;  %v2220_v52 = vsel %vm1682_vm0, %v4112_v53, 0.0 }
 0x30e   :  { %v2336_v16 = vmul.f32 %v2658_v29, %v4506_v20  ;;  %2221 = vadd.xlane.f32.xlu1 %v2220_v52  ;;  %v2120_v26 = vpop.xlane.xlu1 %2119  ;;  %v1853_v10 = vpop.xlane.xlu0 %1852  ;;  %v4511_v29 = vld [vmem:[#allocation20_spill] sm:$0xff] }
 0x30f   :  { %2671 = vpow2.f32 %v2049_v8  ;;  %v1931_v34 = vsub.f32 %v4507_v17, %v1853_v10  ;;  %v4512_v17 = vld [vmem:[#allocation25_spill] sm:$0xff] }
 0x310   :  { %v4122_v24 = vpop.eup %2659  ;;  %2400 = vst.msk [vmem:[%s4434_s3 + $0x68] sm:$0xff] %vm1682_vm0, %v2336_v16  ;;  %2673 = vrcp.f32 %v2120_v26 }
 0x311   :  { %v2662_v2 = vpop.eup %2661  ;;  %v2051_v4 = vmul.f32 1.442695, %v1931_v34  ;;  %v2223_v13 = vsel %vm1682_vm0, %v4122_v24, 0.0 }
 0x312   :  { %v2337_v45 = vmul.f32 %v2662_v2, %v4508_v47  ;;  %v1856_v15 = vpop.xlane.xlu1 %1855  ;;  %2224 = vadd.xlane.f32.xlu0 %v2223_v13 }
 0x313   :  { %2675 = vpow2.f32 %v2051_v4  ;;  %v1932_v44 = vsub.f32 %v4509_v1, %v1856_v15  ;;  %v4513_v1 = vld [vmem:[#allocation26_spill] sm:$0xff] }
 0x314   :  { %v4132_v23 = vpop.eup %2663  ;;  %2401 = vst.msk [vmem:[%s4434_s3 + $0x70] sm:$0xff] %vm1682_vm0, %v2337_v45 }
 0x315   :  { %v2666_v46 = vpop.eup %2665  ;;  %v2053_v40 = vmul.f32 1.442695, %v1932_v44  ;;  %v1859_v42 = vpop.xlane.xlu0 %1858  ;;  %v2226_v61 = vsel %vm1682_vm0, %v4132_v23, 0.0 }
 0x316   :  { %v2338_v60 = vmul.f32 %v2666_v46, %v4510_v55  ;;  %v1933_v8 = vsub.f32 %v4511_v29, %v1859_v42  ;;  %2227 = vadd.xlane.f32.xlu1 %v2226_v61 }
 0x317   :  { %2677 = vpow2.f32 %v2053_v40 }
 0x318   :  { %v4142_v52 = vpop.eup %2667  ;;  %2402 = vst.msk [vmem:[%s4434_s3 + $0x78] sm:$0xff] %vm1682_vm0, %v2338_v60  ;;  %v2055_v20 = vmul.f32 1.442695, %v1933_v8 }
 0x319   :  { %v2670_v16 = vpop.eup %2669  ;;  %v1862_v26 = vpop.xlane.xlu1 %1861  ;;  %v2229_v10 = vsel %vm1682_vm0, %v4142_v52, 0.0 }
 0x31a   :  { %v2339_v34 = vmul.f32 %v2670_v16, %v4512_v17  ;;  %2679 = vpow2.f32 %v2055_v20  ;;  %v1934_v2 = vsub.f32 %v3859_v38, %v1862_v26  ;;  %2230 = vadd.xlane.f32.xlu0 %v2229_v10 }
 0x31c   :  { %v4152_v4 = vpop.eup %2671  ;;  %2403 = vst.msk [vmem:[%s4434_s3 + $0x80] sm:$0xff] %vm1682_vm0, %v2339_v34  ;;  %v2057_v13 = vmul.f32 1.442695, %v1934_v2 }
 0x31d   :  { %v2674_v47 = vpop.eup %2673  ;;  %v1865_v45 = vpop.xlane.xlu0 %1864  ;;  %v2232_v15 = vsel %vm1682_vm0, %v4152_v4, 0.0 }
 0x31e   :  { %v2340_v44 = vmul.f32 %v2674_v47, %v4513_v1  ;;  %2681 = vpow2.f32 %v2057_v13  ;;  %v1935_v46 = vsub.f32 %v3866_v57, %v1865_v45  ;;  %2233 = vadd.xlane.f32.xlu1 %v2232_v15 }
 0x320   :  { %v4162_v38 = vpop.eup %2675  ;;  %2404 = vst.msk [vmem:[%s4434_s3 + $0x88] sm:$0xff] %vm1682_vm0, %v2340_v44  ;;  %v2059_v40 = vmul.f32 1.442695, %v1935_v46 }
 0x321   :  { %v1868_v42 = vpop.xlane.xlu1 %1867  ;;  %v2235_v61 = vsel %vm1682_vm0, %v4162_v38, 0.0 }
 0x322   :  { %2683 = vpow2.f32 %v2059_v40  ;;  %v1936_v55 = vsub.f32 %v3874_v48, %v1868_v42  ;;  %2236 = vadd.xlane.f32.xlu0 %v2235_v61 }
 0x324   :  { %v4171_v60 = vpop.eup %2677  ;;  %v2061_v57 = vmul.f32 1.442695, %v1936_v55 }
 0x325   :  { %v1871_v29 = vpop.xlane.xlu0 %1870  ;;  %v2238_v8 = vsel %vm1682_vm0, %v4171_v60, 0.0 }
 0x326   :  { %2685 = vpow2.f32 %v2061_v57  ;;  %v1937_v20 = vsub.f32 %v3882_v59, %v1871_v29  ;;  %2239 = vadd.xlane.f32.xlu1 %v2238_v8 }
 0x327   :  { %v4176_v16 = vpop.eup %2679 }
 0x328   :  { %v2063_v26 = vmul.f32 1.442695, %v1937_v20  ;;  %v2241_v10 = vsel %vm1682_vm0, %v4176_v16, 0.0 }
 0x329   :  { %v1874_v17 = vpop.xlane.xlu1 %1873  ;;  %2242 = vadd.xlane.f32.xlu0 %v2241_v10  ;;  %v2123_v48 = vpop.xlane.xlu0 %2122 }
 0x32a   :  { %2687 = vpow2.f32 %v2063_v26  ;;  %v1938_v34 = vsub.f32 %v3889_v28, %v1874_v17 }
 0x32b   :  { %v4181_v2 = vpop.eup %2681  ;;  %2689 = vrcp.f32 %v2123_v48 }
 0x32c   :  { %v2065_v13 = vmul.f32 1.442695, %v1938_v34  ;;  %v2244_v59 = vsel %vm1682_vm0, %v4181_v2, 0.0 }
 0x32d   :  { %2245 = vadd.xlane.f32.xlu1 %v2244_v59  ;;  %v2126_v47 = vpop.xlane.xlu1 %2125  ;;  %v2129_v45 = vpop.xlane.xlu0 %2128 }
 0x32e   :  { %2691 = vpow2.f32 %v2065_v13 }
 0x32f   :  { %v4185_v15 = vpop.eup %2683  ;;  %2693 = vrcp.f32 %v2126_v47 }
 0x330   :  { %2695 = vrcp.f32 %v2129_v45  ;;  %v2247_v1 = vsel %vm1682_vm0, %v4185_v15, 0.0 }
 0x331   :  { %v2132_v44 = vpop.xlane.xlu1 %2131  ;;  %2248 = vadd.xlane.f32.xlu0 %v2247_v1  ;;  %v2135_v28 = vpop.xlane.xlu0 %2134 }
 0x332   :  { %2697 = vrcp.f32 %v2132_v44 }
 0x333   :  { %v4189_v46 = vpop.eup %2685  ;;  %2699 = vrcp.f32 %v2135_v28 }
 0x334   :  { %v2250_v40 = vsel %vm1682_vm0, %v4189_v46, 0.0 }
 0x335   :  { %2251 = vadd.xlane.f32.xlu1 %v2250_v40  ;;  %v2138_v42 = vpop.xlane.xlu1 %2137  ;;  %v2141_v61 = vpop.xlane.xlu0 %2140 }
 0x336   :  { %2701 = vrcp.f32 %v2138_v42 }
 0x337   :  { %v4193_v55 = vpop.eup %2687  ;;  %2703 = vrcp.f32 %v2141_v61 }
 0x338   :  { %v2690_v57 = vpop.eup %2689  ;;  %v2253_v29 = vsel %vm1682_vm0, %v4193_v55, 0.0 }
 0x339   :  { %v2341_v8 = vmul.f32 %v2690_v57, %v3887_v49  ;;  %v2144_v20 = vpop.xlane.xlu1 %2143  ;;  %2254 = vadd.xlane.f32.xlu0 %v2253_v29  ;;  %v2147_v26 = vpop.xlane.xlu0 %2146 }
 0x33a   :  { %2705 = vrcp.f32 %v2144_v20 }
 0x33b   :  { %v4198_v10 = vpop.eup %2691  ;;  %2405 = vst.msk [vmem:[%s4434_s3 + $0x90] sm:$0xff] %vm1682_vm0, %v2341_v8  ;;  %2707 = vrcp.f32 %v2147_v26 }
 0x33c   :  { %v2694_v17 = vpop.eup %2693  ;;  %v2256_v48 = vsel %vm1682_vm0, %v4198_v10, 0.0 }
 0x33d   :  { %v2696_v34 = vpop.eup %2695  ;;  %v2342_v13 = vmul.f32 %v2694_v17, %v3892_v56  ;;  %2257 = vadd.xlane.f32.xlu1 %v2256_v48  ;;  %v2150_v49 = vpop.xlane.xlu1 %2149 }
 0x33e   :  { %v2153_v59 = vpop.xlane.xlu0 %2152  ;;  %v2343_v47 = vmul.f32 %v2696_v34, %v3898_v54  ;;  %2709 = vrcp.f32 %v2150_v49 }
 0x33f   :  { %v2698_v45 = vpop.eup %2697  ;;  %2406 = vst.msk [vmem:[%s4434_s3 + $0x98] sm:$0xff] %vm1682_vm0, %v2342_v13  ;;  %2711 = vrcp.f32 %v2153_v59 }
 0x340   :  { %v2700_v1 = vpop.eup %2699  ;;  %2407 = vst.msk [vmem:[%s4434_s3 + $0xa0] sm:$0xff] %vm1682_vm0, %v2343_v47  ;;  %v2344_v56 = vmul.f32 %v2698_v45, %v3900_v9 }
 0x341   :  { %v2345_v44 = vmul.f32 %v2700_v1, %v3903_v43  ;;  %v2156_v28 = vpop.xlane.xlu1 %2155 }
 0x342   :  { %2408 = vst.msk [vmem:[%s4434_s3 + $0xa8] sm:$0xff] %vm1682_vm0, %v2344_v56  ;;  %2713 = vrcp.f32 %v2156_v28  ;;  %v2159_v54 = vpop.xlane.xlu0 %2158 }
 0x343   :  { %v2702_v40 = vpop.eup %2701  ;;  %2409 = vst.msk [vmem:[%s4434_s3 + $0xb0] sm:$0xff] %vm1682_vm0, %v2345_v44  ;;  %2715 = vrcp.f32 %v2159_v54 }
 0x344   :  { %v2704_v42 = vpop.eup %2703  ;;  %v2346_v9 = vmul.f32 %v2702_v40, %v3910_v62 }
 0x345   :  { %v2347_v43 = vmul.f32 %v2704_v42, %v3916_v31 }
 0x346   :  { %2410 = vst.msk [vmem:[%s4434_s3 + $0xb8] sm:$0xff] %vm1682_vm0, %v2346_v9  ;;  %v2162_v61 = vpop.xlane.xlu1 %2161 }
 0x347   :  { %v2706_v57 = vpop.eup %2705  ;;  %2411 = vst.msk [vmem:[%s4434_s3 + $0xc0] sm:$0xff] %vm1682_vm0, %v2347_v43  ;;  %2717 = vrcp.f32 %v2162_v61 }
 0x348   :  { %v2708_v29 = vpop.eup %2707  ;;  %v2348_v8 = vmul.f32 %v2706_v57, %v3919_v58 }
 0x349   :  { %v2349_v62 = vmul.f32 %v2708_v29, %v3925_v39 }
 0x34a   :  { %2412 = vst.msk [vmem:[%s4434_s3 + $0xc8] sm:$0xff] %vm1682_vm0, %v2348_v8  ;;  %v2165_v31 = vpop.xlane.xlu0 %2164 }
 0x34b   :  { %v2710_v20 = vpop.eup %2709  ;;  %2413 = vst.msk [vmem:[%s4434_s3 + $0xd0] sm:$0xff] %vm1682_vm0, %v2349_v62  ;;  %2719 = vrcp.f32 %v2165_v31 }
 0x34c   :  { %v2712_v26 = vpop.eup %2711  ;;  %v2350_v17 = vmul.f32 %v2710_v20, %v3928_v27 }
 0x34d   :  { %v2351_v58 = vmul.f32 %v2712_v26, %v3934_v11 }
 0x34e   :  { %2414 = vst.msk [vmem:[%s4434_s3 + $0xd8] sm:$0xff] %vm1682_vm0, %v2350_v17  ;;  %v2168_v39 = vpop.xlane.xlu1 %2167 }
 0x34f   :  { %v2714_v48 = vpop.eup %2713  ;;  %2415 = vst.msk [vmem:[%s4434_s3 + $0xe0] sm:$0xff] %vm1682_vm0, %v2351_v58  ;;  %2721 = vrcp.f32 %v2168_v39 }
 0x350   :  { %v2716_v34 = vpop.eup %2715  ;;  %v2352_v13 = vmul.f32 %v2714_v48, %v3941_v50 }
 0x351   :  { %v2353_v27 = vmul.f32 %v2716_v34, %v3944_v33 }
 0x352   :  { %2416 = vst.msk [vmem:[%s4434_s3 + $0xe8] sm:$0xff] %vm1682_vm0, %v2352_v13  ;;  %v2171_v11 = vpop.xlane.xlu0 %2170 }
 0x353   :  { %2417 = vst.msk [vmem:[%s4434_s3 + $0xf0] sm:$0xff] %vm1682_vm0, %v2353_v27  ;;  %2723 = vrcp.f32 %v2171_v11 }
 0x354   :  { %v2718_v49 = vpop.eup %2717 }
 0x355   :  { %v2354_v59 = vmul.f32 %v2718_v49, %v3951_v3 }
 0x356   :  { %v2174_v47 = vpop.xlane.xlu1 %2173 }
 0x357   :  { %2418 = vst.msk [vmem:[%s4434_s3 + $0xf8] sm:$0xff] %vm1682_vm0, %v2354_v59  ;;  %2725 = vrcp.f32 %v2174_v47 }
 0x358   :  { %v2720_v50 = vpop.eup %2719 }
 0x359   :  { %v2355_v33 = vmul.f32 %v2720_v50, %v3956_v32 }
 0x35a   :  { %v2177_v45 = vpop.xlane.xlu0 %2176 }
 0x35b   :  { %2419 = vst.msk [vmem:[%s4434_s3 + $0x100] sm:$0xff] %vm1682_vm0, %v2355_v33  ;;  %2727 = vrcp.f32 %v2177_v45 }
 0x35c   :  { %v2722_v1 = vpop.eup %2721 }
 0x35d   :  { %v2356_v3 = vmul.f32 %v2722_v1, %v3961_v5 }
 0x35e   :  { %v2180_v56 = vpop.xlane.xlu1 %2179 }
 0x35f   :  { %2420 = vst.msk [vmem:[%s4434_s3 + $0x108] sm:$0xff] %vm1682_vm0, %v2356_v3  ;;  %2729 = vrcp.f32 %v2180_v56 }
 0x360   :  { %v2724_v44 = vpop.eup %2723 }
 0x361   :  { %v2357_v32 = vmul.f32 %v2724_v44, %v3966_v22 }
 0x362   :  { %v2183_v28 = vpop.xlane.xlu0 %2182 }
 0x363   :  { %2421 = vst.msk [vmem:[%s4434_s3 + $0x110] sm:$0xff] %vm1682_vm0, %v2357_v32  ;;  %2731 = vrcp.f32 %v2183_v28 }
 0x364   :  { %v2726_v54 = vpop.eup %2725 }
 0x365   :  { %v2358_v5 = vmul.f32 %v2726_v54, %v3971_v12 }
 0x366   :  { %v2186_v40 = vpop.xlane.xlu1 %2185 }
 0x367   :  { %2422 = vst.msk [vmem:[%s4434_s3 + $0x118] sm:$0xff] %vm1682_vm0, %v2358_v5  ;;  %2733 = vrcp.f32 %v2186_v40 }
 0x368   :  { %v2728_v42 = vpop.eup %2727 }
 0x369   :  { %v2359_v22 = vmul.f32 %v2728_v42, %v3975_v37 }
 0x36b   :  { %2423 = vst.msk [vmem:[%s4434_s3 + $0x120] sm:$0xff] %vm1682_vm0, %v2359_v22  ;;  %v2189_v9 = vpop.xlane.xlu0 %2188 }
 0x36c   :  { %v2730_v43 = vpop.eup %2729  ;;  %2735 = vrcp.f32 %v2189_v9 }
 0x36d   :  { %v2360_v12 = vmul.f32 %v2730_v43, %v3980_v25 }
 0x36f   :  { %2424 = vst.msk [vmem:[%s4434_s3 + $0x128] sm:$0xff] %vm1682_vm0, %v2360_v12  ;;  %v2192_v61 = vpop.xlane.xlu1 %2191 }
 0x370   :  { %v2732_v57 = vpop.eup %2731  ;;  %2737 = vrcp.f32 %v2192_v61 }
 0x371   :  { %v2361_v37 = vmul.f32 %v2732_v57, %v3985_v21 }
 0x373   :  { %2425 = vst.msk [vmem:[%s4434_s3 + $0x130] sm:$0xff] %vm1682_vm0, %v2361_v37  ;;  %v2195_v29 = vpop.xlane.xlu0 %2194 }
 0x374   :  { %v2734_v8 = vpop.eup %2733  ;;  %2739 = vrcp.f32 %v2195_v29 }
 0x375   :  { %v2362_v25 = vmul.f32 %v2734_v8, %v3991_v19 }
 0x377   :  { %2426 = vst.msk [vmem:[%s4434_s3 + $0x138] sm:$0xff] %vm1682_vm0, %v2362_v25  ;;  %v2198_v62 = vpop.xlane.xlu1 %2197 }
 0x378   :  { %2741 = vrcp.f32 %v2198_v62 }
 0x379   :  { %v2736_v31 = vpop.eup %2735 }
 0x37a   :  { %v2363_v21 = vmul.f32 %v2736_v31, %v4006_v30 }
 0x37b   :  { %v2201_v20 = vpop.xlane.xlu0 %2200 }
 0x37c   :  { %2427 = vst.msk [vmem:[%s4434_s3 + $0x140] sm:$0xff] %vm1682_vm0, %v2363_v21  ;;  %2743 = vrcp.f32 %v2201_v20 }
 0x37d   :  { %v2738_v26 = vpop.eup %2737 }
 0x37e   :  { %v2364_v19 = vmul.f32 %v2738_v26, %v4012_v7 }
 0x37f   :  { %v2204_v17 = vpop.xlane.xlu1 %2203 }
 0x380   :  { %2428 = vst.msk [vmem:[%s4434_s3 + $0x148] sm:$0xff] %vm1682_vm0, %v2364_v19  ;;  %2745 = vrcp.f32 %v2204_v17 }
 0x381   :  { %v2740_v58 = vpop.eup %2739 }
 0x382   :  { %v2365_v30 = vmul.f32 %v2740_v58, %v4022_v36 }
 0x383   :  { %v2207_v39 = vpop.xlane.xlu0 %2206 }
 0x384   :  { %2429 = vst.msk [vmem:[%s4434_s3 + $0x150] sm:$0xff] %vm1682_vm0, %v2365_v30  ;;  %2747 = vrcp.f32 %v2207_v39 }
 0x385   :  { %v2742_v48 = vpop.eup %2741 }
 0x386   :  { %v2366_v7 = vmul.f32 %v2742_v48, %v4032_v51 }
 0x387   :  { %v2210_v34 = vpop.xlane.xlu1 %2209 }
 0x388   :  { %2430 = vst.msk [vmem:[%s4434_s3 + $0x158] sm:$0xff] %vm1682_vm0, %v2366_v7  ;;  %2749 = vrcp.f32 %v2210_v34 }
 0x389   :  { %v2744_v13 = vpop.eup %2743 }
 0x38a   :  { %v2367_v36 = vmul.f32 %v2744_v13, %v4042_v6 }
 0x38b   :  { %v2213_v27 = vpop.xlane.xlu0 %2212 }
 0x38c   :  { %2431 = vst.msk [vmem:[%s4434_s3 + $0x160] sm:$0xff] %vm1682_vm0, %v2367_v36  ;;  %2751 = vrcp.f32 %v2213_v27 }
 0x38d   :  { %v2746_v11 = vpop.eup %2745 }
 0x38e   :  { %v2368_v51 = vmul.f32 %v2746_v11, %v4052_v35 }
 0x38f   :  { %v2216_v49 = vpop.xlane.xlu1 %2215 }
 0x390   :  { %2432 = vst.msk [vmem:[%s4434_s3 + $0x168] sm:$0xff] %vm1682_vm0, %v2368_v51  ;;  %2753 = vrcp.f32 %v2216_v49 }
 0x391   :  { %v2748_v59 = vpop.eup %2747 }
 0x392   :  { %v2369_v6 = vmul.f32 %v2748_v59, %v4062_v0 }
 0x393   :  { %v2219_v47 = vpop.xlane.xlu0 %2218 }
 0x394   :  { %2433 = vst.msk [vmem:[%s4434_s3 + $0x170] sm:$0xff] %vm1682_vm0, %v2369_v6  ;;  %2755 = vrcp.f32 %v2219_v47 }
 0x395   :  { %v2750_v50 = vpop.eup %2749 }
 0x396   :  { %v2370_v35 = vmul.f32 %v2750_v50, %v4072_v41 }
 0x397   :  { %v2222_v33 = vpop.xlane.xlu1 %2221 }
 0x398   :  { %2434 = vst.msk [vmem:[%s4434_s3 + $0x178] sm:$0xff] %vm1682_vm0, %v2370_v35  ;;  %2757 = vrcp.f32 %v2222_v33 }
 0x399   :  { %v2752_v45 = vpop.eup %2751 }
 0x39a   :  { %v2371_v0 = vmul.f32 %v2752_v45, %v4082_v18 }
 0x39b   :  { %v2225_v1 = vpop.xlane.xlu0 %2224 }
 0x39c   :  { %2435 = vst.msk [vmem:[%s4434_s3 + $0x180] sm:$0xff] %vm1682_vm0, %v2371_v0  ;;  %2759 = vrcp.f32 %v2225_v1 }
 0x39d   :  { %v2754_v3 = vpop.eup %2753 }
 0x39e   :  { %v2372_v41 = vmul.f32 %v2754_v3, %v4092_v63 }
 0x39f   :  { %v2228_v56 = vpop.xlane.xlu1 %2227 }
 0x3a0   :  { %2436 = vst.msk [vmem:[%s4434_s3 + $0x188] sm:$0xff] %vm1682_vm0, %v2372_v41  ;;  %2761 = vrcp.f32 %v2228_v56 }
 0x3a1   :  { %v2756_v44 = vpop.eup %2755 }
 0x3a2   :  { %v2373_v18 = vmul.f32 %v2756_v44, %v4102_v14 }
 0x3a3   :  { %v2231_v32 = vpop.xlane.xlu0 %2230 }
 0x3a4   :  { %2437 = vst.msk [vmem:[%s4434_s3 + $0x190] sm:$0xff] %vm1682_vm0, %v2373_v18  ;;  %2763 = vrcp.f32 %v2231_v32 }
 0x3a5   :  { %v2758_v28 = vpop.eup %2757 }
 0x3a6   :  { %v2374_v63 = vmul.f32 %v2758_v28, %v4112_v53 }
 0x3a7   :  { %v2234_v54 = vpop.xlane.xlu1 %2233 }
 0x3a8   :  { %2438 = vst.msk [vmem:[%s4434_s3 + $0x198] sm:$0xff] %vm1682_vm0, %v2374_v63  ;;  %2765 = vrcp.f32 %v2234_v54 }
 0x3a9   :  { %v2760_v5 = vpop.eup %2759 }
 0x3aa   :  { %v2375_v14 = vmul.f32 %v2760_v5, %v4122_v24 }
 0x3ab   :  { %v2237_v40 = vpop.xlane.xlu0 %2236 }
 0x3ac   :  { %2439 = vst.msk [vmem:[%s4434_s3 + $0x1a0] sm:$0xff] %vm1682_vm0, %v2375_v14  ;;  %2767 = vrcp.f32 %v2237_v40 }
 0x3ad   :  { %v2762_v42 = vpop.eup %2761 }
 0x3ae   :  { %v2376_v53 = vmul.f32 %v2762_v42, %v4132_v23 }
 0x3af   :  { %v2240_v22 = vpop.xlane.xlu1 %2239 }
 0x3b0   :  { %2440 = vst.msk [vmem:[%s4434_s3 + $0x1a8] sm:$0xff] %vm1682_vm0, %v2376_v53  ;;  %2769 = vrcp.f32 %v2240_v22 }
 0x3b1   :  { %v2764_v9 = vpop.eup %2763 }
 0x3b2   :  { %v2377_v24 = vmul.f32 %v2764_v9, %v4142_v52  ;;  %v2243_v43 = vpop.xlane.xlu0 %2242 }
 0x3b3   :  { %2771 = vrcp.f32 %v2243_v43 }
 0x3b4   :  { %2441 = vst.msk [vmem:[%s4434_s3 + $0x1b0] sm:$0xff] %vm1682_vm0, %v2377_v24 }
 0x3b5   :  { %v2766_v12 = vpop.eup %2765 }
 0x3b6   :  { %v2378_v23 = vmul.f32 %v2766_v12, %v4152_v4  ;;  %v2246_v61 = vpop.xlane.xlu1 %2245 }
 0x3b7   :  { %2773 = vrcp.f32 %v2246_v61 }
 0x3b8   :  { %2442 = vst.msk [vmem:[%s4434_s3 + $0x1b8] sm:$0xff] %vm1682_vm0, %v2378_v23 }
 0x3b9   :  { %v2768_v57 = vpop.eup %2767 }
 0x3ba   :  { %v2379_v52 = vmul.f32 %v2768_v57, %v4162_v38  ;;  %v2249_v37 = vpop.xlane.xlu0 %2248 }
 0x3bb   :  { %2775 = vrcp.f32 %v2249_v37 }
 0x3bc   :  { %2443 = vst.msk [vmem:[%s4434_s3 + $0x1c0] sm:$0xff] %vm1682_vm0, %v2379_v52 }
 0x3bd   :  { %v2770_v29 = vpop.eup %2769 }
 0x3be   :  { %v2380_v4 = vmul.f32 %v2770_v29, %v4171_v60  ;;  %v2252_v8 = vpop.xlane.xlu1 %2251 }
 0x3bf   :  { %2777 = vrcp.f32 %v2252_v8 }
 0x3c0   :  { %v2772_v25 = vpop.eup %2771  ;;  %2444 = vst.msk [vmem:[%s4434_s3 + $0x1c8] sm:$0xff] %vm1682_vm0, %v2380_v4 }
 0x3c1   :  { %v2381_v38 = vmul.f32 %v2772_v25, %v4176_v16 }
 0x3c2   :  { %v2255_v62 = vpop.xlane.xlu0 %2254 }
 0x3c3   :  { %2445 = vst.msk [vmem:[%s4434_s3 + $0x1d0] sm:$0xff] %vm1682_vm0, %v2381_v38  ;;  %2779 = vrcp.f32 %v2255_v62 }
 0x3c4   :  { %v2774_v31 = vpop.eup %2773 }
 0x3c5   :  { %v2382_v60 = vmul.f32 %v2774_v31, %v4181_v2 }
 0x3c6   :  { %v2258_v21 = vpop.xlane.xlu1 %2257 }
 0x3c7   :  { %2446 = vst.msk [vmem:[%s4434_s3 + $0x1d8] sm:$0xff] %vm1682_vm0, %v2382_v60  ;;  %2781 = vrcp.f32 %v2258_v21 }
 0x3c8   :  { %v2776_v20 = vpop.eup %2775 }
 0x3c9   :  { %v2383_v16 = vmul.f32 %v2776_v20, %v4185_v15 }
 0x3cb   :  { %2447 = vst.msk [vmem:[%s4434_s3 + $0x1e0] sm:$0xff] %vm1682_vm0, %v2383_v16 }
 0x3cc   :  { %v2778_v26 = vpop.eup %2777 }
 0x3cd   :  { %v2384_v19 = vmul.f32 %v2778_v26, %v4189_v46 }
 0x3cf   :  { %2448 = vst.msk [vmem:[%s4434_s3 + $0x1e8] sm:$0xff] %vm1682_vm0, %v2384_v19 }
 0x3d0   :  { %v2780_v2 = vpop.eup %2779 }
 0x3d1   :  { %v2385_v17 = vmul.f32 %v2780_v2, %v4193_v55 }
 0x3d3   :  { %2449 = vst.msk [vmem:[%s4434_s3 + $0x1f0] sm:$0xff] %vm1682_vm0, %v2385_v17 }
 0x3d4   :  { %v2782_v15 = vpop.eup %2781 }
 0x3d5   :  { %v2386_v58 = vmul.f32 %v2782_v15, %v4198_v10 }
 0x3d7   :  { %2450 = vst.msk [vmem:[%s4434_s3 + $0x1f8] sm:$0xff] %vm1682_vm0, %v2386_v58 }
 0x3d8   :  { %2455 = vsyncpa [#allocation3], 1 }
 0x3d9   :  { %2456 = vsyncpa [#allocation5], 1 }

</bundles_post_ra>
